<compile_context>
chip_gen: v5e
topology: v5e:2x2
jax: 0.10.0
libtpu: 0.0.40
codegen_flags: <defaults>
</compile_context>

<pallas_src>
import functools
import math

import jax
import jax.numpy as jnp
from jax.experimental import pallas as pl
from jax.experimental.pallas import tpu as pltpu

_INV_SQRT2 = math.sqrt(0.5)
_VPU_K_MAX = 8        # contraction dims <= this use exact-f32 VPU MACs
_N_K = 4              # 2x2 transposed-conv kernel positions


def _erf_approx(z):
    """Abramowitz & Stegun 7.1.26 erf approximation (|err| <= 1.5e-7)."""
    s = jnp.where(z < 0.0, -1.0, 1.0)
    a = jnp.abs(z)
    t = 1.0 / (1.0 + 0.3275911 * a)
    poly = t * (0.254829592 + t * (-0.284496736 + t * (1.421413741
               + t * (-1.453152027 + t * 1.061405429))))
    return s * (1.0 - poly * jnp.exp(-(a * a)))


def _gelu_exact(x):
    """erf-based GELU matching torch.nn.GELU(); the exp runs on the EUP slot."""
    return 0.5 * x * (1.0 + _erf_approx(x * _INV_SQRT2))


def _mix(w, x):
    """Channel contraction w @ x -> (R, T) f32.

    w is either (R, K) f32   -> one MXU matmul with f32 accumulation, or
                (K, R, 1) f32 -> K exact-f32 VPU broadcast-MACs (toy widths).
    x is (K, T) f32 with T lane-dense.
    """
    if w.ndim == 2:
        return jnp.dot(w, x, preferred_element_type=jnp.float32)
    acc = w[0] * x[0:1, :]
    for k in range(1, w.shape[0]):
        acc = acc + w[k] * x[k:k + 1, :]
    return acc


def _group_stats_kernel(x_ref, w1_ref, o_ref, s1_ref, s2_ref, *, inv_n, eps):
    """Pass 1 (GroupNorm only): per-channel mean / inv_std of the (bias-free)
    ConvTranspose output, accumulated across spatial tiles.

    grid = (B, n_tiles); the tile axis is 'arbitrary' and accumulates
    sum(u) / sum(u*u) into (C, 1) VMEM scratch.  The ConvTranspose bias is a
    per-channel constant, so it cancels in (u - mean) and is simply omitted.
    """
    t = pl.program_id(1)

    @pl.when(t == 0)
    def _():
        s1_ref[...] = jnp.zeros_like(s1_ref)
        s2_ref[...] = jnp.zeros_like(s2_ref)

    x = x_ref[0].astype(jnp.float32)                   # (C, T)
    w1 = w1_ref[...].astype(jnp.float32)               # (4, C, C[, 1])
    for k in range(_N_K):
        u = _mix(w1[k], x)                             # (C, T): one u live at a time
        s1_ref[...] += jnp.sum(u, axis=1, keepdims=True)
        s2_ref[...] += jnp.sum(u * u, axis=1, keepdims=True)

    @pl.when(t == pl.num_programs(1) - 1)
    def _():
        # TODO(synk): one-pass E[u^2]-E[u]^2 in f32; switch to a compensated
        # accumulation if very large spatial extents ever show drift.
        m = s1_ref[...] * inv_n                        # (C, 1)
        v = s2_ref[...] * inv_n - m * m
        o_ref[0, 0] = m
        o_ref[0, 1] = jax.lax.rsqrt(v + eps)


def _mednext_up_kernel(*refs, norm_type, eps):
    """Pass 2: one grid step = one (batch, spatial-tile).

    Output is blocked: o_ref[0, k] holds the ConvTranspose kernel position
    k = 2*kh + kw slab; the 2x2 interleave into (2H, 2W) happens outside
    with a cheap reshape/transpose (keeps every store lane-dense/unmasked).
    """
    if norm_type == "group":
        (x_ref, w1_ref, bt_ref, w2_ref, b2_ref, w3_ref, b3_ref,
         nwb_ref, stats_ref, o_ref) = refs
    else:
        (x_ref, w1_ref, bt_ref, w2_ref, b2_ref, w3_ref, b3_ref,
         nwb_ref, o_ref) = refs
        stats_ref = None

    x = x_ref[0].astype(jnp.float32)                   # (C, T)
    w1 = w1_ref[...].astype(jnp.float32)
    w2 = w2_ref[...].astype(jnp.float32)
    w3 = w3_ref[...].astype(jnp.float32)
    bt = bt_ref[...].astype(jnp.float32)               # (C, 1)
    b2 = b2_ref[...].astype(jnp.float32)               # (E, 1)
    b3 = b3_ref[...].astype(jnp.float32)               # (O, 1)
    gamma = nwb_ref[0].astype(jnp.float32)             # (C, 1)
    beta = nwb_ref[1].astype(jnp.float32)              # (C, 1)

    if norm_type == "group":
        # Fold (u - mean) * inv_std * gamma + beta into one per-row FMA,
        # hoisted once per tile.  conv1's bias cancels inside the norm and is
        # therefore skipped here and in the stats pass.
        mean = stats_ref[0, 0].astype(jnp.float32)     # (C, 1)
        istd = stats_ref[0, 1].astype(jnp.float32)     # (C, 1)
        scale = istd * gamma
        shift = beta - mean * scale

    for k in range(_N_K):
        u = _mix(w1[k], x)                             # (C, T)
        if norm_type == "group":
            un = u * scale + shift
        else:
            # channels_first LayerNorm: per-position stats over channels.
            u = u + bt
            mu = jnp.mean(u, axis=0, keepdims=True)    # (1, T)
            var = jnp.mean((u - mu) * (u - mu), axis=0, keepdims=True)
            un = (u - mu) * jax.lax.rsqrt(var + eps) * gamma + beta
        h = _gelu_exact(_mix(w2, un) + b2)             # (E, T)
        y = _mix(w3, h) + b3                           # (O, T)
        o_ref[0, k] = y.astype(o_ref.dtype)            # lane-dense unmasked store


def _vmem_limit_bytes():
    try:
        cap = int(pltpu.get_tpu_info().vmem_capacity_bytes)
    except Exception:
        cap = 64 * 1024 * 1024          # conservative (v7x-sized) fallback
    # ~96 MiB on v5e/v6e (128 MiB physical), ~48 MiB on v7x (64 MiB physical).
    return int(min(100 * 2 ** 20, (cap * 3) // 4))


def _pick_spatial_tile(s_total, n_rows_f32, vmem_limit):
    """Largest lane-dense (multiple-of-128) tile dividing S within budget."""
    budget = max(vmem_limit // 3, 2 * 2 ** 20)
    t_max = max(256, (budget // (n_rows_f32 * 4) // 128) * 128)
    if s_total <= t_max:
        return s_total
    t = min(t_max, (s_total // 128) * 128)
    while t >= 128:
        if s_total % t == 0:
            return t
        t -= 128
    return s_total   # no lane-dense divisor found: fall back to one block


def mednext_up_block(x, params, *, norm_type="group", eps=1e-5,
                     spatial_tile=None):
    """Forward pass of MedNeXtUpBlock (2D convs, stride=2, grn/do_res off).

    Args:
      x: (B, C, H, W) channels_first input (PyTorch layout).
      params: PyTorch-layout parameters:
        'wt': (C, C, 2, 2) ConvTranspose2d weight, 'bt': (C,)
        'norm_w', 'norm_b': (C,)
        'w2': (E, C, 1, 1), 'b2': (E,)        (E = exp_r * C)
        'w3': (O, E, 1, 1), 'b3': (O,)
      norm_type: 'group' (module default) or 'layer'.
      spatial_tile: optional override of the lane-dense spatial tile size.
    Returns: (B, O, 2H, 2W) array of x.dtype.
    """
    if norm_type not in ("group", "layer"):
        raise NotImplementedError(norm_type)
    B, C, H, W = x.shape
    S = H * W
    E = params["w2"].shape[0]
    O = params["w3"].shape[0]

    # ---- one-time weight re-layout (tiny; activations never touched here).
    # torch ConvTranspose2d weight is (Cin, Cout, kh, kw); k = 2*kh + kw.
    wt = params["wt"]
    if C > _VPU_K_MAX:
        w1 = jnp.transpose(wt, (2, 3, 1, 0)).reshape(_N_K, C, C)              # [k,co,ci]
    else:
        w1 = jnp.transpose(wt, (2, 3, 0, 1)).reshape(_N_K, C, C)[..., None]   # [k,ci]->(Cout,1)
    bt = params["bt"].reshape(C, 1)
    nwb = jnp.stack([params["norm_w"], params["norm_b"]], axis=0)[..., None]  # (2,C,1)
    w2 = params["w2"].reshape(E, C)
    w2 = w2 if C > _VPU_K_MAX else jnp.transpose(w2)[..., None]               # (E,C) | (C,E,1)
    b2 = params["b2"].reshape(E, 1)
    w3 = params["w3"].reshape(O, E)
    w3 = w3 if E > _VPU_K_MAX else jnp.transpose(w3)[..., None]               # (O,E) | (E,O,1)
    b3 = params["b3"].reshape(O, 1)

    x3 = x.reshape(B, C, S)              # contiguous metadata-only reshape

    vmem_limit = _vmem_limit_bytes()
    if spatial_tile is None:
        # f32 rows of width T live per step (double-buffered x/out blocks +
        # one u/un/h/y at a time + GELU temporaries); heuristic upper bound.
        n_rows = 4 * C + 3 * E + 9 * O + 32
        T = _pick_spatial_tile(S, n_rows, vmem_limit)
    else:
        T = int(spatial_tile)
        if S % T != 0 or (T != S and T % 128 != 0):
            raise ValueError(f"spatial_tile={T} must divide S={S} and be a "
                             "multiple of 128 (or equal S)")
    nt = S // T

    def _rep(arr):                        # grid-invariant (broadcast) spec
        nd = arr.ndim
        return pl.BlockSpec(arr.shape, lambda *_: (0,) * nd)

    # ---- pass 1 (GroupNorm only): cross-tile per-channel stats.
    stats = None
    if norm_type == "group":
        stats = pl.pallas_call(
            functools.partial(_group_stats_kernel,
                              inv_n=1.0 / float(_N_K * S), eps=eps),
            out_shape=jax.ShapeDtypeStruct((B, 2, C, 1), jnp.float32),
            grid_spec=pltpu.PrefetchScalarGridSpec(
                num_scalar_prefetch=0,
                grid=(B, nt),
                in_specs=[
                    pl.BlockSpec((1, C, T), lambda b, t: (b, 0, t)),
                    _rep(w1),
                ],
                out_specs=pl.BlockSpec((1, 2, C, 1), lambda b, t: (b, 0, 0, 0)),
                scratch_shapes=[pltpu.VMEM((C, 1), jnp.float32),
                                pltpu.VMEM((C, 1), jnp.float32)],
            ),
            compiler_params=pltpu.CompilerParams(
                dimension_semantics=("parallel", "arbitrary"),
                vmem_limit_bytes=vmem_limit,
            ),
        )(x3, w1)

    # ---- pass 2: conv1 -> norm -> conv2 -> GELU -> conv3, blocked output.
    in_arrays = [x3, w1, bt, w2, b2, w3, b3, nwb]
    in_specs = [pl.BlockSpec((1, C, T), lambda b, t: (b, 0, t)),
                _rep(w1), _rep(bt), _rep(w2), _rep(b2), _rep(w3), _rep(b3),
                _rep(nwb)]
    if norm_type == "group":
        in_arrays.append(stats)
        in_specs.append(pl.BlockSpec((1, 2, C, 1), lambda b, t: (b, 0, 0, 0)))

    out_blocked = pl.pallas_call(
        functools.partial(_mednext_up_kernel, norm_type=norm_type, eps=eps),
        out_shape=jax.ShapeDtypeStruct((B, _N_K, O, S), x.dtype),
        grid_spec=pltpu.PrefetchScalarGridSpec(
            num_scalar_prefetch=0,
            grid=(B, nt),
            in_specs=in_specs,
            out_specs=pl.BlockSpec((1, _N_K, O, T), lambda b, t: (b, 0, 0, t)),
        ),
        compiler_params=pltpu.CompilerParams(
            dimension_semantics=("parallel", "parallel"),
            vmem_limit_bytes=vmem_limit,
        ),
    )(*in_arrays)

    # ---- 2x2 spatial interleave of the blocked output (one cheap transpose):
    # out[b, o, 2h+kh, 2w+kw] = out_blocked[b, 2*kh+kw, o, h*W + w]
    y = out_blocked.reshape(B, 2, 2, O, H, W)
    y = jnp.transpose(y, (0, 3, 4, 1, 5, 2))
    return y.reshape(B, O, 2 * H, 2 * W)


def mednext_up_block_reference(x, params, *, norm_type="group", eps=1e-5):
    """Pure-JAX reference matching the PyTorch module semantics."""
    B, C, H, W = x.shape
    hp = jax.lax.Precision.HIGHEST
    u = jnp.einsum("bihw,iokl->bohkwl", x, params["wt"], precision=hp)
    u = u.reshape(B, C, 2 * H, 2 * W) + params["bt"][None, :, None, None]
    gamma = params["norm_w"][None, :, None, None]
    beta = params["norm_b"][None, :, None, None]
    if norm_type == "group":
        mu = jnp.mean(u, axis=(2, 3), keepdims=True)
        var = jnp.mean((u - mu) ** 2, axis=(2, 3), keepdims=True)
    else:
        mu = jnp.mean(u, axis=1, keepdims=True)
        var = jnp.mean((u - mu) ** 2, axis=1, keepdims=True)
    un = (u - mu) / jnp.sqrt(var + eps) * gamma + beta
    h = (jnp.einsum("ec,bchw->behw", params["w2"][:, :, 0, 0], un, precision=hp)
         + params["b2"][None, :, None, None])
    h = jax.nn.gelu(h, approximate=False)
    y = (jnp.einsum("oe,behw->bohw", params["w3"][:, :, 0, 0], h, precision=hp)
         + params["b3"][None, :, None, None])
    return y.astype(x.dtype)


if __name__ == "__main__":
    key = jax.random.PRNGKey(0)

    def make_params(k, C, E, O):
        ks = jax.random.split(k, 8)
        return {
            "wt": 0.3 * jax.random.normal(ks[0], (C, C, 2, 2), jnp.float32),
            "bt": 0.1 * jax.random.normal(ks[1], (C,), jnp.float32),
            "norm_w": 1.0 + 0.1 * jax.random.normal(ks[2], (C,), jnp.float32),
            "norm_b": 0.1 * jax.random.normal(ks[3], (C,), jnp.float32),
            "w2": 0.3 * jax.random.normal(ks[4], (E, C, 1, 1), jnp.float32),
            "b2": 0.1 * jax.random.normal(ks[5], (E,), jnp.float32),
            "w3": 0.3 * jax.random.normal(ks[6], (O, E, 1, 1), jnp.float32),
            "b3": 0.1 * jax.random.normal(ks[7], (O,), jnp.float32),
        }

    eps = 1e-5
    # (B, C, exp_r, O, H, W, spatial_tile, rel_tol)
    configs = [
        (2, 4, 4, 2, 16, 16, None, 1e-2),    # toy widths: VPU MAC conv1/conv2
        (2, 32, 4, 16, 16, 16, 128, 3e-2),   # MXU convs + 2 spatial tiles
    ]
    for (B, C, exp_r, O, H, W, tile, tol) in configs:
        E = exp_r * C
        key, pk, xk = jax.random.split(key, 3)
        params = make_params(pk, C, E, O)
        x = jax.random.normal(xk, (B, C, H, W), jnp.float32)
        for norm_type in ("group", "layer"):
            fwd = jax.jit(functools.partial(
                mednext_up_block, norm_type=norm_type, eps=eps,
                spatial_tile=tile))
            y = jax.block_until_ready(fwd(x, params))
            y_ref = mednext_up_block_reference(x, params,
                                               norm_type=norm_type, eps=eps)
            assert y.shape == (B, O, 2 * H, 2 * W), y.shape
            # Relative-RMS check: robust to the MXU's reduced-precision f32
            # matmul passes while still catching structural (O(1)) errors.
            rel = float(jnp.linalg.norm((y - y_ref).astype(jnp.float32))
                        / jnp.linalg.norm(y_ref.astype(jnp.float32)))
            assert rel < tol, (C, norm_type, rel)
    print("KERNEL_OK")
</pallas_src>

<mosaic_0001>
module attributes {stable_mosaic.version = 11 : i64} {
  func.func @_group_stats_kernel(%arg0: i32, %arg1: i32, %arg2: memref<1x4x256xf32, #tpu.memory_space<vmem>>, %arg3: memref<4x4x4x1xf32, #tpu.memory_space<vmem>>, %arg4: memref<1x2x4x1xf32, #tpu.memory_space<vmem>>, %arg5: memref<4x1xf32, #tpu.memory_space<vmem>>, %arg6: memref<4x1xf32, #tpu.memory_space<vmem>>) attributes {dimension_semantics = [#tpu.dimension_semantics<parallel>, #tpu.dimension_semantics<arbitrary>], iteration_bounds = array<i64: 2, 1>, scalar_prefetch = 0 : i64, scratch_operands = 2 : i64, tpu.core_type = #tpu.core_type<tc>, window_params = [{transform_indices = @transform_0, window_bounds = array<i64: 1, 4, 256>}, {pipeline_mode = #tpu.pipeline_mode<synchronous>, transform_indices = @transform_1, window_bounds = array<i64: 4, 4, 4, 1>}, {transform_indices = @transform_2, window_bounds = array<i64: 1, 2, 4, 1>}]} {
    %c0_i32 = arith.constant 0 : i32
    %0 = arith.cmpi eq, %arg1, %c0_i32 : i32
    %1 = arith.extui %0 : i1 to i32
    %c0_i32_0 = arith.constant 0 : i32
    %2 = arith.cmpi ne, %1, %c0_i32_0 : i32
    scf.if %2 {
      %cst_48 = arith.constant 0.000000e+00 : f32
      %169 = vector.broadcast %cst_48 : f32 to vector<4x1xf32>
      %c0_49 = arith.constant 0 : index
      %c0_50 = arith.constant 0 : index
      %170 = vector.load %arg5[%c0_49, %c0_50] : memref<4x1xf32, #tpu.memory_space<vmem>>, vector<4x1xf32>
      tpu.vector_store %arg5[%c0_49, %c0_50], %169 {strides = array<i32>} : memref<4x1xf32, #tpu.memory_space<vmem>>, vector<4x1xf32>,
      %cst_51 = arith.constant 0.000000e+00 : f32
      %171 = vector.broadcast %cst_51 : f32 to vector<4x1xf32>
      %c0_52 = arith.constant 0 : index
      %c0_53 = arith.constant 0 : index
      %172 = vector.load %arg6[%c0_52, %c0_53] : memref<4x1xf32, #tpu.memory_space<vmem>>, vector<4x1xf32>
      tpu.vector_store %arg6[%c0_52, %c0_53], %171 {strides = array<i32>} : memref<4x1xf32, #tpu.memory_space<vmem>>, vector<4x1xf32>,
    } else {
    }
    %c0 = arith.constant 0 : index
    %c0_1 = arith.constant 0 : index
    %c0_2 = arith.constant 0 : index
    %3 = vector.load %arg2[%c0, %c0_1, %c0_2] : memref<1x4x256xf32, #tpu.memory_space<vmem>>, vector<1x4x256xf32>
    %4 = vector.shape_cast %3 : vector<1x4x256xf32> to vector<4x256xf32>
    %c0_3 = arith.constant 0 : index
    %c0_4 = arith.constant 0 : index
    %c0_5 = arith.constant 0 : index
    %c0_6 = arith.constant 0 : index
    %5 = vector.load %arg3[%c0_3, %c0_4, %c0_5, %c0_6] : memref<4x4x4x1xf32, #tpu.memory_space<vmem>>, vector<4x4x4x1xf32>
    %6 = vector.extract_strided_slice %5 {offsets = [0, 0, 0, 0], sizes = [1, 4, 4, 1], strides = [1, 1, 1, 1]} : vector<4x4x4x1xf32> to vector<1x4x4x1xf32>
    %7 = vector.shape_cast %6 : vector<1x4x4x1xf32> to vector<4x4x1xf32>
    %8 = vector.extract_strided_slice %7 {offsets = [0, 0, 0], sizes = [1, 4, 1], strides = [1, 1, 1]} : vector<4x4x1xf32> to vector<1x4x1xf32>
    %9 = vector.shape_cast %8 : vector<1x4x1xf32> to vector<4x1xf32>
    %10 = vector.extract_strided_slice %4 {offsets = [0, 0], sizes = [1, 256], strides = [1, 1]} : vector<4x256xf32> to vector<1x256xf32>
    %11 = vector.broadcast %9 : vector<4x1xf32> to vector<4x256xf32>
    %12 = vector.broadcast %10 : vector<1x256xf32> to vector<4x256xf32>
    %13 = arith.mulf %11, %12 : vector<4x256xf32>
    %14 = vector.extract_strided_slice %7 {offsets = [1, 0, 0], sizes = [1, 4, 1], strides = [1, 1, 1]} : vector<4x4x1xf32> to vector<1x4x1xf32>
    %15 = vector.shape_cast %14 : vector<1x4x1xf32> to vector<4x1xf32>
    %16 = vector.extract_strided_slice %4 {offsets = [1, 0], sizes = [1, 256], strides = [1, 1]} : vector<4x256xf32> to vector<1x256xf32>
    %17 = vector.broadcast %15 : vector<4x1xf32> to vector<4x256xf32>
    %18 = vector.broadcast %16 : vector<1x256xf32> to vector<4x256xf32>
    %19 = arith.mulf %17, %18 : vector<4x256xf32>
    %20 = arith.addf %13, %19 : vector<4x256xf32>
    %21 = vector.extract_strided_slice %7 {offsets = [2, 0, 0], sizes = [1, 4, 1], strides = [1, 1, 1]} : vector<4x4x1xf32> to vector<1x4x1xf32>
    %22 = vector.shape_cast %21 : vector<1x4x1xf32> to vector<4x1xf32>
    %23 = vector.extract_strided_slice %4 {offsets = [2, 0], sizes = [1, 256], strides = [1, 1]} : vector<4x256xf32> to vector<1x256xf32>
    %24 = vector.broadcast %22 : vector<4x1xf32> to vector<4x256xf32>
    %25 = vector.broadcast %23 : vector<1x256xf32> to vector<4x256xf32>
    %26 = arith.mulf %24, %25 : vector<4x256xf32>
    %27 = arith.addf %20, %26 : vector<4x256xf32>
    %28 = vector.extract_strided_slice %7 {offsets = [3, 0, 0], sizes = [1, 4, 1], strides = [1, 1, 1]} : vector<4x4x1xf32> to vector<1x4x1xf32>
    %29 = vector.shape_cast %28 : vector<1x4x1xf32> to vector<4x1xf32>
    %30 = vector.extract_strided_slice %4 {offsets = [3, 0], sizes = [1, 256], strides = [1, 1]} : vector<4x256xf32> to vector<1x256xf32>
    %31 = vector.broadcast %29 : vector<4x1xf32> to vector<4x256xf32>
    %32 = vector.broadcast %30 : vector<1x256xf32> to vector<4x256xf32>
    %33 = arith.mulf %31, %32 : vector<4x256xf32>
    %34 = arith.addf %27, %33 : vector<4x256xf32>
    %c0_7 = arith.constant 0 : index
    %c0_8 = arith.constant 0 : index
    %35 = vector.load %arg5[%c0_7, %c0_8] : memref<4x1xf32, #tpu.memory_space<vmem>>, vector<4x1xf32>
    %cst = arith.constant dense<0.000000e+00> : vector<4xf32>
    %36 = vector.multi_reduction <add>, %34, %cst [1] : vector<4x256xf32> to vector<4xf32>
    %37 = vector.shape_cast %36 : vector<4xf32> to vector<4x1xf32>
    %38 = arith.addf %35, %37 : vector<4x1xf32>
    %c0_9 = arith.constant 0 : index
    %c0_10 = arith.constant 0 : index
    %39 = vector.load %arg5[%c0_9, %c0_10] : memref<4x1xf32, #tpu.memory_space<vmem>>, vector<4x1xf32>
    tpu.vector_store %arg5[%c0_9, %c0_10], %38 {strides = array<i32>} : memref<4x1xf32, #tpu.memory_space<vmem>>, vector<4x1xf32>,
    %c0_11 = arith.constant 0 : index
    %c0_12 = arith.constant 0 : index
    %40 = vector.load %arg6[%c0_11, %c0_12] : memref<4x1xf32, #tpu.memory_space<vmem>>, vector<4x1xf32>
    %41 = arith.mulf %34, %34 : vector<4x256xf32>
    %cst_13 = arith.constant dense<0.000000e+00> : vector<4xf32>
    %42 = vector.multi_reduction <add>, %41, %cst_13 [1] : vector<4x256xf32> to vector<4xf32>
    %43 = vector.shape_cast %42 : vector<4xf32> to vector<4x1xf32>
    %44 = arith.addf %40, %43 : vector<4x1xf32>
    %c0_14 = arith.constant 0 : index
    %c0_15 = arith.constant 0 : index
    %45 = vector.load %arg6[%c0_14, %c0_15] : memref<4x1xf32, #tpu.memory_space<vmem>>, vector<4x1xf32>
    tpu.vector_store %arg6[%c0_14, %c0_15], %44 {strides = array<i32>} : memref<4x1xf32, #tpu.memory_space<vmem>>, vector<4x1xf32>,
    %46 = vector.extract_strided_slice %5 {offsets = [1, 0, 0, 0], sizes = [1, 4, 4, 1], strides = [1, 1, 1, 1]} : vector<4x4x4x1xf32> to vector<1x4x4x1xf32>
    %47 = vector.shape_cast %46 : vector<1x4x4x1xf32> to vector<4x4x1xf32>
    %48 = vector.extract_strided_slice %47 {offsets = [0, 0, 0], sizes = [1, 4, 1], strides = [1, 1, 1]} : vector<4x4x1xf32> to vector<1x4x1xf32>
    %49 = vector.shape_cast %48 : vector<1x4x1xf32> to vector<4x1xf32>
    %50 = vector.extract_strided_slice %4 {offsets = [0, 0], sizes = [1, 256], strides = [1, 1]} : vector<4x256xf32> to vector<1x256xf32>
    %51 = vector.broadcast %49 : vector<4x1xf32> to vector<4x256xf32>
    %52 = vector.broadcast %50 : vector<1x256xf32> to vector<4x256xf32>
    %53 = arith.mulf %51, %52 : vector<4x256xf32>
    %54 = vector.extract_strided_slice %47 {offsets = [1, 0, 0], sizes = [1, 4, 1], strides = [1, 1, 1]} : vector<4x4x1xf32> to vector<1x4x1xf32>
    %55 = vector.shape_cast %54 : vector<1x4x1xf32> to vector<4x1xf32>
    %56 = vector.extract_strided_slice %4 {offsets = [1, 0], sizes = [1, 256], strides = [1, 1]} : vector<4x256xf32> to vector<1x256xf32>
    %57 = vector.broadcast %55 : vector<4x1xf32> to vector<4x256xf32>
    %58 = vector.broadcast %56 : vector<1x256xf32> to vector<4x256xf32>
    %59 = arith.mulf %57, %58 : vector<4x256xf32>
    %60 = arith.addf %53, %59 : vector<4x256xf32>
    %61 = vector.extract_strided_slice %47 {offsets = [2, 0, 0], sizes = [1, 4, 1], strides = [1, 1, 1]} : vector<4x4x1xf32> to vector<1x4x1xf32>
    %62 = vector.shape_cast %61 : vector<1x4x1xf32> to vector<4x1xf32>
    %63 = vector.extract_strided_slice %4 {offsets = [2, 0], sizes = [1, 256], strides = [1, 1]} : vector<4x256xf32> to vector<1x256xf32>
    %64 = vector.broadcast %62 : vector<4x1xf32> to vector<4x256xf32>
    %65 = vector.broadcast %63 : vector<1x256xf32> to vector<4x256xf32>
    %66 = arith.mulf %64, %65 : vector<4x256xf32>
    %67 = arith.addf %60, %66 : vector<4x256xf32>
    %68 = vector.extract_strided_slice %47 {offsets = [3, 0, 0], sizes = [1, 4, 1], strides = [1, 1, 1]} : vector<4x4x1xf32> to vector<1x4x1xf32>
    %69 = vector.shape_cast %68 : vector<1x4x1xf32> to vector<4x1xf32>
    %70 = vector.extract_strided_slice %4 {offsets = [3, 0], sizes = [1, 256], strides = [1, 1]} : vector<4x256xf32> to vector<1x256xf32>
    %71 = vector.broadcast %69 : vector<4x1xf32> to vector<4x256xf32>
    %72 = vector.broadcast %70 : vector<1x256xf32> to vector<4x256xf32>
    %73 = arith.mulf %71, %72 : vector<4x256xf32>
    %74 = arith.addf %67, %73 : vector<4x256xf32>
    %c0_16 = arith.constant 0 : index
    %c0_17 = arith.constant 0 : index
    %75 = vector.load %arg5[%c0_16, %c0_17] : memref<4x1xf32, #tpu.memory_space<vmem>>, vector<4x1xf32>
    %cst_18 = arith.constant dense<0.000000e+00> : vector<4xf32>
    %76 = vector.multi_reduction <add>, %74, %cst_18 [1] : vector<4x256xf32> to vector<4xf32>
    %77 = vector.shape_cast %76 : vector<4xf32> to vector<4x1xf32>
    %78 = arith.addf %75, %77 : vector<4x1xf32>
    %c0_19 = arith.constant 0 : index
    %c0_20 = arith.constant 0 : index
    %79 = vector.load %arg5[%c0_19, %c0_20] : memref<4x1xf32, #tpu.memory_space<vmem>>, vector<4x1xf32>
    tpu.vector_store %arg5[%c0_19, %c0_20], %78 {strides = array<i32>} : memref<4x1xf32, #tpu.memory_space<vmem>>, vector<4x1xf32>,
    %c0_21 = arith.constant 0 : index
    %c0_22 = arith.constant 0 : index
    %80 = vector.load %arg6[%c0_21, %c0_22] : memref<4x1xf32, #tpu.memory_space<vmem>>, vector<4x1xf32>
    %81 = arith.mulf %74, %74 : vector<4x256xf32>
    %cst_23 = arith.constant dense<0.000000e+00> : vector<4xf32>
    %82 = vector.multi_reduction <add>, %81, %cst_23 [1] : vector<4x256xf32> to vector<4xf32>
    %83 = vector.shape_cast %82 : vector<4xf32> to vector<4x1xf32>
    %84 = arith.addf %80, %83 : vector<4x1xf32>
    %c0_24 = arith.constant 0 : index
    %c0_25 = arith.constant 0 : index
    %85 = vector.load %arg6[%c0_24, %c0_25] : memref<4x1xf32, #tpu.memory_space<vmem>>, vector<4x1xf32>
    tpu.vector_store %arg6[%c0_24, %c0_25], %84 {strides = array<i32>} : memref<4x1xf32, #tpu.memory_space<vmem>>, vector<4x1xf32>,
    %86 = vector.extract_strided_slice %5 {offsets = [2, 0, 0, 0], sizes = [1, 4, 4, 1], strides = [1, 1, 1, 1]} : vector<4x4x4x1xf32> to vector<1x4x4x1xf32>
    %87 = vector.shape_cast %86 : vector<1x4x4x1xf32> to vector<4x4x1xf32>
    %88 = vector.extract_strided_slice %87 {offsets = [0, 0, 0], sizes = [1, 4, 1], strides = [1, 1, 1]} : vector<4x4x1xf32> to vector<1x4x1xf32>
    %89 = vector.shape_cast %88 : vector<1x4x1xf32> to vector<4x1xf32>
    %90 = vector.extract_strided_slice %4 {offsets = [0, 0], sizes = [1, 256], strides = [1, 1]} : vector<4x256xf32> to vector<1x256xf32>
    %91 = vector.broadcast %89 : vector<4x1xf32> to vector<4x256xf32>
    %92 = vector.broadcast %90 : vector<1x256xf32> to vector<4x256xf32>
    %93 = arith.mulf %91, %92 : vector<4x256xf32>
    %94 = vector.extract_strided_slice %87 {offsets = [1, 0, 0], sizes = [1, 4, 1], strides = [1, 1, 1]} : vector<4x4x1xf32> to vector<1x4x1xf32>
    %95 = vector.shape_cast %94 : vector<1x4x1xf32> to vector<4x1xf32>
    %96 = vector.extract_strided_slice %4 {offsets = [1, 0], sizes = [1, 256], strides = [1, 1]} : vector<4x256xf32> to vector<1x256xf32>
    %97 = vector.broadcast %95 : vector<4x1xf32> to vector<4x256xf32>
    %98 = vector.broadcast %96 : vector<1x256xf32> to vector<4x256xf32>
    %99 = arith.mulf %97, %98 : vector<4x256xf32>
    %100 = arith.addf %93, %99 : vector<4x256xf32>
    %101 = vector.extract_strided_slice %87 {offsets = [2, 0, 0], sizes = [1, 4, 1], strides = [1, 1, 1]} : vector<4x4x1xf32> to vector<1x4x1xf32>
    %102 = vector.shape_cast %101 : vector<1x4x1xf32> to vector<4x1xf32>
    %103 = vector.extract_strided_slice %4 {offsets = [2, 0], sizes = [1, 256], strides = [1, 1]} : vector<4x256xf32> to vector<1x256xf32>
    %104 = vector.broadcast %102 : vector<4x1xf32> to vector<4x256xf32>
    %105 = vector.broadcast %103 : vector<1x256xf32> to vector<4x256xf32>
    %106 = arith.mulf %104, %105 : vector<4x256xf32>
    %107 = arith.addf %100, %106 : vector<4x256xf32>
    %108 = vector.extract_strided_slice %87 {offsets = [3, 0, 0], sizes = [1, 4, 1], strides = [1, 1, 1]} : vector<4x4x1xf32> to vector<1x4x1xf32>
    %109 = vector.shape_cast %108 : vector<1x4x1xf32> to vector<4x1xf32>
    %110 = vector.extract_strided_slice %4 {offsets = [3, 0], sizes = [1, 256], strides = [1, 1]} : vector<4x256xf32> to vector<1x256xf32>
    %111 = vector.broadcast %109 : vector<4x1xf32> to vector<4x256xf32>
    %112 = vector.broadcast %110 : vector<1x256xf32> to vector<4x256xf32>
    %113 = arith.mulf %111, %112 : vector<4x256xf32>
    %114 = arith.addf %107, %113 : vector<4x256xf32>
    %c0_26 = arith.constant 0 : index
    %c0_27 = arith.constant 0 : index
    %115 = vector.load %arg5[%c0_26, %c0_27] : memref<4x1xf32, #tpu.memory_space<vmem>>, vector<4x1xf32>
    %cst_28 = arith.constant dense<0.000000e+00> : vector<4xf32>
    %116 = vector.multi_reduction <add>, %114, %cst_28 [1] : vector<4x256xf32> to vector<4xf32>
    %117 = vector.shape_cast %116 : vector<4xf32> to vector<4x1xf32>
    %118 = arith.addf %115, %117 : vector<4x1xf32>
    %c0_29 = arith.constant 0 : index
    %c0_30 = arith.constant 0 : index
    %119 = vector.load %arg5[%c0_29, %c0_30] : memref<4x1xf32, #tpu.memory_space<vmem>>, vector<4x1xf32>
    tpu.vector_store %arg5[%c0_29, %c0_30], %118 {strides = array<i32>} : memref<4x1xf32, #tpu.memory_space<vmem>>, vector<4x1xf32>,
    %c0_31 = arith.constant 0 : index
    %c0_32 = arith.constant 0 : index
    %120 = vector.load %arg6[%c0_31, %c0_32] : memref<4x1xf32, #tpu.memory_space<vmem>>, vector<4x1xf32>
    %121 = arith.mulf %114, %114 : vector<4x256xf32>
    %cst_33 = arith.constant dense<0.000000e+00> : vector<4xf32>
    %122 = vector.multi_reduction <add>, %121, %cst_33 [1] : vector<4x256xf32> to vector<4xf32>
    %123 = vector.shape_cast %122 : vector<4xf32> to vector<4x1xf32>
    %124 = arith.addf %120, %123 : vector<4x1xf32>
    %c0_34 = arith.constant 0 : index
    %c0_35 = arith.constant 0 : index
    %125 = vector.load %arg6[%c0_34, %c0_35] : memref<4x1xf32, #tpu.memory_space<vmem>>, vector<4x1xf32>
    tpu.vector_store %arg6[%c0_34, %c0_35], %124 {strides = array<i32>} : memref<4x1xf32, #tpu.memory_space<vmem>>, vector<4x1xf32>,
    %126 = vector.extract_strided_slice %5 {offsets = [3, 0, 0, 0], sizes = [1, 4, 4, 1], strides = [1, 1, 1, 1]} : vector<4x4x4x1xf32> to vector<1x4x4x1xf32>
    %127 = vector.shape_cast %126 : vector<1x4x4x1xf32> to vector<4x4x1xf32>
    %128 = vector.extract_strided_slice %127 {offsets = [0, 0, 0], sizes = [1, 4, 1], strides = [1, 1, 1]} : vector<4x4x1xf32> to vector<1x4x1xf32>
    %129 = vector.shape_cast %128 : vector<1x4x1xf32> to vector<4x1xf32>
    %130 = vector.extract_strided_slice %4 {offsets = [0, 0], sizes = [1, 256], strides = [1, 1]} : vector<4x256xf32> to vector<1x256xf32>
    %131 = vector.broadcast %129 : vector<4x1xf32> to vector<4x256xf32>
    %132 = vector.broadcast %130 : vector<1x256xf32> to vector<4x256xf32>
    %133 = arith.mulf %131, %132 : vector<4x256xf32>
    %134 = vector.extract_strided_slice %127 {offsets = [1, 0, 0], sizes = [1, 4, 1], strides = [1, 1, 1]} : vector<4x4x1xf32> to vector<1x4x1xf32>
    %135 = vector.shape_cast %134 : vector<1x4x1xf32> to vector<4x1xf32>
    %136 = vector.extract_strided_slice %4 {offsets = [1, 0], sizes = [1, 256], strides = [1, 1]} : vector<4x256xf32> to vector<1x256xf32>
    %137 = vector.broadcast %135 : vector<4x1xf32> to vector<4x256xf32>
    %138 = vector.broadcast %136 : vector<1x256xf32> to vector<4x256xf32>
    %139 = arith.mulf %137, %138 : vector<4x256xf32>
    %140 = arith.addf %133, %139 : vector<4x256xf32>
    %141 = vector.extract_strided_slice %127 {offsets = [2, 0, 0], sizes = [1, 4, 1], strides = [1, 1, 1]} : vector<4x4x1xf32> to vector<1x4x1xf32>
    %142 = vector.shape_cast %141 : vector<1x4x1xf32> to vector<4x1xf32>
    %143 = vector.extract_strided_slice %4 {offsets = [2, 0], sizes = [1, 256], strides = [1, 1]} : vector<4x256xf32> to vector<1x256xf32>
    %144 = vector.broadcast %142 : vector<4x1xf32> to vector<4x256xf32>
    %145 = vector.broadcast %143 : vector<1x256xf32> to vector<4x256xf32>
    %146 = arith.mulf %144, %145 : vector<4x256xf32>
    %147 = arith.addf %140, %146 : vector<4x256xf32>
    %148 = vector.extract_strided_slice %127 {offsets = [3, 0, 0], sizes = [1, 4, 1], strides = [1, 1, 1]} : vector<4x4x1xf32> to vector<1x4x1xf32>
    %149 = vector.shape_cast %148 : vector<1x4x1xf32> to vector<4x1xf32>
    %150 = vector.extract_strided_slice %4 {offsets = [3, 0], sizes = [1, 256], strides = [1, 1]} : vector<4x256xf32> to vector<1x256xf32>
    %151 = vector.broadcast %149 : vector<4x1xf32> to vector<4x256xf32>
    %152 = vector.broadcast %150 : vector<1x256xf32> to vector<4x256xf32>
    %153 = arith.mulf %151, %152 : vector<4x256xf32>
    %154 = arith.addf %147, %153 : vector<4x256xf32>
    %c0_36 = arith.constant 0 : index
    %c0_37 = arith.constant 0 : index
    %155 = vector.load %arg5[%c0_36, %c0_37] : memref<4x1xf32, #tpu.memory_space<vmem>>, vector<4x1xf32>
    %cst_38 = arith.constant dense<0.000000e+00> : vector<4xf32>
    %156 = vector.multi_reduction <add>, %154, %cst_38 [1] : vector<4x256xf32> to vector<4xf32>
    %157 = vector.shape_cast %156 : vector<4xf32> to vector<4x1xf32>
    %158 = arith.addf %155, %157 : vector<4x1xf32>
    %c0_39 = arith.constant 0 : index
    %c0_40 = arith.constant 0 : index
    %159 = vector.load %arg5[%c0_39, %c0_40] : memref<4x1xf32, #tpu.memory_space<vmem>>, vector<4x1xf32>
    tpu.vector_store %arg5[%c0_39, %c0_40], %158 {strides = array<i32>} : memref<4x1xf32, #tpu.memory_space<vmem>>, vector<4x1xf32>,
    %c0_41 = arith.constant 0 : index
    %c0_42 = arith.constant 0 : index
    %160 = vector.load %arg6[%c0_41, %c0_42] : memref<4x1xf32, #tpu.memory_space<vmem>>, vector<4x1xf32>
    %161 = arith.mulf %154, %154 : vector<4x256xf32>
    %cst_43 = arith.constant dense<0.000000e+00> : vector<4xf32>
    %162 = vector.multi_reduction <add>, %161, %cst_43 [1] : vector<4x256xf32> to vector<4xf32>
    %163 = vector.shape_cast %162 : vector<4xf32> to vector<4x1xf32>
    %164 = arith.addf %160, %163 : vector<4x1xf32>
    %c0_44 = arith.constant 0 : index
    %c0_45 = arith.constant 0 : index
    %165 = vector.load %arg6[%c0_44, %c0_45] : memref<4x1xf32, #tpu.memory_space<vmem>>, vector<4x1xf32>
    tpu.vector_store %arg6[%c0_44, %c0_45], %164 {strides = array<i32>} : memref<4x1xf32, #tpu.memory_space<vmem>>, vector<4x1xf32>,
    %c0_i32_46 = arith.constant 0 : i32
    %166 = arith.cmpi eq, %arg1, %c0_i32_46 : i32
    %167 = arith.extui %166 : i1 to i32
    %c0_i32_47 = arith.constant 0 : i32
    %168 = arith.cmpi ne, %167, %c0_i32_47 : i32
    scf.if %168 {
      %c0_48 = arith.constant 0 : index
      %c0_49 = arith.constant 0 : index
      %169 = vector.load %arg5[%c0_48, %c0_49] : memref<4x1xf32, #tpu.memory_space<vmem>>, vector<4x1xf32>
      %cst_50 = arith.constant 9.765625E-4 : f32
      %170 = vector.broadcast %cst_50 : f32 to vector<4x1xf32>
      %171 = arith.mulf %169, %170 : vector<4x1xf32>
      %c0_51 = arith.constant 0 : index
      %c0_52 = arith.constant 0 : index
      %172 = vector.load %arg6[%c0_51, %c0_52] : memref<4x1xf32, #tpu.memory_space<vmem>>, vector<4x1xf32>
      %cst_53 = arith.constant 9.765625E-4 : f32
      %173 = vector.broadcast %cst_53 : f32 to vector<4x1xf32>
      %174 = arith.mulf %172, %173 : vector<4x1xf32>
      %175 = arith.mulf %171, %171 : vector<4x1xf32>
      %176 = arith.subf %174, %175 : vector<4x1xf32>
      %c0_54 = arith.constant 0 : index
      %c0_55 = arith.constant 0 : index
      %c0_56 = arith.constant 0 : index
      %c0_57 = arith.constant 0 : index
      %177 = vector.load %arg4[%c0_54, %c0_55, %c0_56, %c0_57] : memref<1x2x4x1xf32, #tpu.memory_space<vmem>>, vector<1x1x4x1xf32>
      %178 = vector.shape_cast %177 : vector<1x1x4x1xf32> to vector<4x1xf32>
      %179 = vector.shape_cast %171 : vector<4x1xf32> to vector<1x1x4x1xf32>
      tpu.vector_store %arg4[%c0_54, %c0_55, %c0_56, %c0_57], %179 {strides = array<i32>} : memref<1x2x4x1xf32, #tpu.memory_space<vmem>>, vector<1x1x4x1xf32>,
      %cst_58 = arith.constant 9.99999974E-6 : f32
      %180 = vector.broadcast %cst_58 : f32 to vector<4x1xf32>
      %181 = arith.addf %176, %180 : vector<4x1xf32>
      %182 = math.rsqrt %181 : vector<4x1xf32>
      %c0_59 = arith.constant 0 : index
      %c1 = arith.constant 1 : index
      %c0_60 = arith.constant 0 : index
      %c0_61 = arith.constant 0 : index
      %183 = vector.load %arg4[%c0_59, %c1, %c0_60, %c0_61] : memref<1x2x4x1xf32, #tpu.memory_space<vmem>>, vector<1x1x4x1xf32>
      %184 = vector.shape_cast %183 : vector<1x1x4x1xf32> to vector<4x1xf32>
      %185 = vector.shape_cast %182 : vector<4x1xf32> to vector<1x1x4x1xf32>
      tpu.vector_store %arg4[%c0_59, %c1, %c0_60, %c0_61], %185 {strides = array<i32>} : memref<1x2x4x1xf32, #tpu.memory_space<vmem>>, vector<1x1x4x1xf32>,
    } else {
    }
    return
  }
  func.func @transform_0(%arg0: i32, %arg1: i32) -> (i32, i32, i32) {
    %c0_i32 = arith.constant 0 : i32
    %c0_i32_0 = arith.constant 0 : i32
    return %arg0, %c0_i32, %arg1 : i32, i32, i32
  }
  func.func @transform_1(%arg0: i32, %arg1: i32) -> (i32, i32, i32, i32) {
    %c0_i32 = arith.constant 0 : i32
    %c0_i32_0 = arith.constant 0 : i32
    %c0_i32_1 = arith.constant 0 : i32
    %c0_i32_2 = arith.constant 0 : i32
    %c0_i32_3 = arith.constant 0 : i32
    return %c0_i32, %c0_i32_0, %c0_i32_1, %c0_i32_2 : i32, i32, i32, i32
  }
  func.func @transform_2(%arg0: i32, %arg1: i32) -> (i32, i32, i32, i32) {
    %c0_i32 = arith.constant 0 : i32
    %c0_i32_0 = arith.constant 0 : i32
    %c0_i32_1 = arith.constant 0 : i32
    %c0_i32_2 = arith.constant 0 : i32
    return %arg0, %c0_i32, %c0_i32_0, %c0_i32_1 : i32, i32, i32, i32
  }
}

module attributes {stable_mosaic.version = 11 : i64} {
  func.func @_mednext_up_kernel(%arg0: i32, %arg1: i32, %arg2: memref<1x4x256xf32, #tpu.memory_space<vmem>>, %arg3: memref<4x4x4x1xf32, #tpu.memory_space<vmem>>, %arg4: memref<4x1xf32, #tpu.memory_space<vmem>>, %arg5: memref<4x16x1xf32, #tpu.memory_space<vmem>>, %arg6: memref<16x1xf32, #tpu.memory_space<vmem>>, %arg7: memref<2x16xf32, #tpu.memory_space<vmem>>, %arg8: memref<2x1xf32, #tpu.memory_space<vmem>>, %arg9: memref<2x4x1xf32, #tpu.memory_space<vmem>>, %arg10: memref<1x2x4x1xf32, #tpu.memory_space<vmem>>, %arg11: memref<1x4x2x256xf32, #tpu.memory_space<vmem>>) attributes {dimension_semantics = [#tpu.dimension_semantics<parallel>, #tpu.dimension_semantics<parallel>], iteration_bounds = array<i64: 2, 1>, scalar_prefetch = 0 : i64, scratch_operands = 0 : i64, tpu.core_type = #tpu.core_type<tc>, window_params = [{transform_indices = @transform_0, window_bounds = array<i64: 1, 4, 256>}, {pipeline_mode = #tpu.pipeline_mode<synchronous>, transform_indices = @transform_1, window_bounds = array<i64: 4, 4, 4, 1>}, {pipeline_mode = #tpu.pipeline_mode<synchronous>, transform_indices = @transform_2, window_bounds = array<i64: 4, 1>}, {pipeline_mode = #tpu.pipeline_mode<synchronous>, transform_indices = @transform_3, window_bounds = array<i64: 4, 16, 1>}, {pipeline_mode = #tpu.pipeline_mode<synchronous>, transform_indices = @transform_4, window_bounds = array<i64: 16, 1>}, {pipeline_mode = #tpu.pipeline_mode<synchronous>, transform_indices = @transform_5, window_bounds = array<i64: 2, 16>}, {pipeline_mode = #tpu.pipeline_mode<synchronous>, transform_indices = @transform_6, window_bounds = array<i64: 2, 1>}, {pipeline_mode = #tpu.pipeline_mode<synchronous>, transform_indices = @transform_7, window_bounds = array<i64: 2, 4, 1>}, {transform_indices = @transform_8, window_bounds = array<i64: 1, 2, 4, 1>}, {transform_indices = @transform_9, window_bounds = array<i64: 1, 4, 2, 256>}]} {
    %c0 = arith.constant 0 : index
    %c0_0 = arith.constant 0 : index
    %c0_1 = arith.constant 0 : index
    %0 = vector.load %arg2[%c0, %c0_0, %c0_1] : memref<1x4x256xf32, #tpu.memory_space<vmem>>, vector<1x4x256xf32>
    %1 = vector.shape_cast %0 : vector<1x4x256xf32> to vector<4x256xf32>
    %c0_2 = arith.constant 0 : index
    %c0_3 = arith.constant 0 : index
    %c0_4 = arith.constant 0 : index
    %c0_5 = arith.constant 0 : index
    %2 = vector.load %arg3[%c0_2, %c0_3, %c0_4, %c0_5] : memref<4x4x4x1xf32, #tpu.memory_space<vmem>>, vector<4x4x4x1xf32>
    %c0_6 = arith.constant 0 : index
    %c0_7 = arith.constant 0 : index
    %c0_8 = arith.constant 0 : index
    %3 = vector.load %arg5[%c0_6, %c0_7, %c0_8] : memref<4x16x1xf32, #tpu.memory_space<vmem>>, vector<4x16x1xf32>
    %c0_9 = arith.constant 0 : index
    %c0_10 = arith.constant 0 : index
    %4 = vector.load %arg7[%c0_9, %c0_10] : memref<2x16xf32, #tpu.memory_space<vmem>>, vector<2x16xf32>
    %c0_11 = arith.constant 0 : index
    %c0_12 = arith.constant 0 : index
    %5 = vector.load %arg6[%c0_11, %c0_12] : memref<16x1xf32, #tpu.memory_space<vmem>>, vector<16x1xf32>
    %c0_13 = arith.constant 0 : index
    %c0_14 = arith.constant 0 : index
    %6 = vector.load %arg8[%c0_13, %c0_14] : memref<2x1xf32, #tpu.memory_space<vmem>>, vector<2x1xf32>
    %c0_15 = arith.constant 0 : index
    %c0_16 = arith.constant 0 : index
    %c0_17 = arith.constant 0 : index
    %7 = vector.load %arg9[%c0_15, %c0_16, %c0_17] : memref<2x4x1xf32, #tpu.memory_space<vmem>>, vector<1x4x1xf32>
    %8 = vector.shape_cast %7 : vector<1x4x1xf32> to vector<4x1xf32>
    %c1 = arith.constant 1 : index
    %c0_18 = arith.constant 0 : index
    %c0_19 = arith.constant 0 : index
    %9 = vector.load %arg9[%c1, %c0_18, %c0_19] : memref<2x4x1xf32, #tpu.memory_space<vmem>>, vector<1x4x1xf32>
    %10 = vector.shape_cast %9 : vector<1x4x1xf32> to vector<4x1xf32>
    %c0_20 = arith.constant 0 : index
    %c0_21 = arith.constant 0 : index
    %c0_22 = arith.constant 0 : index
    %c0_23 = arith.constant 0 : index
    %11 = vector.load %arg10[%c0_20, %c0_21, %c0_22, %c0_23] : memref<1x2x4x1xf32, #tpu.memory_space<vmem>>, vector<1x1x4x1xf32>
    %12 = vector.shape_cast %11 : vector<1x1x4x1xf32> to vector<4x1xf32>
    %c0_24 = arith.constant 0 : index
    %c1_25 = arith.constant 1 : index
    %c0_26 = arith.constant 0 : index
    %c0_27 = arith.constant 0 : index
    %13 = vector.load %arg10[%c0_24, %c1_25, %c0_26, %c0_27] : memref<1x2x4x1xf32, #tpu.memory_space<vmem>>, vector<1x1x4x1xf32>
    %14 = vector.shape_cast %13 : vector<1x1x4x1xf32> to vector<4x1xf32>
    %15 = arith.mulf %14, %8 : vector<4x1xf32>
    %16 = arith.mulf %12, %15 : vector<4x1xf32>
    %17 = arith.subf %10, %16 : vector<4x1xf32>
    %18 = vector.extract_strided_slice %2 {offsets = [0, 0, 0, 0], sizes = [1, 4, 4, 1], strides = [1, 1, 1, 1]} : vector<4x4x4x1xf32> to vector<1x4x4x1xf32>
    %19 = vector.shape_cast %18 : vector<1x4x4x1xf32> to vector<4x4x1xf32>
    %20 = vector.extract_strided_slice %19 {offsets = [0, 0, 0], sizes = [1, 4, 1], strides = [1, 1, 1]} : vector<4x4x1xf32> to vector<1x4x1xf32>
    %21 = vector.shape_cast %20 : vector<1x4x1xf32> to vector<4x1xf32>
    %22 = vector.extract_strided_slice %1 {offsets = [0, 0], sizes = [1, 256], strides = [1, 1]} : vector<4x256xf32> to vector<1x256xf32>
    %23 = vector.broadcast %21 : vector<4x1xf32> to vector<4x256xf32>
    %24 = vector.broadcast %22 : vector<1x256xf32> to vector<4x256xf32>
    %25 = arith.mulf %23, %24 : vector<4x256xf32>
    %26 = vector.extract_strided_slice %19 {offsets = [1, 0, 0], sizes = [1, 4, 1], strides = [1, 1, 1]} : vector<4x4x1xf32> to vector<1x4x1xf32>
    %27 = vector.shape_cast %26 : vector<1x4x1xf32> to vector<4x1xf32>
    %28 = vector.extract_strided_slice %1 {offsets = [1, 0], sizes = [1, 256], strides = [1, 1]} : vector<4x256xf32> to vector<1x256xf32>
    %29 = vector.broadcast %27 : vector<4x1xf32> to vector<4x256xf32>
    %30 = vector.broadcast %28 : vector<1x256xf32> to vector<4x256xf32>
    %31 = arith.mulf %29, %30 : vector<4x256xf32>
    %32 = arith.addf %25, %31 : vector<4x256xf32>
    %33 = vector.extract_strided_slice %19 {offsets = [2, 0, 0], sizes = [1, 4, 1], strides = [1, 1, 1]} : vector<4x4x1xf32> to vector<1x4x1xf32>
    %34 = vector.shape_cast %33 : vector<1x4x1xf32> to vector<4x1xf32>
    %35 = vector.extract_strided_slice %1 {offsets = [2, 0], sizes = [1, 256], strides = [1, 1]} : vector<4x256xf32> to vector<1x256xf32>
    %36 = vector.broadcast %34 : vector<4x1xf32> to vector<4x256xf32>
    %37 = vector.broadcast %35 : vector<1x256xf32> to vector<4x256xf32>
    %38 = arith.mulf %36, %37 : vector<4x256xf32>
    %39 = arith.addf %32, %38 : vector<4x256xf32>
    %40 = vector.extract_strided_slice %19 {offsets = [3, 0, 0], sizes = [1, 4, 1], strides = [1, 1, 1]} : vector<4x4x1xf32> to vector<1x4x1xf32>
    %41 = vector.shape_cast %40 : vector<1x4x1xf32> to vector<4x1xf32>
    %42 = vector.extract_strided_slice %1 {offsets = [3, 0], sizes = [1, 256], strides = [1, 1]} : vector<4x256xf32> to vector<1x256xf32>
    %43 = vector.broadcast %41 : vector<4x1xf32> to vector<4x256xf32>
    %44 = vector.broadcast %42 : vector<1x256xf32> to vector<4x256xf32>
    %45 = arith.mulf %43, %44 : vector<4x256xf32>
    %46 = arith.addf %39, %45 : vector<4x256xf32>
    %47 = vector.broadcast %15 : vector<4x1xf32> to vector<4x256xf32>
    %48 = arith.mulf %46, %47 : vector<4x256xf32>
    %49 = vector.broadcast %17 : vector<4x1xf32> to vector<4x256xf32>
    %50 = arith.addf %48, %49 : vector<4x256xf32>
    %51 = vector.extract_strided_slice %3 {offsets = [0, 0, 0], sizes = [1, 16, 1], strides = [1, 1, 1]} : vector<4x16x1xf32> to vector<1x16x1xf32>
    %52 = vector.shape_cast %51 : vector<1x16x1xf32> to vector<16x1xf32>
    %53 = vector.extract_strided_slice %50 {offsets = [0, 0], sizes = [1, 256], strides = [1, 1]} : vector<4x256xf32> to vector<1x256xf32>
    %54 = vector.broadcast %52 : vector<16x1xf32> to vector<16x256xf32>
    %55 = vector.broadcast %53 : vector<1x256xf32> to vector<16x256xf32>
    %56 = arith.mulf %54, %55 : vector<16x256xf32>
    %57 = vector.extract_strided_slice %3 {offsets = [1, 0, 0], sizes = [1, 16, 1], strides = [1, 1, 1]} : vector<4x16x1xf32> to vector<1x16x1xf32>
    %58 = vector.shape_cast %57 : vector<1x16x1xf32> to vector<16x1xf32>
    %59 = vector.extract_strided_slice %50 {offsets = [1, 0], sizes = [1, 256], strides = [1, 1]} : vector<4x256xf32> to vector<1x256xf32>
    %60 = vector.broadcast %58 : vector<16x1xf32> to vector<16x256xf32>
    %61 = vector.broadcast %59 : vector<1x256xf32> to vector<16x256xf32>
    %62 = arith.mulf %60, %61 : vector<16x256xf32>
    %63 = arith.addf %56, %62 : vector<16x256xf32>
    %64 = vector.extract_strided_slice %3 {offsets = [2, 0, 0], sizes = [1, 16, 1], strides = [1, 1, 1]} : vector<4x16x1xf32> to vector<1x16x1xf32>
    %65 = vector.shape_cast %64 : vector<1x16x1xf32> to vector<16x1xf32>
    %66 = vector.extract_strided_slice %50 {offsets = [2, 0], sizes = [1, 256], strides = [1, 1]} : vector<4x256xf32> to vector<1x256xf32>
    %67 = vector.broadcast %65 : vector<16x1xf32> to vector<16x256xf32>
    %68 = vector.broadcast %66 : vector<1x256xf32> to vector<16x256xf32>
    %69 = arith.mulf %67, %68 : vector<16x256xf32>
    %70 = arith.addf %63, %69 : vector<16x256xf32>
    %71 = vector.extract_strided_slice %3 {offsets = [3, 0, 0], sizes = [1, 16, 1], strides = [1, 1, 1]} : vector<4x16x1xf32> to vector<1x16x1xf32>
    %72 = vector.shape_cast %71 : vector<1x16x1xf32> to vector<16x1xf32>
    %73 = vector.extract_strided_slice %50 {offsets = [3, 0], sizes = [1, 256], strides = [1, 1]} : vector<4x256xf32> to vector<1x256xf32>
    %74 = vector.broadcast %72 : vector<16x1xf32> to vector<16x256xf32>
    %75 = vector.broadcast %73 : vector<1x256xf32> to vector<16x256xf32>
    %76 = arith.mulf %74, %75 : vector<16x256xf32>
    %77 = arith.addf %70, %76 : vector<16x256xf32>
    %78 = vector.broadcast %5 : vector<16x1xf32> to vector<16x256xf32>
    %79 = arith.addf %77, %78 : vector<16x256xf32>
    %cst = arith.constant 5.000000e-01 : f32
    %80 = vector.broadcast %cst : f32 to vector<16x256xf32>
    %81 = arith.mulf %80, %79 : vector<16x256xf32>
    %cst_28 = arith.constant 0.707106769 : f32
    %82 = vector.broadcast %cst_28 : f32 to vector<16x256xf32>
    %83 = arith.mulf %79, %82 : vector<16x256xf32>
    %cst_29 = arith.constant 0.000000e+00 : f32
    %84 = vector.broadcast %cst_29 : f32 to vector<16x256xf32>
    %85 = arith.cmpf olt, %83, %84 : vector<16x256xf32>
    %cst_30 = arith.constant -1.000000e+00 : f32
    %cst_31 = arith.constant 1.000000e+00 : f32
    %86 = vector.broadcast %cst_30 : f32 to vector<16x256xf32>
    %87 = vector.broadcast %cst_31 : f32 to vector<16x256xf32>
    %88 = arith.select %85, %86, %87 : vector<16x256xi1>, vector<16x256xf32>
    %89 = math.absf %83 : vector<16x256xf32>
    %cst_32 = arith.constant 0.327591091 : f32
    %90 = vector.broadcast %cst_32 : f32 to vector<16x256xf32>
    %91 = arith.mulf %90, %89 : vector<16x256xf32>
    %cst_33 = arith.constant 1.000000e+00 : f32
    %92 = vector.broadcast %cst_33 : f32 to vector<16x256xf32>
    %93 = arith.addf %92, %91 : vector<16x256xf32>
    %cst_34 = arith.constant 1.000000e+00 : f32
    %94 = vector.broadcast %cst_34 : f32 to vector<16x256xf32>
    %95 = arith.divf %94, %93 : vector<16x256xf32>
    %cst_35 = arith.constant 1.06140542 : f32
    %96 = vector.broadcast %cst_35 : f32 to vector<16x256xf32>
    %97 = arith.mulf %95, %96 : vector<16x256xf32>
    %cst_36 = arith.constant -1.45315206 : f32
    %98 = vector.broadcast %cst_36 : f32 to vector<16x256xf32>
    %99 = arith.addf %98, %97 : vector<16x256xf32>
    %100 = arith.mulf %95, %99 : vector<16x256xf32>
    %cst_37 = arith.constant 1.42141378 : f32
    %101 = vector.broadcast %cst_37 : f32 to vector<16x256xf32>
    %102 = arith.addf %101, %100 : vector<16x256xf32>
    %103 = arith.mulf %95, %102 : vector<16x256xf32>
    %cst_38 = arith.constant -0.284496725 : f32
    %104 = vector.broadcast %cst_38 : f32 to vector<16x256xf32>
    %105 = arith.addf %104, %103 : vector<16x256xf32>
    %106 = arith.mulf %95, %105 : vector<16x256xf32>
    %cst_39 = arith.constant 0.254829586 : f32
    %107 = vector.broadcast %cst_39 : f32 to vector<16x256xf32>
    %108 = arith.addf %107, %106 : vector<16x256xf32>
    %109 = arith.mulf %95, %108 : vector<16x256xf32>
    %110 = arith.mulf %89, %89 : vector<16x256xf32>
    %cst_40 = arith.constant 0.000000e+00 : f32
    %111 = vector.broadcast %cst_40 : f32 to vector<16x256xf32>
    %112 = arith.subf %111, %110 : vector<16x256xf32>
    %113 = math.exp %112 : vector<16x256xf32>
    %114 = arith.mulf %109, %113 : vector<16x256xf32>
    %cst_41 = arith.constant 1.000000e+00 : f32
    %115 = vector.broadcast %cst_41 : f32 to vector<16x256xf32>
    %116 = arith.subf %115, %114 : vector<16x256xf32>
    %117 = arith.mulf %88, %116 : vector<16x256xf32>
    %cst_42 = arith.constant 1.000000e+00 : f32
    %118 = vector.broadcast %cst_42 : f32 to vector<16x256xf32>
    %119 = arith.addf %118, %117 : vector<16x256xf32>
    %120 = arith.mulf %81, %119 : vector<16x256xf32>
    %cst_43 = arith.constant dense<0.000000e+00> : vector<2x256xf32>
    %121 = tpu.matmul %4, %120, %cst_43 {dimension_numbers = #tpu.dot_dimension_numbers<[1], [0], [0], [1], [0, 0, 1, 1], [], []>} : vector<2x16xf32>, vector<16x256xf32>, vector<2x256xf32> -> vector<2x256xf32>
    %122 = vector.broadcast %6 : vector<2x1xf32> to vector<2x256xf32>
    %123 = arith.addf %121, %122 : vector<2x256xf32>
    %c0_44 = arith.constant 0 : index
    %c0_45 = arith.constant 0 : index
    %c0_46 = arith.constant 0 : index
    %c0_47 = arith.constant 0 : index
    %124 = vector.load %arg11[%c0_44, %c0_45, %c0_46, %c0_47] : memref<1x4x2x256xf32, #tpu.memory_space<vmem>>, vector<1x1x2x256xf32>
    %125 = vector.shape_cast %124 : vector<1x1x2x256xf32> to vector<2x256xf32>
    %126 = vector.shape_cast %123 : vector<2x256xf32> to vector<1x1x2x256xf32>
    tpu.vector_store %arg11[%c0_44, %c0_45, %c0_46, %c0_47], %126 {strides = array<i32>} : memref<1x4x2x256xf32, #tpu.memory_space<vmem>>, vector<1x1x2x256xf32>,
    %127 = vector.extract_strided_slice %2 {offsets = [1, 0, 0, 0], sizes = [1, 4, 4, 1], strides = [1, 1, 1, 1]} : vector<4x4x4x1xf32> to vector<1x4x4x1xf32>
    %128 = vector.shape_cast %127 : vector<1x4x4x1xf32> to vector<4x4x1xf32>
    %129 = vector.extract_strided_slice %128 {offsets = [0, 0, 0], sizes = [1, 4, 1], strides = [1, 1, 1]} : vector<4x4x1xf32> to vector<1x4x1xf32>
    %130 = vector.shape_cast %129 : vector<1x4x1xf32> to vector<4x1xf32>
    %131 = vector.extract_strided_slice %1 {offsets = [0, 0], sizes = [1, 256], strides = [1, 1]} : vector<4x256xf32> to vector<1x256xf32>
    %132 = vector.broadcast %130 : vector<4x1xf32> to vector<4x256xf32>
    %133 = vector.broadcast %131 : vector<1x256xf32> to vector<4x256xf32>
    %134 = arith.mulf %132, %133 : vector<4x256xf32>
    %135 = vector.extract_strided_slice %128 {offsets = [1, 0, 0], sizes = [1, 4, 1], strides = [1, 1, 1]} : vector<4x4x1xf32> to vector<1x4x1xf32>
    %136 = vector.shape_cast %135 : vector<1x4x1xf32> to vector<4x1xf32>
    %137 = vector.extract_strided_slice %1 {offsets = [1, 0], sizes = [1, 256], strides = [1, 1]} : vector<4x256xf32> to vector<1x256xf32>
    %138 = vector.broadcast %136 : vector<4x1xf32> to vector<4x256xf32>
    %139 = vector.broadcast %137 : vector<1x256xf32> to vector<4x256xf32>
    %140 = arith.mulf %138, %139 : vector<4x256xf32>
    %141 = arith.addf %134, %140 : vector<4x256xf32>
    %142 = vector.extract_strided_slice %128 {offsets = [2, 0, 0], sizes = [1, 4, 1], strides = [1, 1, 1]} : vector<4x4x1xf32> to vector<1x4x1xf32>
    %143 = vector.shape_cast %142 : vector<1x4x1xf32> to vector<4x1xf32>
    %144 = vector.extract_strided_slice %1 {offsets = [2, 0], sizes = [1, 256], strides = [1, 1]} : vector<4x256xf32> to vector<1x256xf32>
    %145 = vector.broadcast %143 : vector<4x1xf32> to vector<4x256xf32>
    %146 = vector.broadcast %144 : vector<1x256xf32> to vector<4x256xf32>
    %147 = arith.mulf %145, %146 : vector<4x256xf32>
    %148 = arith.addf %141, %147 : vector<4x256xf32>
    %149 = vector.extract_strided_slice %128 {offsets = [3, 0, 0], sizes = [1, 4, 1], strides = [1, 1, 1]} : vector<4x4x1xf32> to vector<1x4x1xf32>
    %150 = vector.shape_cast %149 : vector<1x4x1xf32> to vector<4x1xf32>
    %151 = vector.extract_strided_slice %1 {offsets = [3, 0], sizes = [1, 256], strides = [1, 1]} : vector<4x256xf32> to vector<1x256xf32>
    %152 = vector.broadcast %150 : vector<4x1xf32> to vector<4x256xf32>
    %153 = vector.broadcast %151 : vector<1x256xf32> to vector<4x256xf32>
    %154 = arith.mulf %152, %153 : vector<4x256xf32>
    %155 = arith.addf %148, %154 : vector<4x256xf32>
    %156 = vector.broadcast %15 : vector<4x1xf32> to vector<4x256xf32>
    %157 = arith.mulf %155, %156 : vector<4x256xf32>
    %158 = vector.broadcast %17 : vector<4x1xf32> to vector<4x256xf32>
    %159 = arith.addf %157, %158 : vector<4x256xf32>
    %160 = vector.extract_strided_slice %3 {offsets = [0, 0, 0], sizes = [1, 16, 1], strides = [1, 1, 1]} : vector<4x16x1xf32> to vector<1x16x1xf32>
    %161 = vector.shape_cast %160 : vector<1x16x1xf32> to vector<16x1xf32>
    %162 = vector.extract_strided_slice %159 {offsets = [0, 0], sizes = [1, 256], strides = [1, 1]} : vector<4x256xf32> to vector<1x256xf32>
    %163 = vector.broadcast %161 : vector<16x1xf32> to vector<16x256xf32>
    %164 = vector.broadcast %162 : vector<1x256xf32> to vector<16x256xf32>
    %165 = arith.mulf %163, %164 : vector<16x256xf32>
    %166 = vector.extract_strided_slice %3 {offsets = [1, 0, 0], sizes = [1, 16, 1], strides = [1, 1, 1]} : vector<4x16x1xf32> to vector<1x16x1xf32>
    %167 = vector.shape_cast %166 : vector<1x16x1xf32> to vector<16x1xf32>
    %168 = vector.extract_strided_slice %159 {offsets = [1, 0], sizes = [1, 256], strides = [1, 1]} : vector<4x256xf32> to vector<1x256xf32>
    %169 = vector.broadcast %167 : vector<16x1xf32> to vector<16x256xf32>
    %170 = vector.broadcast %168 : vector<1x256xf32> to vector<16x256xf32>
    %171 = arith.mulf %169, %170 : vector<16x256xf32>
    %172 = arith.addf %165, %171 : vector<16x256xf32>
    %173 = vector.extract_strided_slice %3 {offsets = [2, 0, 0], sizes = [1, 16, 1], strides = [1, 1, 1]} : vector<4x16x1xf32> to vector<1x16x1xf32>
    %174 = vector.shape_cast %173 : vector<1x16x1xf32> to vector<16x1xf32>
    %175 = vector.extract_strided_slice %159 {offsets = [2, 0], sizes = [1, 256], strides = [1, 1]} : vector<4x256xf32> to vector<1x256xf32>
    %176 = vector.broadcast %174 : vector<16x1xf32> to vector<16x256xf32>
    %177 = vector.broadcast %175 : vector<1x256xf32> to vector<16x256xf32>
    %178 = arith.mulf %176, %177 : vector<16x256xf32>
    %179 = arith.addf %172, %178 : vector<16x256xf32>
    %180 = vector.extract_strided_slice %3 {offsets = [3, 0, 0], sizes = [1, 16, 1], strides = [1, 1, 1]} : vector<4x16x1xf32> to vector<1x16x1xf32>
    %181 = vector.shape_cast %180 : vector<1x16x1xf32> to vector<16x1xf32>
    %182 = vector.extract_strided_slice %159 {offsets = [3, 0], sizes = [1, 256], strides = [1, 1]} : vector<4x256xf32> to vector<1x256xf32>
    %183 = vector.broadcast %181 : vector<16x1xf32> to vector<16x256xf32>
    %184 = vector.broadcast %182 : vector<1x256xf32> to vector<16x256xf32>
    %185 = arith.mulf %183, %184 : vector<16x256xf32>
    %186 = arith.addf %179, %185 : vector<16x256xf32>
    %187 = vector.broadcast %5 : vector<16x1xf32> to vector<16x256xf32>
    %188 = arith.addf %186, %187 : vector<16x256xf32>
    %cst_48 = arith.constant 5.000000e-01 : f32
    %189 = vector.broadcast %cst_48 : f32 to vector<16x256xf32>
    %190 = arith.mulf %189, %188 : vector<16x256xf32>
    %cst_49 = arith.constant 0.707106769 : f32
    %191 = vector.broadcast %cst_49 : f32 to vector<16x256xf32>
    %192 = arith.mulf %188, %191 : vector<16x256xf32>
    %cst_50 = arith.constant 0.000000e+00 : f32
    %193 = vector.broadcast %cst_50 : f32 to vector<16x256xf32>
    %194 = arith.cmpf olt, %192, %193 : vector<16x256xf32>
    %cst_51 = arith.constant -1.000000e+00 : f32
    %cst_52 = arith.constant 1.000000e+00 : f32
    %195 = vector.broadcast %cst_51 : f32 to vector<16x256xf32>
    %196 = vector.broadcast %cst_52 : f32 to vector<16x256xf32>
    %197 = arith.select %194, %195, %196 : vector<16x256xi1>, vector<16x256xf32>
    %198 = math.absf %192 : vector<16x256xf32>
    %cst_53 = arith.constant 0.327591091 : f32
    %199 = vector.broadcast %cst_53 : f32 to vector<16x256xf32>
    %200 = arith.mulf %199, %198 : vector<16x256xf32>
    %cst_54 = arith.constant 1.000000e+00 : f32
    %201 = vector.broadcast %cst_54 : f32 to vector<16x256xf32>
    %202 = arith.addf %201, %200 : vector<16x256xf32>
    %cst_55 = arith.constant 1.000000e+00 : f32
    %203 = vector.broadcast %cst_55 : f32 to vector<16x256xf32>
    %204 = arith.divf %203, %202 : vector<16x256xf32>
    %cst_56 = arith.constant 1.06140542 : f32
    %205 = vector.broadcast %cst_56 : f32 to vector<16x256xf32>
    %206 = arith.mulf %204, %205 : vector<16x256xf32>
    %cst_57 = arith.constant -1.45315206 : f32
    %207 = vector.broadcast %cst_57 : f32 to vector<16x256xf32>
    %208 = arith.addf %207, %206 : vector<16x256xf32>
    %209 = arith.mulf %204, %208 : vector<16x256xf32>
    %cst_58 = arith.constant 1.42141378 : f32
    %210 = vector.broadcast %cst_58 : f32 to vector<16x256xf32>
    %211 = arith.addf %210, %209 : vector<16x256xf32>
    %212 = arith.mulf %204, %211 : vector<16x256xf32>
    %cst_59 = arith.constant -0.284496725 : f32
    %213 = vector.broadcast %cst_59 : f32 to vector<16x256xf32>
    %214 = arith.addf %213, %212 : vector<16x256xf32>
    %215 = arith.mulf %204, %214 : vector<16x256xf32>
    %cst_60 = arith.constant 0.254829586 : f32
    %216 = vector.broadcast %cst_60 : f32 to vector<16x256xf32>
    %217 = arith.addf %216, %215 : vector<16x256xf32>
    %218 = arith.mulf %204, %217 : vector<16x256xf32>
    %219 = arith.mulf %198, %198 : vector<16x256xf32>
    %cst_61 = arith.constant 0.000000e+00 : f32
    %220 = vector.broadcast %cst_61 : f32 to vector<16x256xf32>
    %221 = arith.subf %220, %219 : vector<16x256xf32>
    %222 = math.exp %221 : vector<16x256xf32>
    %223 = arith.mulf %218, %222 : vector<16x256xf32>
    %cst_62 = arith.constant 1.000000e+00 : f32
    %224 = vector.broadcast %cst_62 : f32 to vector<16x256xf32>
    %225 = arith.subf %224, %223 : vector<16x256xf32>
    %226 = arith.mulf %197, %225 : vector<16x256xf32>
    %cst_63 = arith.constant 1.000000e+00 : f32
    %227 = vector.broadcast %cst_63 : f32 to vector<16x256xf32>
    %228 = arith.addf %227, %226 : vector<16x256xf32>
    %229 = arith.mulf %190, %228 : vector<16x256xf32>
    %cst_64 = arith.constant dense<0.000000e+00> : vector<2x256xf32>
    %230 = tpu.matmul %4, %229, %cst_64 {dimension_numbers = #tpu.dot_dimension_numbers<[1], [0], [0], [1], [0, 0, 1, 1], [], []>} : vector<2x16xf32>, vector<16x256xf32>, vector<2x256xf32> -> vector<2x256xf32>
    %231 = vector.broadcast %6 : vector<2x1xf32> to vector<2x256xf32>
    %232 = arith.addf %230, %231 : vector<2x256xf32>
    %c0_65 = arith.constant 0 : index
    %c1_66 = arith.constant 1 : index
    %c0_67 = arith.constant 0 : index
    %c0_68 = arith.constant 0 : index
    %233 = vector.load %arg11[%c0_65, %c1_66, %c0_67, %c0_68] : memref<1x4x2x256xf32, #tpu.memory_space<vmem>>, vector<1x1x2x256xf32>
    %234 = vector.shape_cast %233 : vector<1x1x2x256xf32> to vector<2x256xf32>
    %235 = vector.shape_cast %232 : vector<2x256xf32> to vector<1x1x2x256xf32>
    tpu.vector_store %arg11[%c0_65, %c1_66, %c0_67, %c0_68], %235 {strides = array<i32>} : memref<1x4x2x256xf32, #tpu.memory_space<vmem>>, vector<1x1x2x256xf32>,
    %236 = vector.extract_strided_slice %2 {offsets = [2, 0, 0, 0], sizes = [1, 4, 4, 1], strides = [1, 1, 1, 1]} : vector<4x4x4x1xf32> to vector<1x4x4x1xf32>
    %237 = vector.shape_cast %236 : vector<1x4x4x1xf32> to vector<4x4x1xf32>
    %238 = vector.extract_strided_slice %237 {offsets = [0, 0, 0], sizes = [1, 4, 1], strides = [1, 1, 1]} : vector<4x4x1xf32> to vector<1x4x1xf32>
    %239 = vector.shape_cast %238 : vector<1x4x1xf32> to vector<4x1xf32>
    %240 = vector.extract_strided_slice %1 {offsets = [0, 0], sizes = [1, 256], strides = [1, 1]} : vector<4x256xf32> to vector<1x256xf32>
    %241 = vector.broadcast %239 : vector<4x1xf32> to vector<4x256xf32>
    %242 = vector.broadcast %240 : vector<1x256xf32> to vector<4x256xf32>
    %243 = arith.mulf %241, %242 : vector<4x256xf32>
    %244 = vector.extract_strided_slice %237 {offsets = [1, 0, 0], sizes = [1, 4, 1], strides = [1, 1, 1]} : vector<4x4x1xf32> to vector<1x4x1xf32>
    %245 = vector.shape_cast %244 : vector<1x4x1xf32> to vector<4x1xf32>
    %246 = vector.extract_strided_slice %1 {offsets = [1, 0], sizes = [1, 256], strides = [1, 1]} : vector<4x256xf32> to vector<1x256xf32>
    %247 = vector.broadcast %245 : vector<4x1xf32> to vector<4x256xf32>
    %248 = vector.broadcast %246 : vector<1x256xf32> to vector<4x256xf32>
    %249 = arith.mulf %247, %248 : vector<4x256xf32>
    %250 = arith.addf %243, %249 : vector<4x256xf32>
    %251 = vector.extract_strided_slice %237 {offsets = [2, 0, 0], sizes = [1, 4, 1], strides = [1, 1, 1]} : vector<4x4x1xf32> to vector<1x4x1xf32>
    %252 = vector.shape_cast %251 : vector<1x4x1xf32> to vector<4x1xf32>
    %253 = vector.extract_strided_slice %1 {offsets = [2, 0], sizes = [1, 256], strides = [1, 1]} : vector<4x256xf32> to vector<1x256xf32>
    %254 = vector.broadcast %252 : vector<4x1xf32> to vector<4x256xf32>
    %255 = vector.broadcast %253 : vector<1x256xf32> to vector<4x256xf32>
    %256 = arith.mulf %254, %255 : vector<4x256xf32>
    %257 = arith.addf %250, %256 : vector<4x256xf32>
    %258 = vector.extract_strided_slice %237 {offsets = [3, 0, 0], sizes = [1, 4, 1], strides = [1, 1, 1]} : vector<4x4x1xf32> to vector<1x4x1xf32>
    %259 = vector.shape_cast %258 : vector<1x4x1xf32> to vector<4x1xf32>
    %260 = vector.extract_strided_slice %1 {offsets = [3, 0], sizes = [1, 256], strides = [1, 1]} : vector<4x256xf32> to vector<1x256xf32>
    %261 = vector.broadcast %259 : vector<4x1xf32> to vector<4x256xf32>
    %262 = vector.broadcast %260 : vector<1x256xf32> to vector<4x256xf32>
    %263 = arith.mulf %261, %262 : vector<4x256xf32>
    %264 = arith.addf %257, %263 : vector<4x256xf32>
    %265 = vector.broadcast %15 : vector<4x1xf32> to vector<4x256xf32>
    %266 = arith.mulf %264, %265 : vector<4x256xf32>
    %267 = vector.broadcast %17 : vector<4x1xf32> to vector<4x256xf32>
    %268 = arith.addf %266, %267 : vector<4x256xf32>
    %269 = vector.extract_strided_slice %3 {offsets = [0, 0, 0], sizes = [1, 16, 1], strides = [1, 1, 1]} : vector<4x16x1xf32> to vector<1x16x1xf32>
    %270 = vector.shape_cast %269 : vector<1x16x1xf32> to vector<16x1xf32>
    %271 = vector.extract_strided_slice %268 {offsets = [0, 0], sizes = [1, 256], strides = [1, 1]} : vector<4x256xf32> to vector<1x256xf32>
    %272 = vector.broadcast %270 : vector<16x1xf32> to vector<16x256xf32>
    %273 = vector.broadcast %271 : vector<1x256xf32> to vector<16x256xf32>
    %274 = arith.mulf %272, %273 : vector<16x256xf32>
    %275 = vector.extract_strided_slice %3 {offsets = [1, 0, 0], sizes = [1, 16, 1], strides = [1, 1, 1]} : vector<4x16x1xf32> to vector<1x16x1xf32>
    %276 = vector.shape_cast %275 : vector<1x16x1xf32> to vector<16x1xf32>
    %277 = vector.extract_strided_slice %268 {offsets = [1, 0], sizes = [1, 256], strides = [1, 1]} : vector<4x256xf32> to vector<1x256xf32>
    %278 = vector.broadcast %276 : vector<16x1xf32> to vector<16x256xf32>
    %279 = vector.broadcast %277 : vector<1x256xf32> to vector<16x256xf32>
    %280 = arith.mulf %278, %279 : vector<16x256xf32>
    %281 = arith.addf %274, %280 : vector<16x256xf32>
    %282 = vector.extract_strided_slice %3 {offsets = [2, 0, 0], sizes = [1, 16, 1], strides = [1, 1, 1]} : vector<4x16x1xf32> to vector<1x16x1xf32>
    %283 = vector.shape_cast %282 : vector<1x16x1xf32> to vector<16x1xf32>
    %284 = vector.extract_strided_slice %268 {offsets = [2, 0], sizes = [1, 256], strides = [1, 1]} : vector<4x256xf32> to vector<1x256xf32>
    %285 = vector.broadcast %283 : vector<16x1xf32> to vector<16x256xf32>
    %286 = vector.broadcast %284 : vector<1x256xf32> to vector<16x256xf32>
    %287 = arith.mulf %285, %286 : vector<16x256xf32>
    %288 = arith.addf %281, %287 : vector<16x256xf32>
    %289 = vector.extract_strided_slice %3 {offsets = [3, 0, 0], sizes = [1, 16, 1], strides = [1, 1, 1]} : vector<4x16x1xf32> to vector<1x16x1xf32>
    %290 = vector.shape_cast %289 : vector<1x16x1xf32> to vector<16x1xf32>
    %291 = vector.extract_strided_slice %268 {offsets = [3, 0], sizes = [1, 256], strides = [1, 1]} : vector<4x256xf32> to vector<1x256xf32>
    %292 = vector.broadcast %290 : vector<16x1xf32> to vector<16x256xf32>
    %293 = vector.broadcast %291 : vector<1x256xf32> to vector<16x256xf32>
    %294 = arith.mulf %292, %293 : vector<16x256xf32>
    %295 = arith.addf %288, %294 : vector<16x256xf32>
    %296 = vector.broadcast %5 : vector<16x1xf32> to vector<16x256xf32>
    %297 = arith.addf %295, %296 : vector<16x256xf32>
    %cst_69 = arith.constant 5.000000e-01 : f32
    %298 = vector.broadcast %cst_69 : f32 to vector<16x256xf32>
    %299 = arith.mulf %298, %297 : vector<16x256xf32>
    %cst_70 = arith.constant 0.707106769 : f32
    %300 = vector.broadcast %cst_70 : f32 to vector<16x256xf32>
    %301 = arith.mulf %297, %300 : vector<16x256xf32>
    %cst_71 = arith.constant 0.000000e+00 : f32
    %302 = vector.broadcast %cst_71 : f32 to vector<16x256xf32>
    %303 = arith.cmpf olt, %301, %302 : vector<16x256xf32>
    %cst_72 = arith.constant -1.000000e+00 : f32
    %cst_73 = arith.constant 1.000000e+00 : f32
    %304 = vector.broadcast %cst_72 : f32 to vector<16x256xf32>
    %305 = vector.broadcast %cst_73 : f32 to vector<16x256xf32>
    %306 = arith.select %303, %304, %305 : vector<16x256xi1>, vector<16x256xf32>
    %307 = math.absf %301 : vector<16x256xf32>
    %cst_74 = arith.constant 0.327591091 : f32
    %308 = vector.broadcast %cst_74 : f32 to vector<16x256xf32>
    %309 = arith.mulf %308, %307 : vector<16x256xf32>
    %cst_75 = arith.constant 1.000000e+00 : f32
    %310 = vector.broadcast %cst_75 : f32 to vector<16x256xf32>
    %311 = arith.addf %310, %309 : vector<16x256xf32>
    %cst_76 = arith.constant 1.000000e+00 : f32
    %312 = vector.broadcast %cst_76 : f32 to vector<16x256xf32>
    %313 = arith.divf %312, %311 : vector<16x256xf32>
    %cst_77 = arith.constant 1.06140542 : f32
    %314 = vector.broadcast %cst_77 : f32 to vector<16x256xf32>
    %315 = arith.mulf %313, %314 : vector<16x256xf32>
    %cst_78 = arith.constant -1.45315206 : f32
    %316 = vector.broadcast %cst_78 : f32 to vector<16x256xf32>
    %317 = arith.addf %316, %315 : vector<16x256xf32>
    %318 = arith.mulf %313, %317 : vector<16x256xf32>
    %cst_79 = arith.constant 1.42141378 : f32
    %319 = vector.broadcast %cst_79 : f32 to vector<16x256xf32>
    %320 = arith.addf %319, %318 : vector<16x256xf32>
    %321 = arith.mulf %313, %320 : vector<16x256xf32>
    %cst_80 = arith.constant -0.284496725 : f32
    %322 = vector.broadcast %cst_80 : f32 to vector<16x256xf32>
    %323 = arith.addf %322, %321 : vector<16x256xf32>
    %324 = arith.mulf %313, %323 : vector<16x256xf32>
    %cst_81 = arith.constant 0.254829586 : f32
    %325 = vector.broadcast %cst_81 : f32 to vector<16x256xf32>
    %326 = arith.addf %325, %324 : vector<16x256xf32>
    %327 = arith.mulf %313, %326 : vector<16x256xf32>
    %328 = arith.mulf %307, %307 : vector<16x256xf32>
    %cst_82 = arith.constant 0.000000e+00 : f32
    %329 = vector.broadcast %cst_82 : f32 to vector<16x256xf32>
    %330 = arith.subf %329, %328 : vector<16x256xf32>
    %331 = math.exp %330 : vector<16x256xf32>
    %332 = arith.mulf %327, %331 : vector<16x256xf32>
    %cst_83 = arith.constant 1.000000e+00 : f32
    %333 = vector.broadcast %cst_83 : f32 to vector<16x256xf32>
    %334 = arith.subf %333, %332 : vector<16x256xf32>
    %335 = arith.mulf %306, %334 : vector<16x256xf32>
    %cst_84 = arith.constant 1.000000e+00 : f32
    %336 = vector.broadcast %cst_84 : f32 to vector<16x256xf32>
    %337 = arith.addf %336, %335 : vector<16x256xf32>
    %338 = arith.mulf %299, %337 : vector<16x256xf32>
    %cst_85 = arith.constant dense<0.000000e+00> : vector<2x256xf32>
    %339 = tpu.matmul %4, %338, %cst_85 {dimension_numbers = #tpu.dot_dimension_numbers<[1], [0], [0], [1], [0, 0, 1, 1], [], []>} : vector<2x16xf32>, vector<16x256xf32>, vector<2x256xf32> -> vector<2x256xf32>
    %340 = vector.broadcast %6 : vector<2x1xf32> to vector<2x256xf32>
    %341 = arith.addf %339, %340 : vector<2x256xf32>
    %c0_86 = arith.constant 0 : index
    %c2 = arith.constant 2 : index
    %c0_87 = arith.constant 0 : index
    %c0_88 = arith.constant 0 : index
    %342 = vector.load %arg11[%c0_86, %c2, %c0_87, %c0_88] : memref<1x4x2x256xf32, #tpu.memory_space<vmem>>, vector<1x1x2x256xf32>
    %343 = vector.shape_cast %342 : vector<1x1x2x256xf32> to vector<2x256xf32>
    %344 = vector.shape_cast %341 : vector<2x256xf32> to vector<1x1x2x256xf32>
    tpu.vector_store %arg11[%c0_86, %c2, %c0_87, %c0_88], %344 {strides = array<i32>} : memref<1x4x2x256xf32, #tpu.memory_space<vmem>>, vector<1x1x2x256xf32>,
    %345 = vector.extract_strided_slice %2 {offsets = [3, 0, 0, 0], sizes = [1, 4, 4, 1], strides = [1, 1, 1, 1]} : vector<4x4x4x1xf32> to vector<1x4x4x1xf32>
    %346 = vector.shape_cast %345 : vector<1x4x4x1xf32> to vector<4x4x1xf32>
    %347 = vector.extract_strided_slice %346 {offsets = [0, 0, 0], sizes = [1, 4, 1], strides = [1, 1, 1]} : vector<4x4x1xf32> to vector<1x4x1xf32>
    %348 = vector.shape_cast %347 : vector<1x4x1xf32> to vector<4x1xf32>
    %349 = vector.extract_strided_slice %1 {offsets = [0, 0], sizes = [1, 256], strides = [1, 1]} : vector<4x256xf32> to vector<1x256xf32>
    %350 = vector.broadcast %348 : vector<4x1xf32> to vector<4x256xf32>
    %351 = vector.broadcast %349 : vector<1x256xf32> to vector<4x256xf32>
    %352 = arith.mulf %350, %351 : vector<4x256xf32>
    %353 = vector.extract_strided_slice %346 {offsets = [1, 0, 0], sizes = [1, 4, 1], strides = [1, 1, 1]} : vector<4x4x1xf32> to vector<1x4x1xf32>
    %354 = vector.shape_cast %353 : vector<1x4x1xf32> to vector<4x1xf32>
    %355 = vector.extract_strided_slice %1 {offsets = [1, 0], sizes = [1, 256], strides = [1, 1]} : vector<4x256xf32> to vector<1x256xf32>
    %356 = vector.broadcast %354 : vector<4x1xf32> to vector<4x256xf32>
    %357 = vector.broadcast %355 : vector<1x256xf32> to vector<4x256xf32>
    %358 = arith.mulf %356, %357 : vector<4x256xf32>
    %359 = arith.addf %352, %358 : vector<4x256xf32>
    %360 = vector.extract_strided_slice %346 {offsets = [2, 0, 0], sizes = [1, 4, 1], strides = [1, 1, 1]} : vector<4x4x1xf32> to vector<1x4x1xf32>
    %361 = vector.shape_cast %360 : vector<1x4x1xf32> to vector<4x1xf32>
    %362 = vector.extract_strided_slice %1 {offsets = [2, 0], sizes = [1, 256], strides = [1, 1]} : vector<4x256xf32> to vector<1x256xf32>
    %363 = vector.broadcast %361 : vector<4x1xf32> to vector<4x256xf32>
    %364 = vector.broadcast %362 : vector<1x256xf32> to vector<4x256xf32>
    %365 = arith.mulf %363, %364 : vector<4x256xf32>
    %366 = arith.addf %359, %365 : vector<4x256xf32>
    %367 = vector.extract_strided_slice %346 {offsets = [3, 0, 0], sizes = [1, 4, 1], strides = [1, 1, 1]} : vector<4x4x1xf32> to vector<1x4x1xf32>
    %368 = vector.shape_cast %367 : vector<1x4x1xf32> to vector<4x1xf32>
    %369 = vector.extract_strided_slice %1 {offsets = [3, 0], sizes = [1, 256], strides = [1, 1]} : vector<4x256xf32> to vector<1x256xf32>
    %370 = vector.broadcast %368 : vector<4x1xf32> to vector<4x256xf32>
    %371 = vector.broadcast %369 : vector<1x256xf32> to vector<4x256xf32>
    %372 = arith.mulf %370, %371 : vector<4x256xf32>
    %373 = arith.addf %366, %372 : vector<4x256xf32>
    %374 = vector.broadcast %15 : vector<4x1xf32> to vector<4x256xf32>
    %375 = arith.mulf %373, %374 : vector<4x256xf32>
    %376 = vector.broadcast %17 : vector<4x1xf32> to vector<4x256xf32>
    %377 = arith.addf %375, %376 : vector<4x256xf32>
    %378 = vector.extract_strided_slice %3 {offsets = [0, 0, 0], sizes = [1, 16, 1], strides = [1, 1, 1]} : vector<4x16x1xf32> to vector<1x16x1xf32>
    %379 = vector.shape_cast %378 : vector<1x16x1xf32> to vector<16x1xf32>
    %380 = vector.extract_strided_slice %377 {offsets = [0, 0], sizes = [1, 256], strides = [1, 1]} : vector<4x256xf32> to vector<1x256xf32>
    %381 = vector.broadcast %379 : vector<16x1xf32> to vector<16x256xf32>
    %382 = vector.broadcast %380 : vector<1x256xf32> to vector<16x256xf32>
    %383 = arith.mulf %381, %382 : vector<16x256xf32>
    %384 = vector.extract_strided_slice %3 {offsets = [1, 0, 0], sizes = [1, 16, 1], strides = [1, 1, 1]} : vector<4x16x1xf32> to vector<1x16x1xf32>
    %385 = vector.shape_cast %384 : vector<1x16x1xf32> to vector<16x1xf32>
    %386 = vector.extract_strided_slice %377 {offsets = [1, 0], sizes = [1, 256], strides = [1, 1]} : vector<4x256xf32> to vector<1x256xf32>
    %387 = vector.broadcast %385 : vector<16x1xf32> to vector<16x256xf32>
    %388 = vector.broadcast %386 : vector<1x256xf32> to vector<16x256xf32>
    %389 = arith.mulf %387, %388 : vector<16x256xf32>
    %390 = arith.addf %383, %389 : vector<16x256xf32>
    %391 = vector.extract_strided_slice %3 {offsets = [2, 0, 0], sizes = [1, 16, 1], strides = [1, 1, 1]} : vector<4x16x1xf32> to vector<1x16x1xf32>
    %392 = vector.shape_cast %391 : vector<1x16x1xf32> to vector<16x1xf32>
    %393 = vector.extract_strided_slice %377 {offsets = [2, 0], sizes = [1, 256], strides = [1, 1]} : vector<4x256xf32> to vector<1x256xf32>
    %394 = vector.broadcast %392 : vector<16x1xf32> to vector<16x256xf32>
    %395 = vector.broadcast %393 : vector<1x256xf32> to vector<16x256xf32>
    %396 = arith.mulf %394, %395 : vector<16x256xf32>
    %397 = arith.addf %390, %396 : vector<16x256xf32>
    %398 = vector.extract_strided_slice %3 {offsets = [3, 0, 0], sizes = [1, 16, 1], strides = [1, 1, 1]} : vector<4x16x1xf32> to vector<1x16x1xf32>
    %399 = vector.shape_cast %398 : vector<1x16x1xf32> to vector<16x1xf32>
    %400 = vector.extract_strided_slice %377 {offsets = [3, 0], sizes = [1, 256], strides = [1, 1]} : vector<4x256xf32> to vector<1x256xf32>
    %401 = vector.broadcast %399 : vector<16x1xf32> to vector<16x256xf32>
    %402 = vector.broadcast %400 : vector<1x256xf32> to vector<16x256xf32>
    %403 = arith.mulf %401, %402 : vector<16x256xf32>
    %404 = arith.addf %397, %403 : vector<16x256xf32>
    %405 = vector.broadcast %5 : vector<16x1xf32> to vector<16x256xf32>
    %406 = arith.addf %404, %405 : vector<16x256xf32>
    %cst_89 = arith.constant 5.000000e-01 : f32
    %407 = vector.broadcast %cst_89 : f32 to vector<16x256xf32>
    %408 = arith.mulf %407, %406 : vector<16x256xf32>
    %cst_90 = arith.constant 0.707106769 : f32
    %409 = vector.broadcast %cst_90 : f32 to vector<16x256xf32>
    %410 = arith.mulf %406, %409 : vector<16x256xf32>
    %cst_91 = arith.constant 0.000000e+00 : f32
    %411 = vector.broadcast %cst_91 : f32 to vector<16x256xf32>
    %412 = arith.cmpf olt, %410, %411 : vector<16x256xf32>
    %cst_92 = arith.constant -1.000000e+00 : f32
    %cst_93 = arith.constant 1.000000e+00 : f32
    %413 = vector.broadcast %cst_92 : f32 to vector<16x256xf32>
    %414 = vector.broadcast %cst_93 : f32 to vector<16x256xf32>
    %415 = arith.select %412, %413, %414 : vector<16x256xi1>, vector<16x256xf32>
    %416 = math.absf %410 : vector<16x256xf32>
    %cst_94 = arith.constant 0.327591091 : f32
    %417 = vector.broadcast %cst_94 : f32 to vector<16x256xf32>
    %418 = arith.mulf %417, %416 : vector<16x256xf32>
    %cst_95 = arith.constant 1.000000e+00 : f32
    %419 = vector.broadcast %cst_95 : f32 to vector<16x256xf32>
    %420 = arith.addf %419, %418 : vector<16x256xf32>
    %cst_96 = arith.constant 1.000000e+00 : f32
    %421 = vector.broadcast %cst_96 : f32 to vector<16x256xf32>
    %422 = arith.divf %421, %420 : vector<16x256xf32>
    %cst_97 = arith.constant 1.06140542 : f32
    %423 = vector.broadcast %cst_97 : f32 to vector<16x256xf32>
    %424 = arith.mulf %422, %423 : vector<16x256xf32>
    %cst_98 = arith.constant -1.45315206 : f32
    %425 = vector.broadcast %cst_98 : f32 to vector<16x256xf32>
    %426 = arith.addf %425, %424 : vector<16x256xf32>
    %427 = arith.mulf %422, %426 : vector<16x256xf32>
    %cst_99 = arith.constant 1.42141378 : f32
    %428 = vector.broadcast %cst_99 : f32 to vector<16x256xf32>
    %429 = arith.addf %428, %427 : vector<16x256xf32>
    %430 = arith.mulf %422, %429 : vector<16x256xf32>
    %cst_100 = arith.constant -0.284496725 : f32
    %431 = vector.broadcast %cst_100 : f32 to vector<16x256xf32>
    %432 = arith.addf %431, %430 : vector<16x256xf32>
    %433 = arith.mulf %422, %432 : vector<16x256xf32>
    %cst_101 = arith.constant 0.254829586 : f32
    %434 = vector.broadcast %cst_101 : f32 to vector<16x256xf32>
    %435 = arith.addf %434, %433 : vector<16x256xf32>
    %436 = arith.mulf %422, %435 : vector<16x256xf32>
    %437 = arith.mulf %416, %416 : vector<16x256xf32>
    %cst_102 = arith.constant 0.000000e+00 : f32
    %438 = vector.broadcast %cst_102 : f32 to vector<16x256xf32>
    %439 = arith.subf %438, %437 : vector<16x256xf32>
    %440 = math.exp %439 : vector<16x256xf32>
    %441 = arith.mulf %436, %440 : vector<16x256xf32>
    %cst_103 = arith.constant 1.000000e+00 : f32
    %442 = vector.broadcast %cst_103 : f32 to vector<16x256xf32>
    %443 = arith.subf %442, %441 : vector<16x256xf32>
    %444 = arith.mulf %415, %443 : vector<16x256xf32>
    %cst_104 = arith.constant 1.000000e+00 : f32
    %445 = vector.broadcast %cst_104 : f32 to vector<16x256xf32>
    %446 = arith.addf %445, %444 : vector<16x256xf32>
    %447 = arith.mulf %408, %446 : vector<16x256xf32>
    %cst_105 = arith.constant dense<0.000000e+00> : vector<2x256xf32>
    %448 = tpu.matmul %4, %447, %cst_105 {dimension_numbers = #tpu.dot_dimension_numbers<[1], [0], [0], [1], [0, 0, 1, 1], [], []>} : vector<2x16xf32>, vector<16x256xf32>, vector<2x256xf32> -> vector<2x256xf32>
    %449 = vector.broadcast %6 : vector<2x1xf32> to vector<2x256xf32>
    %450 = arith.addf %448, %449 : vector<2x256xf32>
    %c0_106 = arith.constant 0 : index
    %c3 = arith.constant 3 : index
    %c0_107 = arith.constant 0 : index
    %c0_108 = arith.constant 0 : index
    %451 = vector.load %arg11[%c0_106, %c3, %c0_107, %c0_108] : memref<1x4x2x256xf32, #tpu.memory_space<vmem>>, vector<1x1x2x256xf32>
    %452 = vector.shape_cast %451 : vector<1x1x2x256xf32> to vector<2x256xf32>
    %453 = vector.shape_cast %450 : vector<2x256xf32> to vector<1x1x2x256xf32>
    tpu.vector_store %arg11[%c0_106, %c3, %c0_107, %c0_108], %453 {strides = array<i32>} : memref<1x4x2x256xf32, #tpu.memory_space<vmem>>, vector<1x1x2x256xf32>,
    return
  }
  func.func @transform_0(%arg0: i32, %arg1: i32) -> (i32, i32, i32) {
    %c0_i32 = arith.constant 0 : i32
    %c0_i32_0 = arith.constant 0 : i32
    return %arg0, %c0_i32, %arg1 : i32, i32, i32
  }
  func.func @transform_1(%arg0: i32, %arg1: i32) -> (i32, i32, i32, i32) {
    %c0_i32 = arith.constant 0 : i32
    %c0_i32_0 = arith.constant 0 : i32
    %c0_i32_1 = arith.constant 0 : i32
    %c0_i32_2 = arith.constant 0 : i32
    %c0_i32_3 = arith.constant 0 : i32
    return %c0_i32, %c0_i32_0, %c0_i32_1, %c0_i32_2 : i32, i32, i32, i32
  }
  func.func @transform_2(%arg0: i32, %arg1: i32) -> (i32, i32) {
    %c0_i32 = arith.constant 0 : i32
    %c0_i32_0 = arith.constant 0 : i32
    %c0_i32_1 = arith.constant 0 : i32
    return %c0_i32, %c0_i32_0 : i32, i32
  }
  func.func @transform_3(%arg0: i32, %arg1: i32) -> (i32, i32, i32) {
    %c0_i32 = arith.constant 0 : i32
    %c0_i32_0 = arith.constant 0 : i32
    %c0_i32_1 = arith.constant 0 : i32
    %c0_i32_2 = arith.constant 0 : i32
    return %c0_i32, %c0_i32_0, %c0_i32_1 : i32, i32, i32
  }
  func.func @transform_4(%arg0: i32, %arg1: i32) -> (i32, i32) {
    %c0_i32 = arith.constant 0 : i32
    %c0_i32_0 = arith.constant 0 : i32
    %c0_i32_1 = arith.constant 0 : i32
    return %c0_i32, %c0_i32_0 : i32, i32
  }
  func.func @transform_5(%arg0: i32, %arg1: i32) -> (i32, i32) {
    %c0_i32 = arith.constant 0 : i32
    %c0_i32_0 = arith.constant 0 : i32
    %c0_i32_1 = arith.constant 0 : i32
    return %c0_i32, %c0_i32_0 : i32, i32
  }
  func.func @transform_6(%arg0: i32, %arg1: i32) -> (i32, i32) {
    %c0_i32 = arith.constant 0 : i32
    %c0_i32_0 = arith.constant 0 : i32
    %c0_i32_1 = arith.constant 0 : i32
    return %c0_i32, %c0_i32_0 : i32, i32
  }
  func.func @transform_7(%arg0: i32, %arg1: i32) -> (i32, i32, i32) {
    %c0_i32 = arith.constant 0 : i32
    %c0_i32_0 = arith.constant 0 : i32
    %c0_i32_1 = arith.constant 0 : i32
    %c0_i32_2 = arith.constant 0 : i32
    return %c0_i32, %c0_i32_0, %c0_i32_1 : i32, i32, i32
  }
  func.func @transform_8(%arg0: i32, %arg1: i32) -> (i32, i32, i32, i32) {
    %c0_i32 = arith.constant 0 : i32
    %c0_i32_0 = arith.constant 0 : i32
    %c0_i32_1 = arith.constant 0 : i32
    %c0_i32_2 = arith.constant 0 : i32
    return %arg0, %c0_i32, %c0_i32_0, %c0_i32_1 : i32, i32, i32, i32
  }
  func.func @transform_9(%arg0: i32, %arg1: i32) -> (i32, i32, i32, i32) {
    %c0_i32 = arith.constant 0 : i32
    %c0_i32_0 = arith.constant 0 : i32
    %c0_i32_1 = arith.constant 0 : i32
    return %arg0, %c0_i32, %c0_i32_0, %arg1 : i32, i32, i32, i32
  }
}

</mosaic_0001>

<bundles_post_ra>
// kernel: mednext_up_block.2
= control target key start
LH: loop header
LB: loop body
LE: loop exit
PB: predicated region body
PF: predicated region fallthrough
CT: control target
= control target key end

     0   :  { %s609_s9 = smov 0   ;;  %s611_s10 = smov 0   ;;  %s777_s0 = inlined_call_operand.vmem [shape: f32[2,4,256], index: 0, kind: input, shape index: {}]   ;;  %s778_s1 = inlined_call_operand.vmem [shape: f32[4,4,4,1], index: 1, kind: input, shape index: {}]   ;;  %s779_s2 = inlined_call_operand.vmem [shape: f32[2,2,4,1], index: 2, kind: output, shape index: {}]  }
   0x1   :  { %s613_s11 = smov 0  }
   0x2 LB: > { %s24_s12 = sadd.s32 1, %s586_s10  ;;  %p527_p0 = scmp.ge.s32.totalorder %s590_s11, 1  ;;  %s590_s11 = sphi %s613_s11, %s12_s11   ;;  %s586_s10 = sphi %s611_s10, %s781_s10   ;;  %s582_s9 = sphi %s609_s9, %s780_s9  }
   0x3   : > { %p26_p1 = scmp.ge.s32.totalorder %s24_s12, 2  ;;  %p131_p2 = scmp.lt.s32.totalorder %s590_s11, 3 }
   0x5   : > { %s783_s12 = smov (%p26_p1, %s24_s12), 0  ;;  %p132_p3 = pnand %p527_p0, %p131_p2 }
   0x6   : > { %p158_p4 = scmp.lt.s32.totalorder (!%p132_p3), %s582_s9, 1 }
   0x7   : > { %135 = sbr.rel (%p132_p3) target bundleno = 339 (0x153), region = 28 }
   0xc   : > { %v182_v0 = vld [vmem:[%s778_s1 + $0x8] sm:$0xf]  ;;  %v180_v1 = vld [vmem:[%s778_s1] sm:$0xf]  ;;  %v592_v2 = vmov 0   ;;  %s785_s9 = smov (!%p158_p4, %s582_s9), 1 }
   0xd   : > { %564 = vset.pattern.permute.xlu1 %v592_v2  ;;  %563 = vset.pattern.permute.xlu0 %v592_v2  ;;  %v183_v3 = vld [vmem:[%s778_s1 + $0xc] sm:$0xf]  ;;  %v181_v4 = vld [vmem:[%s778_s1 + $0x4] sm:$0xf]  ;;  %v186_v5 = vld [vmem:[%s778_s1 + $0x18] sm:$0xf] }
   0xe   : > { %227 = vperm.xlu1 %564, %v182_v0   ;;  %198 = vperm.xlu0 %563, %v180_v1   ;;  %v185_v6 = vld [vmem:[%s778_s1 + $0x14] sm:$0xf]  ;;  %v184_v7 = vld [vmem:[%s778_s1 + $0x10] sm:$0xf]  ;;  %v188_v9 = vld [vmem:[%s778_s1 + $0x20] sm:$0xf] }
   0xf   : > { %565 = vset.pattern.permute.xlu2 %v592_v2  ;;  %v193_v8 = vld [vmem:[%s778_s1 + $0x34] sm:$0xf]  ;;  %v187_v10 = vld [vmem:[%s778_s1 + $0x1c] sm:$0xf]  ;;  %v190_v11 = vld [vmem:[%s778_s1 + $0x28] sm:$0xf] }
  0x10   : > { %293 = vperm.xlu2 %565, %v186_v5   ;;  %v189_v12 = vld [vmem:[%s778_s1 + $0x24] sm:$0xf]  ;;  %v192_v13 = vld [vmem:[%s778_s1 + $0x30] sm:$0xf]  ;;  %v191_v14 = vld [vmem:[%s778_s1 + $0x2c] sm:$0xf] }
  0x11   : > { %v195_v15 = vld [vmem:[%s778_s1 + $0x3c] sm:$0xf]  ;;  %v194_v16 = vld [vmem:[%s778_s1 + $0x38] sm:$0xf]  ;;  %s535_s21 = sshll.u32 %s785_s9, 3  ;;  %vm256_vm0 = vcmask 1043456  }
  0x12   : > { %s165_s24 = scalar_lea.vmem %s777_s0, %s535_s21  ;;  %vm176_vm1 = vcmask 3072   ;;  %s171_s27 = scalar_lea.vmem %s779_s2, %s535_s21 }
  0x13   : > { %v179_v17 = vld [vmem:[%s165_s24] sm:$0xff] }
  0x14   : > { %v202_v20 = vperm.slane %v179_v17, 0  ;;  %v203_v21 = vperm.slane %v179_v17, 4  ;;  %v215_v22 = vperm.slane %v179_v17, 1  ;;  %v216_v23 = vperm.slane %v179_v17, 5 }
  0x15   : > { %v230_v24 = vperm.slane %v179_v17, 2  ;;  %v231_v25 = vperm.slane %v179_v17, 6  ;;  %v245_v26 = vperm.slane %v179_v17, 3  ;;  %v246_v27 = vperm.slane %v179_v17, 7 }
  0x16   : > { %242 = vperm.xlu1 %564, %v183_v3   ;;  %212 = vperm.xlu0 %563, %v181_v4   ;;  %v687_v28 = vperm.slane %v202_v20, 0  ;;  %v689_v29 = vperm.slane %v203_v21, 0  ;;  %v691_v30 = vperm.slane %v215_v22, 1  ;;  %v693_v31 = vperm.slane %v216_v23, 1 }
  0x17   : > { %v695_v32 = vperm.slane %v230_v24, 2  ;;  %v697_v33 = vperm.slane %v231_v25, 2  ;;  %v699_v35 = vperm.slane %v245_v26, 3  ;;  %v701_v36 = vperm.slane %v246_v27, 3 }
  0x18   : > { %388 = vperm.xlu2 %565, %v193_v8   ;;  %v593_v17 = vmov 0.0  }
  0x19   : > { %177 = vst.msk [vmem:[#allocation2] sm:$0xf] %vm176_vm1, %v593_v17 }
  0x1a   : > { %178 = vst.msk [vmem:[#allocation3] sm:$0xf] %vm176_vm1, %v593_v17 }
  0x1e   : > { %284 = vperm.xlu1 %564, %v185_v6   ;;  %277 = vperm.xlu0 %563, %v184_v7  }
  0x26   : > { %329 = vperm.xlu1 %564, %v188_v9   ;;  %302 = vperm.xlu0 %563, %v187_v10  }
  0x2e   : > { %345 = vperm.xlu1 %564, %v190_v11   ;;  %336 = vperm.xlu0 %563, %v189_v12  }
  0x36   : > { %381 = vperm.xlu1 %564, %v192_v13   ;;  %354 = vperm.xlu0 %563, %v191_v14  }
  0x3e   : > { %406 = vperm.xlu1 %564, %v195_v15   ;;  %397 = vperm.xlu0 %563, %v194_v16  }
  0x6a   : > { %v294_v58 = vpop.permute.xlu2 %293 }
  0x6b   : > { %v296_v2 = vmul.f32 %v294_v58, %v695_v32  ;;  %v297_v3 = vmul.f32 %v294_v58, %v697_v33 }
  0x80   : > { %v228_v18 = vpop.permute.xlu1 %227  ;;  %v199_v19 = vpop.permute.xlu0 %198 }
  0x81   : > { %v208_v38 = vmul.f32 %v687_v28, %v199_v19  ;;  %v209_v39 = vmul.f32 %v689_v29, %v199_v19  ;;  %v236_v42 = vmul.f32 %v695_v32, %v228_v18  ;;  %v237_v43 = vmul.f32 %v697_v33, %v228_v18 }
  0x88   : > { %v243_v34 = vpop.permute.xlu1 %242  ;;  %v213_v37 = vpop.permute.xlu0 %212 }
  0x89   : > { %v221_v40 = vmul.f32 %v691_v30, %v213_v37  ;;  %v222_v41 = vmul.f32 %v693_v31, %v213_v37  ;;  %v251_v46 = vmul.f32 %v699_v35, %v243_v34  ;;  %v252_v47 = vmul.f32 %v701_v36, %v243_v34 }
  0x8b   : > { %v223_v44 = vadd.f32 %v221_v40, %v208_v38  ;;  %v224_v45 = vadd.f32 %v222_v41, %v209_v39 }
  0x8d   : > { %v238_v48 = vadd.f32 %v236_v42, %v223_v44  ;;  %v239_v49 = vadd.f32 %v237_v43, %v224_v45 }
  0x8f   : > { %v253_v50 = vadd.f32 %v251_v46, %v238_v48  ;;  %v254_v51 = vadd.f32 %v252_v47, %v239_v49 }
  0x90   : > { %v285_v52 = vpop.permute.xlu1 %284  ;;  %v278_v53 = vpop.permute.xlu0 %277 }
  0x91   : > { %v287_v54 = vmul.f32 %v285_v52, %v691_v30  ;;  %v288_v55 = vmul.f32 %v285_v52, %v693_v31  ;;  %v280_v56 = vmul.f32 %v278_v53, %v687_v28  ;;  %v281_v57 = vmul.f32 %v278_v53, %v689_v29 }
  0x92   : > { %v257_v59 = vsel %vm256_vm0, %v253_v50, 0.0  ;;  %v258_v60 = vsel %vm256_vm0, %v254_v51, 0.0  ;;  %v266_v62 = vmul.f32 %v253_v50, %v253_v50  ;;  %v267_v63 = vmul.f32 %v254_v51, %v254_v51  ;;  %v389_v50 = vpop.permute.xlu2 %388 }
  0x93   : > { %v259_v61 = vadd.f32 %v258_v60, %v257_v59  ;;  %v289_v0 = vadd.f32 %v287_v54, %v280_v56  ;;  %v290_v1 = vadd.f32 %v288_v55, %v281_v57  ;;  %v391_v58 = vmul.f32 %v389_v50, %v691_v30 }
  0x94   : > { %v268_v6 = vsel %vm256_vm0, %v266_v62, 0.0  ;;  %v269_v7 = vsel %vm256_vm0, %v267_v63, 0.0  ;;  %v392_v59 = vmul.f32 %v389_v50, %v693_v31 }
  0x95   : > { %260 = vadd.xlane.f32.xlu2 %v259_v61  ;;  %v298_v8 = vadd.f32 %v296_v2, %v289_v0  ;;  %v299_v9 = vadd.f32 %v297_v3, %v290_v1  ;;  %v270_v14 = vadd.f32 %v269_v7, %v268_v6 }
  0x98   : > { %v330_v4 = vpop.permute.xlu1 %329  ;;  %v303_v5 = vpop.permute.xlu0 %302 }
  0x99   : > { %v305_v10 = vmul.f32 %v303_v5, %v699_v35  ;;  %v306_v11 = vmul.f32 %v303_v5, %v701_v36  ;;  %v332_v27 = vmul.f32 %v330_v4, %v687_v28  ;;  %v333_v34 = vmul.f32 %v330_v4, %v689_v29 }
  0x9b   : > { %v307_v12 = vadd.f32 %v305_v10, %v298_v8  ;;  %v308_v13 = vadd.f32 %v306_v11, %v299_v9 }
  0x9d   : > { %271 = vadd.xlane.f32.xlu2 %v270_v14  ;;  %v318_v15 = vmul.f32 %v307_v12, %v307_v12  ;;  %v319_v16 = vmul.f32 %v308_v13, %v308_v13  ;;  %v310_v23 = vsel %vm256_vm0, %v307_v12, 0.0  ;;  %v311_v24 = vsel %vm256_vm0, %v308_v13, 0.0  ;;  %v265_v14 = vld [vmem:[#allocation3] sm:$0xf] }
  0x9e   : > { %v312_v37 = vadd.f32 %v311_v24, %v310_v23 }
  0x9f   : > { %v320_v18 = vsel %vm256_vm0, %v318_v15, 0.0  ;;  %v321_v19 = vsel %vm256_vm0, %v319_v16, 0.0 }
  0xa0   : > { %v346_v20 = vpop.permute.xlu1 %345  ;;  %v337_v21 = vpop.permute.xlu0 %336  ;;  %v322_v22 = vadd.f32 %v321_v19, %v320_v18 }
  0xa1   : > { %v339_v25 = vmul.f32 %v337_v21, %v691_v30  ;;  %v340_v26 = vmul.f32 %v337_v21, %v693_v31  ;;  %v348_v40 = vmul.f32 %v346_v20, %v695_v32  ;;  %v349_v41 = vmul.f32 %v346_v20, %v697_v33 }
  0xa2   : > { %323 = vadd.xlane.f32.xlu0 %v322_v22 }
  0xa3   : > { %v341_v38 = vadd.f32 %v339_v25, %v332_v27  ;;  %v342_v39 = vadd.f32 %v340_v26, %v333_v34 }
  0xa5   : > { %313 = vadd.xlane.f32.xlu2 %v312_v37  ;;  %v350_v44 = vadd.f32 %v348_v40, %v341_v38  ;;  %v351_v45 = vadd.f32 %v349_v41, %v342_v39 }
  0xa8   : > { %v382_v42 = vpop.permute.xlu1 %381  ;;  %v355_v43 = vpop.permute.xlu0 %354 }
  0xa9   : > { %v357_v46 = vmul.f32 %v355_v43, %v699_v35  ;;  %v358_v47 = vmul.f32 %v355_v43, %v701_v36  ;;  %v384_v51 = vmul.f32 %v382_v42, %v687_v28  ;;  %v385_v52 = vmul.f32 %v382_v42, %v689_v29 }
  0xab   : > { %v359_v48 = vadd.f32 %v357_v46, %v350_v44  ;;  %v360_v49 = vadd.f32 %v358_v47, %v351_v45  ;;  %v393_v29 = vadd.f32 %v391_v58, %v384_v51  ;;  %v394_v0 = vadd.f32 %v392_v59, %v385_v52 }
  0xad   : > { %v362_v53 = vsel %vm256_vm0, %v359_v48, 0.0  ;;  %v363_v54 = vsel %vm256_vm0, %v360_v49, 0.0  ;;  %v370_v55 = vmul.f32 %v359_v48, %v359_v48  ;;  %v371_v56 = vmul.f32 %v360_v49, %v360_v49 }
  0xae   : > { %v364_v57 = vadd.f32 %v363_v54, %v362_v53 }
  0xaf   : > { %v372_v60 = vsel %vm256_vm0, %v370_v55, 0.0  ;;  %v373_v61 = vsel %vm256_vm0, %v371_v56, 0.0 }
  0xb0   : > { %v407_v62 = vpop.permute.xlu1 %406  ;;  %v398_v63 = vpop.permute.xlu0 %397  ;;  %365 = vadd.xlane.f32.xlu1 %v364_v57  ;;  %v374_v28 = vadd.f32 %v373_v61, %v372_v60 }
  0xb1   : > { %v400_v1 = vmul.f32 %v398_v63, %v695_v32  ;;  %v401_v2 = vmul.f32 %v398_v63, %v697_v33  ;;  %v409_v3 = vmul.f32 %v407_v62, %v699_v35  ;;  %v410_v30 = vmul.f32 %v407_v62, %v701_v36  ;;  %v255_v35 = vld [vmem:[#allocation2] sm:$0xf] }
  0xb2   : > { %375 = vadd.xlane.f32.xlu2 %v374_v28 }
  0xb3   : > { %v402_v31 = vadd.f32 %v400_v1, %v393_v29  ;;  %v403_v4 = vadd.f32 %v401_v2, %v394_v0 }
  0xb5   : > { %v411_v5 = vadd.f32 %v409_v3, %v402_v31  ;;  %v412_v6 = vadd.f32 %v410_v30, %v403_v4 }
  0xb7   : > { %v414_v7 = vsel %vm256_vm0, %v411_v5, 0.0  ;;  %v415_v8 = vsel %vm256_vm0, %v412_v6, 0.0  ;;  %v422_v9 = vmul.f32 %v411_v5, %v411_v5  ;;  %v423_v10 = vmul.f32 %v412_v6, %v412_v6 }
  0xb8   : > { %v416_v11 = vadd.f32 %v415_v8, %v414_v7 }
  0xb9   : > { %v424_v32 = vsel %vm256_vm0, %v422_v9, 0.0  ;;  %v425_v33 = vsel %vm256_vm0, %v423_v10, 0.0 }
  0xba   : > { %417 = vadd.xlane.f32.xlu2 %v416_v11  ;;  %v426_v12 = vadd.f32 %v425_v33, %v424_v32 }
  0xbc   : > { %427 = vadd.xlane.f32.xlu0 %v426_v12 }
 0x108   : > { %v261_v36 = vpop.xlane.xlu2 %260 }
 0x109   : > { %v262_v13 = vadd.f32 %v261_v36, %v255_v35 }
 0x10b   : > { %264 = vst.msk [vmem:[#allocation2] sm:$0xf] %vm176_vm1, %v262_v13 }
 0x110   : > { %v272_v15 = vpop.xlane.xlu2 %271 }
 0x111   : > { %v273_v16 = vadd.f32 %v272_v15, %v265_v14 }
 0x112   : > { %v309_v17 = vld [vmem:[#allocation2] sm:$0xf] }
 0x113   : > { %274 = vst.msk [vmem:[#allocation3] sm:$0xf] %vm176_vm1, %v273_v16 }
 0x115   : > { %v324_v20 = vpop.xlane.xlu0 %323 }
 0x118   : > { %v314_v18 = vpop.xlane.xlu2 %313 }
 0x119   : > { %v315_v19 = vadd.f32 %v314_v18, %v309_v17 }
 0x11a   : > { %v317_v21 = vld [vmem:[#allocation3] sm:$0xf] }
 0x11b   : > { %v325_v22 = vadd.f32 %v324_v20, %v317_v21  ;;  %316 = vst.msk [vmem:[#allocation2] sm:$0xf] %vm176_vm1, %v315_v19 }
 0x11d   : > { %326 = vst.msk [vmem:[#allocation3] sm:$0xf] %vm176_vm1, %v325_v22 }
 0x122   : > { %v361_v24 = vld [vmem:[#allocation2] sm:$0xf] }
 0x123   : > { %v366_v23 = vpop.xlane.xlu1 %365 }
 0x124   : > { %v367_v25 = vadd.f32 %v366_v23, %v361_v24  ;;  %v369_v26 = vld [vmem:[#allocation3] sm:$0xf] }
 0x125   : > { %v376_v27 = vpop.xlane.xlu2 %375 }
 0x126   : > { %368 = vst.msk [vmem:[#allocation2] sm:$0xf] %vm176_vm1, %v367_v25  ;;  %v377_v34 = vadd.f32 %v376_v27, %v369_v26 }
 0x128   : > { %378 = vst.msk [vmem:[#allocation3] sm:$0xf] %vm176_vm1, %v377_v34 }
 0x12d   : > { %v413_v37 = vld [vmem:[#allocation2] sm:$0xf]  ;;  %v418_v38 = vpop.xlane.xlu2 %417 }
 0x12e   : > { %v419_v39 = vadd.f32 %v418_v38, %v413_v37 }
 0x12f   : > { %v428_v40 = vpop.xlane.xlu0 %427  ;;  %v421_v41 = vld [vmem:[#allocation3] sm:$0xf] }
 0x130   : > { %420 = vst.msk [vmem:[#allocation2] sm:$0xf] %vm176_vm1, %v419_v39  ;;  %v429_v42 = vadd.f32 %v428_v40, %v421_v41 }
 0x132   : > { %430 = vst.msk [vmem:[#allocation3] sm:$0xf] %vm176_vm1, %v429_v42 }
 0x137   : > { %v434_v43 = vld [vmem:[#allocation2] sm:$0xf] }
 0x138   : > { %v435_v44 = vmul.f32 0.0009765625, %v434_v43 }
 0x139   : > { %v436_v45 = vld [vmem:[#allocation3] sm:$0xf] }
 0x13a   : > { %v438_v46 = vmul.f32 %v435_v44, %v435_v44  ;;  %440 = vst.msk [vmem:[%s171_s27] sm:$0xf] %vm176_vm1, %v435_v44  ;;  %v437_v47 = vmul.f32 0.0009765625, %v436_v45 }
 0x13c   : > { %v439_v48 = vsub.f32 %v437_v47, %v438_v46 }
 0x13e   : > { %v441_v49 = vadd.f32 1e-05, %v439_v48 }
 0x140   : > { %566 = vrsqrt.f32 %v441_v49  ;;  %vm448_vm3 = vweird.f32 %v441_v49 }
 0x146   : > { %v567_v50 = vpop.eup %566 }
 0x147   : > { %v443_v51 = vmul.f32 %v567_v50, %v441_v49  ;;  %vm449_vm2 = vweird.f32 %v567_v50 }
 0x148   : > { %vm450_vm4 = vmor %vm448_vm3, %vm449_vm2 }
 0x149   : > { %v444_v52 = vmul.f32 %v567_v50, %v443_v51 }
 0x14b   : > { %v445_v53 = vmul.f32 0.5, %v444_v52 }
 0x14d   : > { %v446_v54 = vsub.f32 1.5, %v445_v53 }
 0x14f   : > { %v447_v55 = vmul.f32 %v567_v50, %v446_v54 }
 0x151   : > { %v451_v56 = vsel %vm450_vm4, %v567_v50, %v447_v55 }
 0x152   : > { %532 = vst.msk [vmem:[%s171_s27 + $0x4] sm:$0xf] %vm176_vm1, %v451_v56 }
 0x153 PF: > { %s12_s11 = sadd.s32 1, %s590_s11   ;;  %s780_s9 = smov %s586_s10 }
 0x154   : > { %p9_p5 = scmp.ge.s32.totalorder %s12_s11, 4   ;;  %s781_s10 = smov %s783_s12 }
 0x156   :  { %11 = sbr.rel (!%p9_p5) target bundleno = 2 (0x2), region = 67 }

// kernel: mednext_up_block.3
= control target key start
LH: loop header
LB: loop body
LE: loop exit
PB: predicated region body
PF: predicated region fallthrough
CT: control target
= control target key end

     0   :  { %s1961_s29 = smov 0   ;;  %s1963_s30 = smov 0   ;;  %s2908_s0 = inlined_call_operand.vmem [shape: f32[2,4,256], index: 0, kind: input, shape index: {}]   ;;  %s2909_s1 = inlined_call_operand.vmem [shape: f32[4,4,4,1], index: 1, kind: input, shape index: {}]   ;;  %s2910_s2 = inlined_call_operand.vmem [shape: f32[4,1], index: 2, kind: input, shape index: {}]   ;;  %s2911_s3 = inlined_call_operand.vmem [shape: f32[4,16,1], index: 3, kind: input, shape index: {}]   ;;  %s2912_s4 = inlined_call_operand.vmem [shape: f32[16,1], index: 4, kind: input, shape index: {}]   ;;  %s2913_s5 = inlined_call_operand.vmem [shape: f32[2,16], index: 5, kind: input, shape index: {}]   ;;  %s2914_s6 = inlined_call_operand.vmem [shape: f32[2,1], index: 6, kind: input, shape index: {}]   ;;  %s2915_s7 = inlined_call_operand.vmem [shape: f32[2,4,1], index: 7, kind: input, shape index: {}]   ;;  %s2916_s8 = inlined_call_operand.vmem [shape: f32[2,2,4,1], index: 8, kind: input, shape index: {}]   ;;  %s2917_s9 = inlined_call_operand.vmem [shape: f32[2,4,2,256], index: 9, kind: output, shape index: {}]  }
   0x1   :  { %s1965_s10 = smov 0  }
   0x2 LB: > { %s31_s11 = sadd.s32 1, %s1903_s30  ;;  %p1767_p0 = scmp.ge.s32.totalorder %s1907_s10, 1  ;;  %s1907_s10 = sphi %s1965_s10, %s19_s10   ;;  %s1903_s30 = sphi %s1963_s30, %s2938_s30   ;;  %s1899_s29 = sphi %s1961_s29, %s2937_s29  }
   0x3   : > { %p33_p1 = scmp.ge.s32.totalorder %s31_s11, 2  ;;  %p318_p2 = scmp.lt.s32.totalorder %s1907_s10, 3 }
   0x5   : > { %s2940_s11 = smov (%p33_p1, %s31_s11), 0  ;;  %p319_p3 = pnand %p1767_p0, %p318_p2 }
   0x6   : > { %p368_p4 = scmp.lt.s32.totalorder (!%p319_p3), %s1899_s29, 1 }
   0x7   : > { %322 = sbr.rel (%p319_p3) target bundleno = 524 (0x20c), region = 56 }
   0xc   : > { %v399_v0 = vld [vmem:[%s2909_s1 + $0x18] sm:$0xf]  ;;  %v397_v1 = vld [vmem:[%s2909_s1 + $0x10] sm:$0xf]  ;;  %v1909_v2 = vmov 0   ;;  %s2942_s29 = smov (!%p368_p4, %s1899_s29), 1 }
   0xd   : > { %1820 = vset.pattern.permute.xlu2 %v1909_v2  ;;  %1819 = vset.pattern.permute.xlu1 %v1909_v2  ;;  %v393_v3 = vld [vmem:[%s2909_s1] sm:$0xf]  ;;  %s1789_s18 = sshll.u32 %s2942_s29, 3  ;;  %v400_v4 = vld [vmem:[%s2909_s1 + $0x1c] sm:$0xf]  ;;  %v410_v20 = vld [vmem:[%s2911_s3 + $0x8] sm:$0xff] }
   0xe   : > { %1818 = vset.pattern.permute.xlu0 %v1909_v2  ;;  %827 = vperm.xlu1 %1819, %v399_v0   ;;  %v398_v5 = vld [vmem:[%s2909_s1 + $0x14] sm:$0xf]  ;;  %v394_v6 = vld [vmem:[%s2909_s1 + $0x4] sm:$0xf]  ;;  %s381_s27 = scalar_lea.vmem %s2916_s8, %s1789_s18  ;;  %v421_v7 = vld [vmem:[%s2915_s7] sm:$0xf]  ;;  %s375_s25 = scalar_lea.vmem %s2908_s0, %s1789_s18 }
   0xf   : > { %811 = vperm.xlu0 %1818, %v397_v1   ;;  %432 = vperm.xlu2 %1820, %v393_v3   ;;  %v1775_v8 = vld [vmem:[%s381_s27 + $0x4] sm:$0xf]  ;;  %v395_v10 = vld [vmem:[%s2909_s1 + $0x8] sm:$0xf]  ;;  %v405_v11 = vld [vmem:[%s2909_s1 + $0x30] sm:$0xf] }
  0x10   : > { %v427_v9 = vmul.f32 %v1775_v8, %v421_v7  ;;  %v424_v12 = vld [vmem:[%s381_s27] sm:$0xf]  ;;  %v1774_v14 = vld [vmem:[%s2915_s7 + $0x4] sm:$0xf]  ;;  %v396_v15 = vld [vmem:[%s2909_s1 + $0xc] sm:$0xf] }
  0x11   : > { %v406_v17 = vld [vmem:[%s2909_s1 + $0x34] sm:$0xf]  ;;  %v408_v18 = vld [vmem:[%s2909_s1 + $0x3c] sm:$0xf]  ;;  %v407_v19 = vld [vmem:[%s2909_s1 + $0x38] sm:$0xf] }
  0x12   : > { %v428_v13 = vmul.f32 %v427_v9, %v424_v12  ;;  %v401_v21 = vld [vmem:[%s2909_s1 + $0x20] sm:$0xf]  ;;  %v412_v22 = vld [vmem:[%s2911_s3 + $0x18] sm:$0xff]  ;;  %v402_v23 = vld [vmem:[%s2909_s1 + $0x24] sm:$0xf]  ;;  %s1791_s27 = sshll.u32 %s2942_s29, 4 }
  0x13   : > { %v411_v24 = vld [vmem:[%s2911_s3 + $0x10] sm:$0xff]  ;;  %v409_v25 = vld [vmem:[%s2911_s3] sm:$0xff]  ;;  %v414_v26 = vld [vmem:[%s2911_s3 + $0x28] sm:$0xff]  ;;  %s390_s12 = scalar_lea.vmem %s2917_s9, %s1791_s27 }
  0x14   : > { %v429_v16 = vsub.f32 %v1774_v14, %v428_v13  ;;  %v413_v27 = vld [vmem:[%s2911_s3 + $0x20] sm:$0xff]  ;;  %v403_v28 = vld [vmem:[%s2909_s1 + $0x28] sm:$0xf]  ;;  %v416_v29 = vld [vmem:[%s2911_s3 + $0x38] sm:$0xff] }
  0x15   : > { %v415_v30 = vld [vmem:[%s2911_s3 + $0x30] sm:$0xff]  ;;  %v404_v31 = vld [vmem:[%s2909_s1 + $0x2c] sm:$0xf]  ;;  %v420_v33 = vld [vmem:[%s2914_s6] sm:$0x3] }
  0x16   : > { %836 = vperm.xlu1 %1819, %v400_v4   ;;  %v419_v32 = vld [vmem:[%s2912_s4 + $0x8] sm:$0xff]  ;;  %v418_v34 = vld [vmem:[%s2912_s4] sm:$0xff] }
  0x17   : > { %818 = vperm.xlu0 %1818, %v398_v5   ;;  %446 = vperm.xlu2 %1820, %v394_v6   ;;  %v392_v36 = vld [vmem:[%s375_s25] sm:$0xff] }
  0x18   : > { %v436_v38 = vperm.slane %v392_v36, 0  ;;  %v437_v39 = vperm.slane %v392_v36, 4  ;;  %v449_v48 = vperm.slane %v392_v36, 1  ;;  %v450_v49 = vperm.slane %v392_v36, 5 }
  0x19   : > { %v464_v50 = vperm.slane %v392_v36, 2  ;;  %v465_v51 = vperm.slane %v392_v36, 6  ;;  %v479_v63 = vperm.slane %v392_v36, 3  ;;  %v480_v0 = vperm.slane %v392_v36, 7 }
  0x1a   : > { %v2079_v40 = vperm.slane %v436_v38, 0  ;;  %v2081_v41 = vperm.slane %v437_v39, 0  ;;  %v453_v52 = vperm.slane %v449_v48, 1  ;;  %v454_v53 = vperm.slane %v450_v49, 1 }
  0x1b   : > { %v2089_v59 = vperm.slane %v464_v50, 2  ;;  %v2091_v60 = vperm.slane %v465_v51, 2  ;;  %v2097_v5 = vperm.slane %v479_v63, 3  ;;  %v2099_v6 = vperm.slane %v480_v0, 3 }
  0x1e   : > { %491 = vperm.xlu1 %1819, %v427_v9  }
  0x1f   : > { %461 = vperm.xlu0 %1818, %v395_v10   ;;  %1381 = vperm.xlu2 %1820, %v405_v11  }
  0x26   : > { %476 = vperm.xlu1 %1819, %v396_v15  }
  0x27   : > { %1388 = vperm.xlu0 %1818, %v406_v17   ;;  %498 = vperm.xlu2 %1820, %v429_v16  }
  0x2e   : > { %1406 = vperm.xlu1 %1819, %v408_v18  }
  0x2f   : > { %1397 = vperm.xlu0 %1818, %v407_v19   ;;  %510 = vperm.xlu2 %1820, %v410_v20  }
  0x36   : > { %1096 = vperm.xlu1 %1819, %v401_v21  }
  0x37   : > { %526 = vperm.xlu0 %1818, %v412_v22   ;;  %1103 = vperm.xlu2 %1820, %v402_v23  }
  0x3e   : > { %521 = vperm.xlu1 %1819, %v411_v24  }
  0x3f   : > { %505 = vperm.xlu0 %1818, %v409_v25   ;;  %546 = vperm.xlu2 %1820, %v414_v26  }
  0x46   : > { %541 = vperm.xlu1 %1819, %v413_v27  }
  0x47   : > { %1112 = vperm.xlu0 %1818, %v403_v28   ;;  %566 = vperm.xlu2 %1820, %v416_v29  }
  0x4e   : > { %561 = vperm.xlu1 %1819, %v415_v30  }
  0x4f   : > { %1121 = vperm.xlu0 %1818, %v404_v31   ;;  %586 = vperm.xlu2 %1820, %v419_v32  }
  0x56   : > { %755 = vperm.xlu1 %1819, %v420_v33  }
  0x57   : > { %581 = vperm.xlu0 %1818, %v418_v34  }
  0x69   : > { %v433_v35 = vpop.permute.xlu2 %432 }
  0x6a   : > { %v442_v10 = vmul.f32 %v2079_v40, %v433_v35  ;;  %v443_v11 = vmul.f32 %v2081_v41, %v433_v35 }
  0x71   : > { %v447_v37 = vpop.permute.xlu2 %446 }
  0x72   : > { %v455_v14 = vmul.f32 %v453_v52, %v447_v37  ;;  %v456_v15 = vmul.f32 %v454_v53, %v447_v37 }
  0x74   : > { %v457_v24 = vadd.f32 %v455_v14, %v442_v10  ;;  %v458_v25 = vadd.f32 %v456_v15, %v443_v11 }
  0x79   : > { %v1382_v42 = vpop.permute.xlu2 %1381 }
  0x7a   : > { %v1384_v43 = vmul.f32 %v1382_v42, %v2079_v40  ;;  %v1385_v44 = vmul.f32 %v1382_v42, %v2081_v41 }
  0x80   : > { %v828_v45 = vpop.permute.xlu1 %827 }
  0x81   : > { %v812_v46 = vpop.permute.xlu0 %811  ;;  %v2085_v47 = vpop.permute.xlu2 %498  ;;  %v830_v3 = vmul.f32 %v828_v45, %v2089_v59  ;;  %v831_v4 = vmul.f32 %v828_v45, %v2091_v60 }
  0x82   : > { %v814_v61 = vmul.f32 %v812_v46, %v2079_v40  ;;  %v815_v62 = vmul.f32 %v812_v46, %v2081_v41 }
  0x88   : > { %v837_v54 = vpop.permute.xlu1 %836 }
  0x89   : > { %v819_v55 = vpop.permute.xlu0 %818  ;;  %v2087_v56 = vpop.permute.xlu2 %510  ;;  %v839_v18 = vmul.f32 %v837_v54, %v2097_v5  ;;  %v840_v19 = vmul.f32 %v837_v54, %v2099_v6 }
  0x8a   : > { %v821_v57 = vmul.f32 %v819_v55, %v453_v52  ;;  %v822_v58 = vmul.f32 %v819_v55, %v454_v53 }
  0x8c   : > { %v823_v1 = vadd.f32 %v821_v57, %v814_v61  ;;  %v824_v2 = vadd.f32 %v822_v58, %v815_v62 }
  0x8e   : > { %v832_v12 = vadd.f32 %v830_v3, %v823_v1  ;;  %v833_v13 = vadd.f32 %v831_v4, %v824_v2 }
  0x90   : > { %v2101_v7 = vpop.permute.xlu1 %491  ;;  %v841_v22 = vadd.f32 %v839_v18, %v832_v12  ;;  %v842_v23 = vadd.f32 %v840_v19, %v833_v13 }
  0x91   : > { %v462_v8 = vpop.permute.xlu0 %461  ;;  %v1104_v9 = vpop.permute.xlu2 %1103 }
  0x92   : > { %v2105_v16 = vmul.f32 %v1104_v9, %v453_v52  ;;  %v2107_v17 = vmul.f32 %v1104_v9, %v454_v53  ;;  %v470_v20 = vmul.f32 %v2089_v59, %v462_v8  ;;  %v471_v21 = vmul.f32 %v2091_v60, %v462_v8 }
  0x93   : > { %v843_v32 = vmul.f32 %v841_v22, %v2101_v7  ;;  %v844_v33 = vmul.f32 %v842_v23, %v2101_v7 }
  0x94   : > { %v472_v27 = vadd.f32 %v470_v20, %v457_v24  ;;  %v473_v28 = vadd.f32 %v471_v21, %v458_v25 }
  0x95   : > { %v2122_v48 = vadd.f32 %v843_v32, %v2085_v47  ;;  %v2125_v49 = vadd.f32 %v844_v33, %v2085_v47 }
  0x97   : > { %v847_v57 = vperm.slane %v2122_v48, 0  ;;  %v2921_v58 = vperm.slane %v2125_v49, 0  ;;  %v853_v0 = vperm.slane %v2122_v48, 1  ;;  %v2923_v2 = vperm.slane %v2122_v48, 2 }
  0x98   : > { %v477_v26 = vpop.permute.xlu1 %476  ;;  %v2922_v3 = vperm.slane %v2122_v48, 3  ;;  %v2920_v4 = vperm.slane %v2125_v49, 1 }
  0x99   : > { %v1389_v29 = vpop.permute.xlu0 %1388  ;;  %v485_v30 = vmul.f32 %v2097_v5, %v477_v26  ;;  %v486_v31 = vmul.f32 %v2099_v6, %v477_v26  ;;  %v2119_v46 = vpop.permute.xlu2 %546  ;;  %v851_v10 = vmul.f32 %v847_v57, %v2087_v56  ;;  %v852_v11 = vmul.f32 %v2921_v58, %v2087_v56 }
  0x9a   : > { %v1391_v34 = vmul.f32 %v1389_v29, %v453_v52  ;;  %v1392_v35 = vmul.f32 %v1389_v29, %v454_v53 }
  0x9b   : > { %v487_v36 = vadd.f32 %v485_v30, %v472_v27  ;;  %v488_v37 = vadd.f32 %v486_v31, %v473_v28 }
  0x9c   : > { %v1393_v38 = vadd.f32 %v1391_v34, %v1384_v43  ;;  %v1394_v39 = vadd.f32 %v1392_v35, %v1385_v44 }
  0x9d   : > { %v494_v42 = vmul.f32 %v2101_v7, %v487_v36  ;;  %v495_v45 = vmul.f32 %v2101_v7, %v488_v37 }
  0x9f   : > { %v2128_v50 = vadd.f32 %v2085_v47, %v494_v42  ;;  %v2131_v52 = vadd.f32 %v2085_v47, %v495_v45  ;;  %v2919_v42 = vperm.slane %v2125_v49, 2 }
  0xa0   : > { %v1407_v51 = vpop.permute.xlu1 %1406 }
  0xa1   : > { %v1398_v43 = vpop.permute.xlu0 %1397  ;;  %v1409_v44 = vmul.f32 %v1407_v51, %v2097_v5  ;;  %v1410_v53 = vmul.f32 %v1407_v51, %v2099_v6  ;;  %v513_v61 = vperm.slane %v2128_v50, 0  ;;  %v514_v1 = vperm.slane %v2131_v52, 0  ;;  %v2151_v12 = vpop.permute.xlu2 %566 }
  0xa2   : > { %v1400_v54 = vmul.f32 %v1398_v43, %v2089_v59  ;;  %v1401_v55 = vmul.f32 %v1398_v43, %v2091_v60  ;;  %v529_v14 = vperm.slane %v2128_v50, 1  ;;  %v549_v15 = vperm.slane %v2128_v50, 2 }
  0xa3   : > { %v517_v13 = vmul.f32 %v513_v61, %v2087_v56  ;;  %v569_v18 = vperm.slane %v2128_v50, 3  ;;  %v530_v22 = vperm.slane %v2131_v52, 1  ;;  %v550_v23 = vperm.slane %v2131_v52, 2 }
  0xa4   : > { %v1402_v62 = vadd.f32 %v1400_v54, %v1393_v38  ;;  %v1403_v63 = vadd.f32 %v1401_v55, %v1394_v39  ;;  %v518_v27 = vmul.f32 %v514_v1, %v2087_v56  ;;  %v570_v28 = vperm.slane %v2131_v52, 3 }
  0xa5   : > { %v553_v36 = vmul.f32 %v549_v15, %v2119_v46  ;;  %v867_v39 = vmul.f32 %v2923_v2, %v2119_v46  ;;  %v877_v54 = vmul.f32 %v2922_v3, %v2151_v12 }
  0xa6   : > { %v1411_v8 = vadd.f32 %v1409_v44, %v1402_v62  ;;  %v1412_v9 = vadd.f32 %v1410_v53, %v1403_v63  ;;  %v574_v43 = vmul.f32 %v570_v28, %v2151_v12  ;;  %v868_v63 = vmul.f32 %v2919_v42, %v2119_v46 }
  0xa8   : > { %v1413_v19 = vmul.f32 %v1411_v8, %v2101_v7  ;;  %v1414_v20 = vmul.f32 %v1412_v9, %v2101_v7  ;;  %v1097_v21 = vpop.permute.xlu1 %1096 }
  0xa9   : > { %v2163_v24 = vpop.permute.xlu0 %526  ;;  %v1099_v25 = vmul.f32 %v1097_v21, %v2079_v40  ;;  %v1100_v26 = vmul.f32 %v1097_v21, %v2081_v41  ;;  %v2209_v8 = vpop.permute.xlu2 %586 }
  0xaa   : > { %v2172_v29 = vadd.f32 %v1413_v19, %v2085_v47  ;;  %v2175_v30 = vadd.f32 %v1414_v20, %v2085_v47  ;;  %v533_v31 = vmul.f32 %v529_v14, %v2163_v24  ;;  %v534_v32 = vmul.f32 %v530_v22, %v2163_v24 }
  0xab   : > { %v1108_v40 = vadd.f32 %v2105_v16, %v1099_v25  ;;  %v1109_v41 = vadd.f32 %v2107_v17, %v1100_v26  ;;  %v857_v33 = vmul.f32 %v853_v0, %v2163_v24  ;;  %v858_v34 = vmul.f32 %v2920_v4, %v2163_v24 }
  0xac   : > { %v537_v35 = vadd.f32 %v533_v31, %v517_v13  ;;  %v538_v37 = vadd.f32 %v534_v32, %v518_v27  ;;  %v554_v16 = vmul.f32 %v550_v23, %v2119_v46  ;;  %v573_v17 = vmul.f32 %v569_v18, %v2151_v12 }
  0xad   : > { %v861_v38 = vadd.f32 %v857_v33, %v851_v10  ;;  %v862_v44 = vadd.f32 %v858_v34, %v852_v11  ;;  %v2918_v20 = vperm.slane %v2125_v49, 3 }
  0xae   : > { %v557_v45 = vadd.f32 %v553_v36, %v537_v35  ;;  %v558_v51 = vadd.f32 %v554_v16, %v538_v37 }
  0xaf   : > { %v871_v53 = vadd.f32 %v867_v39, %v861_v38  ;;  %v872_v19 = vadd.f32 %v868_v63, %v862_v44  ;;  %v878_v31 = vmul.f32 %v2918_v20, %v2151_v12 }
  0xb0   : > { %v577_v55 = vadd.f32 %v573_v17, %v557_v45  ;;  %v578_v62 = vadd.f32 %v574_v43, %v558_v51  ;;  %v2217_v25 = vpop.permute.xlu1 %521 }
  0xb1   : > { %v2211_v9 = vpop.permute.xlu0 %505  ;;  %v881_v10 = vadd.f32 %v877_v54, %v871_v53  ;;  %v882_v35 = vadd.f32 %v878_v31, %v872_v19  ;;  %v2229_v45 = vmul.f32 %v529_v14, %v2217_v25  ;;  %v2244_v63 = vmul.f32 %v530_v22, %v2217_v25 }
  0xb2   : > { %v591_v13 = vadd.f32 %v2209_v8, %v577_v55  ;;  %v592_v11 = vadd.f32 %v2209_v8, %v578_v62  ;;  %v2241_v62 = vmul.f32 %v513_v61, %v2211_v9  ;;  %v2259_v61 = vmul.f32 %v514_v1, %v2211_v9 }
  0xb3   : > { %v885_v21 = vadd.f32 %v881_v10, %v2209_v8  ;;  %v886_v53 = vadd.f32 %v882_v35, %v2209_v8  ;;  %v2264_v22 = vmul.f32 %v847_v57, %v2211_v9 }
  0xb4   : > { %v599_v26 = vmul.f32 0.70710677, %v591_v13  ;;  %v2219_v27 = vmul.f32 0.70710677, %v592_v11 }
  0xb5   : > { %v2224_v32 = vmul.f32 0.70710677, %v885_v21  ;;  %v2275_v35 = vmul.f32 0.5, %v885_v21 }
  0xb6   : > { %v611_v33 = vand.u32 2147483647, %v599_v26  ;;  %v612_v34 = vand.u32 2147483647, %v2219_v27  ;;  %vm603_vm0 = vcmp.lt.f32.partialorder %v599_v26, 0.0  ;;  %v2273_v26 = vmul.f32 0.5, %v592_v11 }
  0xb7   : > { %v905_v36 = vand.u32 2147483647, %v2224_v32  ;;  %vm604_vm12 = vcmp.lt.f32.partialorder %v2219_v27, 0.0  ;;  %v2931_v27 = vperm.slane %v2122_v48, 2 }
  0xb8   : > { %v615_v37 = vmul.f32 0.3275911, %v611_v33  ;;  %v616_v16 = vmul.f32 0.3275911, %v612_v34  ;;  %v719_v38 = vmul.f32 %v611_v33, %v611_v33  ;;  %v720_v55 = vmul.f32 %v612_v34, %v612_v34  ;;  %v2252_v31 = vpop.permute.xlu1 %541 }
  0xb9   : > { %v1113_v17 = vpop.permute.xlu0 %1112  ;;  %v909_v39 = vmul.f32 0.3275911, %v905_v36  ;;  %v2254_v33 = vmul.f32 0.70710677, %v886_v53 }
  0xba   : > { %v1115_v51 = vmul.f32 %v1113_v17, %v2089_v59  ;;  %v1116_v43 = vmul.f32 %v1113_v17, %v2091_v60  ;;  %v2233_v44 = vadd.f32 1.0, %v615_v37  ;;  %v2236_v54 = vadd.f32 1.0, %v616_v16 }
  0xbb   : > { %v2247_v59 = vmul.f32 %v905_v36, %v905_v36  ;;  %v723_v60 = vsub.f32 0.0, %v719_v38  ;;  %v2250_v19 = vadd.f32 1.0, %v909_v39  ;;  %v724_v34 = vsub.f32 0.0, %v720_v55 }
  0xbc   : > { %v1117_v14 = vadd.f32 %v1115_v51, %v1108_v40  ;;  %v1118_v10 = vadd.f32 %v1116_v43, %v1109_v41  ;;  %1821 = vrcp.f32 %v2233_v44  ;;  %v2269_v40 = vmul.f32 %v853_v0, %v2217_v25 }
  0xbd   : > { %1823 = vrcp.f32 %v2236_v54  ;;  %v2271_v41 = vmul.f32 0.5, %v591_v13  ;;  %v2924_v36 = vmov 1.0   ;;  %v660_v37 = vand.u32 2147483647, %v2233_v44 }
  0xbe   : > { %v2278_v1 = vsel %vm603_vm0, -1.0, %v2924_v36  ;;  %v1017_v57 = vsub.f32 0.0, %v2247_v59  ;;  %v2282_v16 = vmul.f32 0.5, %v886_v53  ;;  %vm656_vm1 = vweird.f32 %v2233_v44 }
  0xbf   : > { %v662_v0 = vand.u32 2147483648, %v2233_v44  ;;  %v729_v13 = vmul.f32 1.442695, %v723_v60  ;;  %1825 = vrcp.f32 %v2250_v19  ;;  %vm671_vm2 = vweird.f32 %v2236_v54 }
  0xc0   : > { %v906_v39 = vand.u32 2147483647, %v2254_v33  ;;  %v675_v53 = vand.u32 2147483647, %v2236_v54  ;;  %v677_v55 = vand.u32 2147483648, %v2236_v54  ;;  %vm2294_vm3 = vcmp.eq.f32.partialorder %v660_v37, 8.507059e+37 }
  0xc1   : > { %v1122_v17 = vpop.permute.xlu0 %1121  ;;  %v731_v20 = vmul.f32 1.442695, %v724_v34  ;;  %1827 = vpow2.f32 %v729_v13  ;;  %vm950_vm4 = vweird.f32 %v2250_v19  ;;  %v2310_v13 = vpop.permute.xlu1 %561 }
  0xc2   : > { %v1822_v11 = vpop.eup %1821  ;;  %v1124_v21 = vmul.f32 %v1122_v17, %v2097_v5  ;;  %v1125_v38 = vmul.f32 %v1122_v17, %v2099_v6  ;;  %v663_v17 = vor.u32 1.1754944e-38, %v662_v0  ;;  %v910_v58 = vmul.f32 0.3275911, %v906_v39 }
  0xc3   : > { %v1824_v51 = vpop.eup %1823  ;;  %v652_v43 = vmul.f32 %v1822_v11, %v2233_v44  ;;  %vm657_vm5 = vweird.f32 %v1822_v11  ;;  %vm2313_vm7 = vcmp.eq.f32.partialorder %v675_v53, 8.507059e+37  ;;  %v571_v44 = vmul.f32 %v569_v18, %v2310_v13 }
  0xc4   : > { %v1126_v60 = vadd.f32 %v1124_v21, %v1117_v14  ;;  %v1127_v42 = vadd.f32 %v1125_v38, %v1118_v10  ;;  %v667_v5 = vmul.f32 %v1824_v51, %v2236_v54  ;;  %vm672_vm6 = vweird.f32 %v1824_v51  ;;  %vm658_vm8 = vmor %vm656_vm1, %vm657_vm5 }
  0xc5   : > { %v653_v6 = vsub.f32 1.0, %v652_v43  ;;  %v1826_v34 = vpop.eup %1825  ;;  %v2302_v10 = vadd.f32 1.0, %v910_v58  ;;  %v551_v58 = vmul.f32 %v549_v15, %v2252_v31  ;;  %vm673_vm9 = vmor %vm671_vm2, %vm672_vm6  ;;  %v535_v15 = vadd.f32 %v2229_v45, %v2241_v62 }
  0xc6   : > { %v1128_v3 = vmul.f32 %v1126_v60, %v2101_v7  ;;  %v1129_v2 = vmul.f32 %v1127_v42, %v2101_v7  ;;  %v668_v36 = vsub.f32 1.0, %v667_v5  ;;  %v946_v7 = vmul.f32 %v1826_v34, %v2250_v19 }
  0xc7   : > { %v654_v14 = vmul.f32 %v1822_v11, %v653_v6  ;;  %1829 = vrcp.f32 %v2302_v10  ;;  %v2325_v43 = vpop.eup %1827  ;;  %v678_v60 = vor.u32 1.1754944e-38, %v677_v55  ;;  %vm951_vm10 = vweird.f32 %v1826_v34 }
  0xc8   : > { %v2305_v37 = vadd.f32 %v1128_v3, %v2085_v47  ;;  %v2308_v0 = vadd.f32 %v1129_v2, %v2085_v47  ;;  %v669_v21 = vmul.f32 %v1824_v51, %v668_v36  ;;  %v947_v2 = vsub.f32 1.0, %v946_v7  ;;  %vm952_vm13 = vmor %vm950_vm4, %vm951_vm10 }
  0xc9   : > { %v655_v42 = vadd.f32 %v1822_v11, %v654_v14  ;;  %v954_v3 = vand.u32 2147483647, %v2250_v19  ;;  %v956_v36 = vand.u32 2147483648, %v2250_v19  ;;  %1831 = vpow2.f32 %v731_v20  ;;  %v2344_v45 = vpop.permute.xlu0 %581 }
  0xca   : > { %v670_v47 = vadd.f32 %v1824_v51, %v669_v21  ;;  %v948_v14 = vmul.f32 %v1826_v34, %v947_v2  ;;  %v555_v55 = vadd.f32 %v551_v58, %v535_v15  ;;  %v552_v20 = vmul.f32 %v550_v23, %v2252_v31 }
  0xcb   : > { %v659_v53 = vsel %vm658_vm8, %v1822_v11, %v655_v42  ;;  %vm955_vm11 = vcmp.eq.f32.partialorder %v954_v3, 8.507059e+37  ;;  %v957_v4 = vor.u32 1.1754944e-38, %v956_v36  ;;  %v536_v58 = vadd.f32 %v2244_v63, %v2259_v61 }
  0xcc   : > { %v2337_v5 = vsel %vm2294_vm3, %v663_v17, %v659_v53  ;;  %v674_v6 = vsel %vm673_vm9, %v1824_v51, %v670_v47  ;;  %v949_v18 = vadd.f32 %v1826_v34, %v948_v14  ;;  %v1014_v51 = vmul.f32 %v906_v39, %v906_v39 }
  0xcd   : > { %v683_v11 = vmul.f32 1.0614054, %v2337_v5  ;;  %v2342_v54 = vsel %vm2313_vm7, %v678_v60, %v674_v6  ;;  %v1830_v62 = vpop.eup %1829  ;;  %v575_v21 = vadd.f32 %v571_v44, %v555_v55  ;;  %v572_v39 = vmul.f32 %v570_v28, %v2310_v13 }
  0xce   : > { %v684_v50 = vmul.f32 1.0614054, %v2342_v54  ;;  %v953_v42 = vsel %vm952_vm13, %v1826_v34, %v949_v18  ;;  %v961_v38 = vmul.f32 %v1830_v62, %v2302_v10  ;;  %v969_v36 = vand.u32 2147483647, %v2302_v10 }
  0xcf   : > { %v687_v17 = vadd.f32 -1.4531521, %v683_v11  ;;  %v2357_v2 = vsel %vm955_vm11, %v957_v4, %v953_v42  ;;  %v2360_v19 = vadd.f32 %v2344_v45, %v575_v21  ;;  %v1832_v53 = vpop.eup %1831  ;;  %v971_v61 = vand.u32 2147483648, %v2302_v10 }
  0xd0   : > { %v688_v7 = vadd.f32 -1.4531521, %v684_v50  ;;  %v977_v34 = vmul.f32 1.0614054, %v2357_v2  ;;  %v962_v3 = vsub.f32 1.0, %v961_v38  ;;  %v556_v15 = vadd.f32 %v552_v20, %v536_v58 }
  0xd1   : > { %v691_v47 = vmul.f32 %v687_v17, %v2337_v5  ;;  %v2370_v60 = vmul.f32 0.70710677, %v2360_v19  ;;  %vm966_vm14 = vweird.f32 %v1830_v62  ;;  %v1018_v28 = vsub.f32 0.0, %v1014_v51 }
  0xd2   : > { %v692_v23 = vmul.f32 %v688_v7, %v2342_v54  ;;  %v981_v6 = vadd.f32 -1.4531521, %v977_v34  ;;  %v963_v14 = vmul.f32 %v1830_v62, %v962_v3  ;;  %v576_v55 = vadd.f32 %v572_v39, %v556_v15 }
  0xd3   : > { %v695_v63 = vadd.f32 1.4214138, %v691_v47  ;;  %v609_v11 = vand.u32 2147483647, %v2370_v60  ;;  %vm965_vm15 = vweird.f32 %v2302_v10  ;;  %v972_v21 = vor.u32 1.1754944e-38, %v971_v61 }
  0xd4   : > { %v696_v44 = vadd.f32 1.4214138, %v692_v23  ;;  %v985_v18 = vmul.f32 %v981_v6, %v2357_v2  ;;  %v964_v4 = vadd.f32 %v1830_v62, %v963_v14  ;;  %vm967_vm0 = vmor %vm965_vm15, %vm966_vm14  ;;  %v2378_v7 = vadd.f32 %v2344_v45, %v576_v55 }
  0xd5   : > { %v699_v52 = vmul.f32 %v695_v63, %v2337_v5  ;;  %v613_v20 = vmul.f32 0.3275911, %v609_v11  ;;  %vm970_vm1 = vcmp.eq.f32.partialorder %v969_v36, 8.507059e+37  ;;  %v1023_v47 = vmul.f32 1.442695, %v1017_v57 }
  0xd6   : > { %v700_v50 = vmul.f32 %v696_v44, %v2342_v54  ;;  %v989_v38 = vadd.f32 1.4214138, %v985_v18  ;;  %v968_v51 = vsel %vm967_vm0, %v1830_v62, %v964_v4  ;;  %v2930_v10 = vmov 1.0  }
  0xd7   : > { %v703_v17 = vadd.f32 -0.28449672, %v699_v52  ;;  %v2383_v39 = vsel %vm970_vm1, %v972_v21, %v968_v51  ;;  %v2385_v23 = vadd.f32 1.0, %v613_v20  ;;  %v608_v34 = vsel %vm604_vm12, -1.0, %v2930_v10 }
  0xd8   : > { %v704_v42 = vadd.f32 -0.28449672, %v700_v50  ;;  %v993_v63 = vmul.f32 %v989_v38, %v2357_v2  ;;  %v978_v62 = vmul.f32 1.0614054, %v2383_v39  ;;  %v1025_v61 = vmul.f32 1.442695, %v1018_v28 }
  0xd9   : > { %v707_v58 = vmul.f32 %v703_v17, %v2337_v5  ;;  %1833 = vrcp.f32 %v2385_v23  ;;  %v2395_v59 = vmul.f32 0.70710677, %v2378_v7  ;;  %v865_v6 = vmul.f32 %v2931_v27, %v2252_v31 }
  0xda   : > { %v708_v3 = vmul.f32 %v704_v42, %v2342_v54  ;;  %v997_v15 = vadd.f32 -0.28449672, %v993_v63  ;;  %v982_v44 = vadd.f32 -1.4531521, %v978_v62  ;;  %vm897_vm2 = vcmp.lt.f32.partialorder %v2224_v32, 0.0 }
  0xdb   : > { %v711_v36 = vadd.f32 0.2548296, %v707_v58  ;;  %1835 = vpow2.f32 %v1023_v47  ;;  %vm898_vm3 = vcmp.lt.f32.partialorder %v2254_v33, 0.0  ;;  %v859_v50 = vadd.f32 %v2269_v40, %v2264_v22 }
  0xdc   : > { %v712_v57 = vadd.f32 0.2548296, %v708_v3  ;;  %v1001_v28 = vmul.f32 %v997_v15, %v2357_v2  ;;  %v986_v55 = vmul.f32 %v982_v44, %v2383_v39  ;;  %1837 = vpow2.f32 %v1025_v61 }
  0xdd   : > { %v715_v14 = vmul.f32 %v711_v36, %v2337_v5  ;;  %v610_v4 = vand.u32 2147483647, %v2395_v59  ;;  %v2932_v5 = vperm.slane %v2122_v48, 3  ;;  %v630_v58 = vand.u32 2147483647, %v2385_v23 }
  0xde   : > { %v716_v52 = vmul.f32 %v712_v57, %v2342_v54  ;;  %v1005_v20 = vadd.f32 0.2548296, %v1001_v28  ;;  %v990_v42 = vadd.f32 1.4214138, %v986_v55  ;;  %v869_v54 = vadd.f32 %v865_v6, %v859_v50 }
  0xdf   : > { %v735_v18 = vmul.f32 %v2325_v43, %v715_v14  ;;  %v875_v17 = vmul.f32 %v2932_v5, %v2310_v13  ;;  %v1834_v38 = vpop.eup %1833  ;;  %v2414_v47 = vmul.f32 %v609_v11, %v609_v11  ;;  %v614_v22 = vmul.f32 0.3275911, %v610_v4 }
  0xe0   : > { %v736_v21 = vmul.f32 %v1832_v53, %v716_v52  ;;  %v1009_v43 = vmul.f32 %v1005_v20, %v2357_v2  ;;  %v994_v3 = vmul.f32 %v990_v42, %v2383_v39  ;;  %v622_v63 = vmul.f32 %v1834_v38, %v2385_v23 }
  0xe1   : > { %v739_v51 = vsub.f32 1.0, %v735_v18  ;;  %v1836_v48 = vpop.eup %1835  ;;  %v632_v62 = vand.u32 2147483648, %v2385_v23  ;;  %v2421_v36 = vadd.f32 1.0, %v614_v22  ;;  %v879_v61 = vadd.f32 %v875_v17, %v869_v54 }
  0xe2   : > { %v740_v40 = vsub.f32 1.0, %v736_v21  ;;  %v1029_v15 = vmul.f32 %v1836_v48, %v1009_v43  ;;  %v998_v11 = vadd.f32 -0.28449672, %v994_v3  ;;  %v623_v44 = vsub.f32 1.0, %v622_v63  ;;  %v1838_v27 = vpop.eup %1837 }
  0xe3   : > { %v743_v53 = vmul.f32 %v739_v51, %v2278_v1  ;;  %vm627_vm4 = vweird.f32 %v1834_v38  ;;  %1839 = vrcp.f32 %v2421_v36  ;;  %v2425_v2 = vadd.f32 %v879_v61, %v2344_v45 }
  0xe4   : > { %v744_v57 = vmul.f32 %v740_v40, %v608_v34  ;;  %v1033_v52 = vsub.f32 1.0, %v1029_v15  ;;  %v1002_v1 = vmul.f32 %v998_v11, %v2383_v39  ;;  %v624_v28 = vmul.f32 %v1834_v38, %v623_v44 }
  0xe5   : > { %v747_v6 = vadd.f32 1.0, %v743_v53  ;;  %v901_v34 = vsel %vm897_vm2, -1.0, %v2930_v10  ;;  %v902_v50 = vsel %vm898_vm3, -1.0, %v2930_v10  ;;  %vm626_vm5 = vweird.f32 %v2385_v23 }
  0xe6   : > { %v748_v14 = vadd.f32 1.0, %v744_v57  ;;  %v1037_v5 = vmul.f32 %v1033_v52, %v901_v34  ;;  %v1006_v17 = vadd.f32 0.2548296, %v1002_v1  ;;  %v625_v21 = vadd.f32 %v1834_v38, %v624_v28  ;;  %vm628_vm6 = vmor %vm626_vm5, %vm627_vm4 }
  0xe7   : > { %v751_v55 = vmul.f32 %v747_v6, %v2271_v41  ;;  %v2438_v20 = vmul.f32 0.5, %v2360_v19  ;;  %v633_v41 = vor.u32 1.1754944e-38, %v632_v62  ;;  %v721_v32 = vsub.f32 0.0, %v2414_v47 }
  0xe8   : > { %v752_v18 = vmul.f32 %v748_v14, %v2273_v26  ;;  %v2443_v42 = vmul.f32 0.70710677, %v2425_v2  ;;  %v1041_v33 = vadd.f32 1.0, %v1037_v5  ;;  %v1010_v23 = vmul.f32 %v1006_v17, %v2383_v39 }
  0xe9   : > { %776 = vmatpush.msra.mxu0 %v751_v55  ;;  %v629_v26 = vsel %vm628_vm6, %v1834_v38, %v625_v21  ;;  %vm631_vm7 = vcmp.eq.f32.partialorder %v630_v58, 8.507059e+37  ;;  %v1840_v54 = vpop.eup %1839  ;;  %v2933_v22 = vperm.slane %v2125_v49, 0  ;;  %v2934_v47 = vperm.slane %v2125_v49, 1 }
  0xea   : > { %796 = vmatpush.msra.mxu1 %v752_v18  ;;  %v2446_v51 = vsel %vm631_vm7, %v633_v41, %v629_v26  ;;  %v2449_v19 = vand.u32 2147483647, %v2443_v42  ;;  %v1045_v3 = vmul.f32 %v1041_v33, %v2275_v35  ;;  %v1030_v63 = vmul.f32 %v1838_v27, %v1010_v23 }
  0xeb   : > { %v850_v40 = vmul.f32 %v2933_v22, %v2211_v9  ;;  %v856_v43 = vmul.f32 %v2934_v47, %v2217_v25  ;;  %v681_v39 = vmul.f32 1.0614054, %v2446_v51  ;;  %v637_v38 = vmul.f32 %v1840_v54, %v2421_v36 }
  0xec   : > { %v645_v58 = vand.u32 2147483647, %v2421_v36  ;;  %v718_v48 = vmul.f32 %v610_v4, %v610_v4  ;;  %v907_v53 = vmul.f32 0.3275911, %v2449_v19  ;;  %v2935_v62 = vperm.slane %v2125_v49, 2  ;;  %1061 = vmatpush.msra.mxu2 %v1045_v3 }
  0xed   : > { %v1034_v57 = vsub.f32 1.0, %v1030_v63  ;;  %v685_v15 = vadd.f32 -1.4531521, %v681_v39  ;;  %v638_v11 = vsub.f32 1.0, %v637_v38  ;;  %v647_v35 = vand.u32 2147483648, %v2421_v36 }
  0xee   : > { %v866_v61 = vmul.f32 %v2935_v62, %v2252_v31  ;;  %vm642_vm8 = vweird.f32 %v1840_v54  ;;  %v2466_v44 = vadd.f32 1.0, %v907_v53  ;;  %v860_v27 = vadd.f32 %v856_v43, %v850_v40 }
  0xef   : > { %v2936_v6 = vperm.slane %v2125_v49, 3  ;;  %v1038_v14 = vmul.f32 %v1034_v57, %v902_v50  ;;  %v689_v52 = vmul.f32 %v685_v15, %v2446_v51  ;;  %v639_v1 = vmul.f32 %v1840_v54, %v638_v11 }
  0xf0   : > { %v1417_v28 = vperm.slane %v2172_v29, 0  ;;  %vm601_vm9 = vcmp.lt.f32.partialorder %v2370_v60, 0.0  ;;  %v725_v55 = vmul.f32 1.442695, %v721_v32  ;;  %1841 = vrcp.f32 %v2466_v44 }
  0xf1   : > { %v876_v4 = vmul.f32 %v2936_v6, %v2310_v13  ;;  %v870_v34 = vadd.f32 %v866_v61, %v860_v27  ;;  %v1042_v18 = vadd.f32 1.0, %v1038_v14  ;;  %v693_v5 = vadd.f32 1.4214138, %v689_v52 }
  0xf2   : > { %v640_v17 = vadd.f32 %v1840_v54, %v639_v1  ;;  %vm641_vm10 = vweird.f32 %v2421_v36  ;;  %vm646_vm12 = vcmp.eq.f32.partialorder %v645_v58, 8.507059e+37  ;;  %v648_v49 = vor.u32 1.1754944e-38, %v647_v35 }
  0xf3   : > { %vm643_vm11 = vmor %vm641_vm10, %vm642_vm8  ;;  %v722_v50 = vsub.f32 0.0, %v718_v48  ;;  %v880_v21 = vadd.f32 %v876_v4, %v870_v34  ;;  %v1046_v41 = vmul.f32 %v1042_v18, %v2282_v16  ;;  %v697_v33 = vmul.f32 %v693_v5, %v2446_v51 }
  0xf4   : > { %v644_v23 = vsel %vm643_vm11, %v1840_v54, %v640_v17  ;;  %v1421_v32 = vmul.f32 %v1417_v28, %v2087_v56  ;;  %v1423_v36 = vperm.slane %v2172_v29, 1  ;;  %v1433_v40 = vperm.slane %v2172_v29, 2 }
  0xf5   : > { %v2482_v26 = vsel %vm646_vm12, %v648_v49, %v644_v23  ;;  %v2485_v22 = vadd.f32 %v880_v21, %v2344_v45  ;;  %1081 = vmatpush.msra.mxu3 %v1046_v41  ;;  %v605_v16 = vsel %vm601_vm9, -1.0, %v2930_v10  ;;  %v701_v47 = vadd.f32 -0.28449672, %v697_v33 }
  0xf6   : > { %1843 = vpow2.f32 %v725_v55  ;;  %v682_v54 = vmul.f32 1.0614054, %v2482_v26  ;;  %v1842_v43 = vpop.eup %1841  ;;  %v727_v3 = vmul.f32 1.442695, %v722_v50  ;;  %v1427_v39 = vmul.f32 %v1423_v36, %v2163_v24 }
  0xf7   : > { %v2494_v63 = vmul.f32 0.70710677, %v2485_v22  ;;  %v1443_v38 = vperm.slane %v2172_v29, 3  ;;  %v705_v58 = vmul.f32 %v701_v47, %v2446_v51  ;;  %v916_v60 = vmul.f32 %v1842_v43, %v2466_v44 }
  0xf8   : > { %v686_v48 = vadd.f32 -1.4531521, %v682_v54  ;;  %v924_v53 = vand.u32 2147483647, %v2466_v44  ;;  %v926_v62 = vand.u32 2147483648, %v2466_v44  ;;  %v1431_v57 = vadd.f32 %v1427_v39, %v1421_v32 }
  0xf9   : > { %v904_v61 = vand.u32 2147483647, %v2494_v63  ;;  %v1437_v15 = vmul.f32 %v1433_v40, %v2119_v46  ;;  %v709_v11 = vadd.f32 0.2548296, %v705_v58  ;;  %v917_v27 = vsub.f32 1.0, %v916_v60 }
  0xfa   : > { %v690_v35 = vmul.f32 %v686_v48, %v2482_v26  ;;  %v1418_v6 = vperm.slane %v2175_v30, 0  ;;  %vm921_vm13 = vweird.f32 %v1842_v43  ;;  %v1447_v52 = vmul.f32 %v1443_v38, %v2151_v12 }
  0xfb   : > { %v908_v4 = vmul.f32 0.3275911, %v904_v61  ;;  %v1441_v14 = vadd.f32 %v1437_v15, %v1431_v57  ;;  %v713_v55 = vmul.f32 %v709_v11, %v2446_v51  ;;  %v918_v18 = vmul.f32 %v1842_v43, %v917_v27 }
  0xfc   : > { %v1844_v1 = vpop.eup %1843  ;;  %v694_v34 = vadd.f32 1.4214138, %v690_v35  ;;  %v1424_v5 = vperm.slane %v2175_v30, 1  ;;  %vm920_vm14 = vweird.f32 %v2466_v44  ;;  %v1011_v17 = vmul.f32 %v2449_v19, %v2449_v19 }
  0xfd   : > { %v2518_v49 = vadd.f32 1.0, %v908_v4  ;;  %v1451_v50 = vadd.f32 %v1447_v52, %v1441_v14  ;;  %v733_v21 = vmul.f32 %v1844_v1, %v713_v55  ;;  %v919_v33 = vadd.f32 %v1842_v43, %v918_v18  ;;  %vm922_vm15 = vmor %vm920_vm14, %vm921_vm13 }
  0xfe   : > { %v698_v41 = vmul.f32 %v694_v34, %v2482_v26  ;;  %v927_v23 = vor.u32 1.1754944e-38, %v926_v62  ;;  %v1422_v51 = vmul.f32 %v1418_v6, %v2087_v56  ;;  %v1428_v19 = vmul.f32 %v1424_v5, %v2163_v24 }
  0xff   : > { %1845 = vrcp.f32 %v2518_v49  ;;  %v1434_v44 = vperm.slane %v2175_v30, 2  ;;  %v737_v32 = vsub.f32 1.0, %v733_v21  ;;  %v923_v54 = vsel %vm922_vm15, %v1842_v43, %v919_v33 }
 0x100   : > { %v702_v47 = vadd.f32 -0.28449672, %v698_v41  ;;  %vm925_vm0 = vcmp.eq.f32.partialorder %v924_v53, 8.507059e+37  ;;  %vm602_vm1 = vcmp.lt.f32.partialorder %v2395_v59, 0.0  ;;  %1847 = vpow2.f32 %v727_v3 }
 0x101   : > { %v2531_v39 = vsel %vm925_vm0, %v927_v23, %v923_v54  ;;  %v2534_v58 = vadd.f32 %v1451_v50, %v2209_v8  ;;  %v741_v48 = vmul.f32 %v737_v32, %v605_v16  ;;  %v1015_v57 = vsub.f32 0.0, %v1011_v17 }
 0x102   : > { %v706_v60 = vmul.f32 %v702_v47, %v2482_v26  ;;  %v975_v62 = vmul.f32 1.0614054, %v2531_v39  ;;  %v1012_v15 = vmul.f32 %v904_v61, %v904_v61  ;;  %v1432_v43 = vadd.f32 %v1428_v19, %v1422_v51 }
 0x103   : > { %v2539_v11 = vmul.f32 0.70710677, %v2534_v58  ;;  %v1438_v3 = vmul.f32 %v1434_v44, %v2119_v46  ;;  %v745_v53 = vadd.f32 1.0, %v741_v48  ;;  %v1444_v4 = vperm.slane %v2175_v30, 3 }
 0x104   : > { %v710_v35 = vadd.f32 0.2548296, %v706_v60  ;;  %v979_v27 = vadd.f32 -1.4531521, %v975_v62  ;;  %v594_v14 = vmul.f32 0.5, %v2378_v7  ;;  %v606_v50 = vsel %vm602_vm1, -1.0, %v2930_v10 }
 0x105   : > { %v1846_v16 = vpop.eup %1845  ;;  %v2547_v52 = vand.u32 2147483647, %v2539_v11  ;;  %v1442_v61 = vadd.f32 %v1438_v3, %v1432_v43  ;;  %v749_v1 = vmul.f32 %v745_v53, %v2438_v20  ;;  %v1019_v21 = vmul.f32 1.442695, %v1015_v57  ;;  %v2576_v3 = vld [vmem:[%s2913_s5] sm:$0x3] }
 0x106   : > { %v714_v55 = vmul.f32 %v710_v35, %v2482_v26  ;;  %v983_v34 = vmul.f32 %v979_v27, %v2531_v39  ;;  %v931_v18 = vmul.f32 %v1846_v16, %v2518_v49  ;;  %v1848_v17 = vpop.eup %1847  ;;  %v1016_v41 = vsub.f32 0.0, %v1012_v15 }
 0x107   : > { %v1479_v7 = vmul.f32 0.3275911, %v2547_v52  ;;  %777 = vmatpush.msra.mxu0 %v749_v1  ;;  %v1448_v20 = vmul.f32 %v1444_v4, %v2151_v12  ;;  %vm936_vm2 = vweird.f32 %v1846_v16  ;;  %v939_v26 = vand.u32 2147483647, %v2518_v49 }
 0x108   : > { %v734_v33 = vmul.f32 %v1848_v17, %v714_v55  ;;  %v987_v23 = vadd.f32 1.4214138, %v983_v34  ;;  %v932_v51 = vsub.f32 1.0, %v931_v18  ;;  %v941_v19 = vand.u32 2147483648, %v2518_v49 }
 0x109   : > { %v2562_v32 = vadd.f32 1.0, %v1479_v7  ;;  %v1452_v48 = vadd.f32 %v1448_v20, %v1442_v61  ;;  %vm935_vm3 = vweird.f32 %v2518_v49  ;;  %v1419_v60 = vmul.f32 %v1417_v28, %v2211_v9 }
 0x10a   : > { %v738_v59 = vsub.f32 1.0, %v734_v33  ;;  %v991_v47 = vmul.f32 %v987_v23, %v2531_v39  ;;  %v933_v54 = vmul.f32 %v1846_v16, %v932_v51  ;;  %v1425_v62 = vmul.f32 %v1423_v36, %v2217_v25  ;;  %vm937_vm5 = vmor %vm935_vm3, %vm936_vm2 }
 0x10b   : > { %1849 = vrcp.f32 %v2562_v32  ;;  %vm758_vm4 = vcmask 130048   ;;  %v942_v49 = vor.u32 1.1754944e-38, %v941_v19  ;;  %v2582_v28 = vadd.f32 %v1452_v48, %v2209_v8 }
 0x10c   : > { %v742_v57 = vmul.f32 %v738_v59, %v606_v50  ;;  %v995_v15 = vadd.f32 -0.28449672, %v991_v47  ;;  %v934_v43 = vadd.f32 %v1846_v16, %v933_v54  ;;  %1851 = vpow2.f32 %v1019_v21  ;;  %1776 = vmatmul.msk.f32.vlgmr.msra.gmra.mxu0 %vm758_vm4, %v2576_v3 }
 0x10d   : > { %v1435_v36 = vmul.f32 %v1433_v40, %v2252_v31  ;;  %vm940_vm6 = vcmp.eq.f32.partialorder %v939_v26, 8.507059e+37  ;;  %v2591_v1 = vmul.f32 0.70710677, %v2582_v28  ;;  %v1429_v55 = vadd.f32 %v1425_v62, %v1419_v60 }
 0x10e   : > { %v746_v53 = vadd.f32 1.0, %v742_v57  ;;  %v999_v35 = vmul.f32 %v995_v15, %v2531_v39  ;;  %v938_v27 = vsel %vm937_vm5, %v1846_v16, %v934_v43  ;;  %v1021_v50 = vmul.f32 1.442695, %v1016_v41 }
 0x10f   : > { %v2588_v61 = vsel %vm940_vm6, %v942_v49, %v938_v27  ;;  %v2595_v7 = vand.u32 2147483647, %v2591_v1  ;;  %v1439_v40 = vadd.f32 %v1435_v36, %v1429_v55  ;;  %v1445_v16 = vmul.f32 %v1443_v38, %v2310_v13 }
 0x110   : > { %v750_v34 = vmul.f32 %v746_v53, %v594_v14  ;;  %v1003_v18 = vadd.f32 0.2548296, %v999_v35  ;;  %v976_v17 = vmul.f32 1.0614054, %v2588_v61  ;;  %v887_v20 = vmul.f32 0.5, %v2425_v2 }
 0x111   : > { %v1850_v21 = vpop.eup %1849  ;;  %vm895_vm7 = vcmp.lt.f32.partialorder %v2443_v42, 0.0  ;;  %v1480_v41 = vmul.f32 0.3275911, %v2595_v7  ;;  %v1449_v26 = vadd.f32 %v1445_v16, %v1439_v40  ;;  %1853 = vpow2.f32 %v1021_v50 }
 0x112   : > { %797 = vmatpush.msra.mxu1 %v750_v34  ;;  %v1007_v33 = vmul.f32 %v1003_v18, %v2531_v39  ;;  %v980_v23 = vadd.f32 -1.4531521, %v976_v17  ;;  %v1516_v51 = vmul.f32 %v1850_v21, %v2562_v32  ;;  %v1852_v14 = vpop.eup %1851  ;;  %v1524_v39 = vand.u32 2147483647, %v2562_v32 }
 0x113   : > { %1777 = vmatmul.msk.f32.vlgmr.msra.gmra.mxu1 %vm758_vm4, %v2576_v3  ;;  %v1526_v59 = vand.u32 2147483648, %v2562_v32  ;;  %v2610_v47 = vadd.f32 1.0, %v1480_v41  ;;  %v2613_v2 = vadd.f32 %v1449_v26, %v2344_v45  ;;  %vm1521_vm8 = vweird.f32 %v1850_v21 }
 0x114   : > { %v1027_v19 = vmul.f32 %v1852_v14, %v1007_v33  ;;  %v984_v29 = vmul.f32 %v980_v23, %v2588_v61  ;;  %v1517_v38 = vsub.f32 1.0, %v1516_v51  ;;  %v899_v62 = vsel %vm895_vm7, -1.0, %v2930_v10 }
 0x115   : > { %vm896_vm9 = vcmp.lt.f32.partialorder %v2494_v63, 0.0  ;;  %v1583_v57 = vmul.f32 %v2547_v52, %v2547_v52  ;;  %1855 = vrcp.f32 %v2610_v47  ;;  %vm1520_vm10 = vweird.f32 %v2562_v32 }
 0x116   : > { %v1031_v54 = vsub.f32 1.0, %v1027_v19  ;;  %v988_v48 = vadd.f32 1.4214138, %v984_v29  ;;  %v1518_v60 = vmul.f32 %v1850_v21, %v1517_v38  ;;  %vm1522_vm11 = vmor %vm1520_vm10, %vm1521_vm8  ;;  %v1527_v36 = vor.u32 1.1754944e-38, %v1526_v59 }
 0x117   : > { %v2625_v53 = vmul.f32 0.70710677, %v2613_v2  ;;  %v1420_v42 = vmul.f32 %v1418_v6, %v2211_v9  ;;  %v1426_v52 = vmul.f32 %v1424_v5, %v2217_v25  ;;  %v1854_v35 = vpop.eup %1853  ;;  %vm1525_vm12 = vcmp.eq.f32.partialorder %v1524_v39, 8.507059e+37 }
 0x118   : > { %v1035_v15 = vmul.f32 %v1031_v54, %v899_v62  ;;  %v992_v43 = vmul.f32 %v988_v48, %v2588_v61  ;;  %v1519_v49 = vadd.f32 %v1850_v21, %v1518_v60  ;;  %v1587_v32 = vsub.f32 0.0, %v1583_v57 }
 0x119   : > { %v2636_v17 = vand.u32 2147483647, %v2625_v53  ;;  %v1436_v50 = vmul.f32 %v1434_v44, %v2252_v31  ;;  %v888_v40 = vmul.f32 0.5, %v2485_v22  ;;  %v1430_v51 = vadd.f32 %v1426_v52, %v1420_v42 }
 0x11a   : > { %v1039_v27 = vadd.f32 1.0, %v1035_v15  ;;  %v996_v55 = vadd.f32 -0.28449672, %v992_v43  ;;  %v1523_v34 = vsel %vm1522_vm11, %v1850_v21, %v1519_v49  ;;  %v900_v21 = vsel %vm896_vm9, -1.0, %v2930_v10 }
 0x11b   : > { %v2633_v18 = vsel %vm1525_vm12, %v1527_v36, %v1523_v34  ;;  %v1856_v33 = vpop.eup %1855  ;;  %v1477_v23 = vmul.f32 0.3275911, %v2636_v17  ;;  %v1446_v14 = vmul.f32 %v1444_v4, %v2310_v13  ;;  %v2652_v22 = vmul.f32 0.5, %v2534_v58 }
 0x11c   : > { %v1043_v6 = vmul.f32 %v1039_v27, %v887_v20  ;;  %v1000_v5 = vmul.f32 %v996_v55, %v2588_v61  ;;  %v1547_v16 = vmul.f32 1.0614054, %v2633_v18  ;;  %v1531_v41 = vmul.f32 %v1856_v33, %v2610_v47 }
 0x11d   : > { %v1593_v63 = vmul.f32 1.442695, %v1587_v32  ;;  %v2657_v26 = vadd.f32 1.0, %v1477_v23  ;;  %v1440_v19 = vadd.f32 %v1436_v50, %v1430_v51  ;;  %v1132_v29 = vperm.slane %v2305_v37, 0 }
 0x11e   : > { %1062 = vmatpush.msra.mxu2 %v1043_v6  ;;  %v1004_v44 = vadd.f32 0.2548296, %v1000_v5  ;;  %v1551_v20 = vadd.f32 -1.4531521, %v1547_v16  ;;  %v1532_v38 = vsub.f32 1.0, %v1531_v41  ;;  %v1138_v58 = vperm.slane %v2305_v37, 1 }
 0x11f   : > { %1778 = vmatmul.msk.f32.vlgmr.msra.gmra.mxu2 %vm758_vm4, %v2576_v3  ;;  %v1539_v39 = vand.u32 2147483647, %v2610_v47  ;;  %v1541_v59 = vand.u32 2147483648, %v2610_v47  ;;  %1857 = vrcp.f32 %v2657_v26  ;;  %v1450_v54 = vadd.f32 %v1446_v14, %v1440_v19 }
 0x120   : > { %v1008_v30 = vmul.f32 %v1004_v44, %v2588_v61  ;;  %v1555_v4 = vmul.f32 %v1551_v20, %v2633_v18  ;;  %vm1467_vm13 = vcmp.lt.f32.partialorder %v2539_v11, 0.0  ;;  %v1533_v62 = vmul.f32 %v1856_v33, %v1532_v38 }
 0x121   : > { %vm1536_vm14 = vweird.f32 %v1856_v33  ;;  %v1584_v61 = vmul.f32 %v2595_v7, %v2595_v7  ;;  %v2670_v57 = vadd.f32 %v1450_v54, %v2344_v45  ;;  %v1136_v15 = vmul.f32 %v1132_v29, %v2087_v56 }
 0x122   : > { %v1028_v48 = vmul.f32 %v1854_v35, %v1008_v30  ;;  %v1559_v60 = vadd.f32 1.4214138, %v1555_v4  ;;  %v1142_v43 = vmul.f32 %v1138_v58, %v2163_v24  ;;  %v1534_v42 = vadd.f32 %v1856_v33, %v1533_v62 }
 0x123   : > { %vm1535_vm15 = vweird.f32 %v2610_v47  ;;  %1859 = vpow2.f32 %v1593_v63  ;;  %v1542_v7 = vor.u32 1.1754944e-38, %v1541_v59  ;;  %v2681_v52 = vmul.f32 0.70710677, %v2670_v57 }
 0x124   : > { %v1032_v49 = vsub.f32 1.0, %v1028_v48  ;;  %v1563_v36 = vmul.f32 %v1559_v60, %v2633_v18  ;;  %vm1537_vm0 = vmor %vm1535_vm15, %vm1536_vm14  ;;  %v1148_v35 = vperm.slane %v2305_v37, 2  ;;  %vm1540_vm1 = vcmp.eq.f32.partialorder %v1539_v39, 8.507059e+37 }
 0x125   : > { %v1538_v34 = vsel %vm1537_vm0, %v1856_v33, %v1534_v42  ;;  %v1858_v32 = vpop.eup %1857  ;;  %v1588_v6 = vsub.f32 0.0, %v1584_v61  ;;  %v2687_v5 = vand.u32 2147483647, %v2681_v52  ;;  %v1146_v47 = vadd.f32 %v1142_v43, %v1136_v15 }
 0x126   : > { %v1036_v27 = vmul.f32 %v1032_v49, %v900_v21  ;;  %v1567_v55 = vadd.f32 -0.28449672, %v1563_v36  ;;  %v2684_v50 = vsel %vm1540_vm1, %v1542_v7, %v1538_v34  ;;  %v1486_v14 = vmul.f32 %v1858_v32, %v2657_v26 }
 0x127   : > { %v1548_v51 = vmul.f32 1.0614054, %v2684_v50  ;;  %v1494_v21 = vand.u32 2147483647, %v2657_v26  ;;  %v1478_v33 = vmul.f32 0.3275911, %v2687_v5  ;;  %v1152_v44 = vmul.f32 %v1148_v35, %v2119_v46 }
 0x128   : > { %v1040_v16 = vadd.f32 1.0, %v1036_v27  ;;  %v1571_v23 = vmul.f32 %v1567_v55, %v2633_v18  ;;  %v1158_v20 = vperm.slane %v2305_v37, 3  ;;  %v1487_v30 = vsub.f32 1.0, %v1486_v14 }
 0x129   : > { %v1552_v19 = vadd.f32 -1.4531521, %v1548_v51  ;;  %v1860_v4 = vpop.eup %1859  ;;  %vm1491_vm2 = vweird.f32 %v1858_v32  ;;  %v1496_v38 = vand.u32 2147483648, %v2657_v26  ;;  %v2699_v39 = vadd.f32 1.0, %v1478_v33 }
 0x12a   : > { %v1044_v41 = vmul.f32 %v1040_v16, %v888_v40  ;;  %v1575_v63 = vadd.f32 0.2548296, %v1571_v23  ;;  %v1156_v59 = vadd.f32 %v1152_v44, %v1146_v47  ;;  %v1488_v60 = vmul.f32 %v1858_v32, %v1487_v30 }
 0x12b   : > { %v1556_v48 = vmul.f32 %v1552_v19, %v2684_v50  ;;  %v1133_v62 = vperm.slane %v2308_v0, 0  ;;  %v1471_v40 = vsel %vm1467_vm13, -1.0, %v2930_v10  ;;  %v1595_v61 = vmul.f32 1.442695, %v1588_v6 }
 0x12c   : > { %1082 = vmatpush.msra.mxu3 %v1044_v41  ;;  %v1579_v54 = vmul.f32 %v1575_v63, %v2633_v18  ;;  %1861 = vrcp.f32 %v2699_v39  ;;  %v1162_v15 = vmul.f32 %v1158_v20, %v2151_v12  ;;  %v1489_v49 = vadd.f32 %v1858_v32, %v1488_v60 }
 0x12d   : > { %1779 = vmatmul.msk.f32.vlgmr.msra.gmra.mxu3 %vm758_vm4, %v2576_v3  ;;  %v1560_v43 = vadd.f32 1.4214138, %v1556_v48  ;;  %vm1490_vm3 = vweird.f32 %v2657_v26  ;;  %vm1495_vm6 = vcmp.eq.f32.partialorder %v1494_v21, 8.507059e+37  ;;  %v1497_v36 = vor.u32 1.1754944e-38, %v1496_v38 }
 0x12e   : > { %v1599_v18 = vmul.f32 %v1860_v4, %v1579_v54  ;;  %vm1492_vm5 = vmor %vm1490_vm3, %vm1491_vm2  ;;  %v1581_v11 = vmul.f32 %v2636_v17, %v2636_v17  ;;  %v1166_v42 = vadd.f32 %v1162_v15, %v1156_v59  ;;  %v1137_v34 = vmul.f32 %v1133_v62, %v2087_v56 }
 0x12f   : > { %v1564_v27 = vmul.f32 %v1560_v43, %v2684_v50  ;;  %v1493_v55 = vsel %vm1492_vm5, %v1858_v32, %v1489_v49  ;;  %v1139_v47 = vperm.slane %v2308_v0, 1  ;;  %v1149_v16 = vperm.slane %v2308_v0, 2 }
 0x130   : > { %v1603_v7 = vsub.f32 1.0, %v1599_v18  ;;  %v2721_v6 = vsel %vm1495_vm6, %v1497_v36, %v1493_v55  ;;  %v2724_v26 = vadd.f32 %v1166_v42, %v2209_v8  ;;  %vm1468_vm7 = vcmp.lt.f32.partialorder %v2591_v1, 0.0 }
 0x131   : > { %v1568_v17 = vadd.f32 -0.28449672, %v1564_v27  ;;  %1863 = vpow2.f32 %v1595_v61  ;;  %v1545_v32 = vmul.f32 1.0614054, %v2721_v6  ;;  %v1585_v14 = vsub.f32 0.0, %v1581_v11 }
 0x132   : > { %v1607_v23 = vmul.f32 %v1603_v7, %v1471_v40  ;;  %v1862_v51 = vpop.eup %1861  ;;  %v2731_v56 = vmul.f32 0.70710677, %v2724_v26  ;;  %v1143_v21 = vmul.f32 %v1139_v47, %v2163_v24  ;;  %v1159_v33 = vperm.slane %v2308_v0, 3 }
 0x133   : > { %v1572_v41 = vmul.f32 %v1568_v17, %v2684_v50  ;;  %v1549_v63 = vadd.f32 -1.4531521, %v1545_v32  ;;  %v1501_v19 = vmul.f32 %v1862_v51, %v2699_v39  ;;  %v1509_v30 = vand.u32 2147483647, %v2699_v39 }
 0x134   : > { %v1611_v44 = vadd.f32 1.0, %v1607_v23  ;;  %v2741_v4 = vand.u32 2147483647, %v2731_v56  ;;  %v1147_v38 = vadd.f32 %v1143_v21, %v1137_v34  ;;  %v1153_v59 = vmul.f32 %v1149_v16, %v2119_v46 }
 0x135   : > { %v1576_v54 = vadd.f32 0.2548296, %v1572_v41  ;;  %v1553_v48 = vmul.f32 %v1549_v63, %v2721_v6  ;;  %v1502_v60 = vsub.f32 1.0, %v1501_v19  ;;  %vm1506_vm8 = vweird.f32 %v1862_v51 }
 0x136   : > { %v1615_v24 = vmul.f32 %v1611_v44, %v2652_v22  ;;  %v1511_v40 = vand.u32 2147483648, %v2699_v39  ;;  %v1194_v61 = vmul.f32 0.3275911, %v2741_v4  ;;  %v1157_v15 = vadd.f32 %v1153_v59, %v1147_v38 }
 0x137   : > { %v1864_v18 = vpop.eup %1863  ;;  %v1580_v43 = vmul.f32 %v1576_v54, %v2684_v50  ;;  %v1557_v49 = vadd.f32 1.4214138, %v1553_v48  ;;  %v1503_v36 = vmul.f32 %v1862_v51, %v1502_v60  ;;  %v1163_v46 = vmul.f32 %v1159_v33, %v2151_v12 }
 0x138   : > { %1631 = vmatpush.msrb.mxu2 %v1615_v24  ;;  %v1589_v22 = vmul.f32 1.442695, %v1585_v14  ;;  %vm1505_vm9 = vweird.f32 %v2699_v39  ;;  %v1582_v11 = vmul.f32 %v2687_v5, %v2687_v5  ;;  %v2757_v42 = vadd.f32 1.0, %v1194_v61 }
 0x139   : > { %v1600_v7 = vmul.f32 %v1864_v18, %v1580_v43  ;;  %v1561_v27 = vmul.f32 %v1557_v49, %v2721_v6  ;;  %v1504_v55 = vadd.f32 %v1862_v51, %v1503_v36  ;;  %v1167_v34 = vadd.f32 %v1163_v46, %v1157_v15  ;;  %vm1507_vm10 = vmor %vm1505_vm9, %vm1506_vm8 }
 0x13a   : > { %v1512_v50 = vor.u32 1.1754944e-38, %v1511_v40  ;;  %1865 = vrcp.f32 %v2757_v42  ;;  %v1134_v12 = vmul.f32 %v1132_v29, %v2211_v9  ;;  %v1140_v5 = vmul.f32 %v1138_v58, %v2217_v25 }
 0x13b   : > { %v1604_v39 = vsub.f32 1.0, %v1600_v7  ;;  %v1565_v23 = vadd.f32 -0.28449672, %v1561_v27  ;;  %v1508_v17 = vsel %vm1507_vm10, %v1862_v51, %v1504_v55  ;;  %vm1510_vm11 = vcmp.eq.f32.partialorder %v1509_v30, 8.507059e+37 }
 0x13c   : > { %v1472_v32 = vsel %vm1468_vm7, -1.0, %v2930_v10  ;;  %1867 = vpow2.f32 %v1589_v22  ;;  %v2771_v14 = vsel %vm1510_vm11, %v1512_v50, %v1508_v17  ;;  %v2774_v21 = vadd.f32 %v1167_v34, %v2209_v8 }
 0x13d   : > { %v1608_v44 = vmul.f32 %v1604_v39, %v1472_v32  ;;  %v1569_v29 = vmul.f32 %v1565_v23, %v2721_v6  ;;  %v1546_v41 = vmul.f32 1.0614054, %v2771_v14  ;;  %v1586_v58 = vsub.f32 0.0, %v1582_v11 }
 0x13e   : > { %v2779_v63 = vmul.f32 0.70710677, %v2774_v21  ;;  %v1144_v51 = vadd.f32 %v1140_v5, %v1134_v12  ;;  %v1150_v1 = vmul.f32 %v1148_v35, %v2252_v31  ;;  %v1460_v19 = vmul.f32 0.5, %v2582_v28 }
 0x13f   : > { %v1612_v30 = vadd.f32 1.0, %v1608_v44  ;;  %v1573_v38 = vadd.f32 0.2548296, %v1569_v29  ;;  %v1550_v8 = vadd.f32 -1.4531521, %v1546_v41  ;;  %v1160_v48 = vmul.f32 %v1158_v20, %v2310_v13 }
 0x140   : > { %v1866_v59 = vpop.eup %1865  ;;  %v2786_v24 = vand.u32 2147483647, %v2779_v63  ;;  %v1154_v54 = vadd.f32 %v1150_v1, %v1144_v51  ;;  %v1457_v15 = vmul.f32 0.5, %v2613_v2  ;;  %vm1465_vm12 = vcmp.lt.f32.partialorder %v2625_v53, 0.0 }
 0x141   : > { %v1616_v60 = vmul.f32 %v1612_v30, %v1460_v19  ;;  %v1577_v40 = vmul.f32 %v1573_v38, %v2721_v6  ;;  %v1554_v61 = vmul.f32 %v1550_v8, %v2771_v14  ;;  %v1231_v35 = vmul.f32 %v1866_v59, %v2757_v42 }
 0x142   : > { %v1868_v28 = vpop.eup %1867  ;;  %v1591_v18 = vmul.f32 1.442695, %v1586_v58  ;;  %v1195_v43 = vmul.f32 0.3275911, %v2786_v24  ;;  %v1164_v20 = vadd.f32 %v1160_v48, %v1154_v54  ;;  %vm1236_vm13 = vweird.f32 %v1866_v59 }
 0x143   : > { %1651 = vmatpush.msrb.mxu3 %v1616_v60  ;;  %v1597_v49 = vmul.f32 %v1868_v28, %v1577_v40  ;;  %v1558_v36 = vadd.f32 1.4214138, %v1554_v61  ;;  %v1232_v37 = vsub.f32 1.0, %v1231_v35  ;;  %v1239_v6 = vand.u32 2147483647, %v2757_v42 }
 0x144   : > { %v1241_v46 = vand.u32 2147483648, %v2757_v42  ;;  %v2799_v22 = vadd.f32 1.0, %v1195_v43  ;;  %v2803_v27 = vadd.f32 %v1164_v20, %v2344_v45  ;;  %v1469_v55 = vsel %vm1465_vm12, -1.0, %v2930_v10 }
 0x145   : > { %v1601_v11 = vsub.f32 1.0, %v1597_v49  ;;  %v1562_v2 = vmul.f32 %v1558_v36, %v2771_v14  ;;  %v1233_v7 = vmul.f32 %v1866_v59, %v1232_v37  ;;  %v1135_v34 = vmul.f32 %v1133_v62, %v2211_v9 }
 0x146   : > { %1869 = vrcp.f32 %v2799_v22  ;;  %v1141_v50 = vmul.f32 %v1139_v47, %v2217_v25  ;;  %vm1235_vm14 = vweird.f32 %v2757_v42  ;;  %v1242_v53 = vor.u32 1.1754944e-38, %v1241_v46 }
 0x147   : > { %v1605_v12 = vmul.f32 %v1601_v11, %v1469_v55  ;;  %v1566_v5 = vadd.f32 -0.28449672, %v1562_v2  ;;  %v1234_v39 = vadd.f32 %v1866_v59, %v1233_v7  ;;  %1871 = vpow2.f32 %v1591_v18  ;;  %vm1237_vm15 = vmor %vm1235_vm14, %vm1236_vm13 }
 0x148   : > { %v1298_v23 = vmul.f32 %v2741_v4, %v2741_v4  ;;  %v2820_v17 = vmul.f32 0.70710677, %v2803_v27  ;;  %vm1240_vm0 = vcmp.eq.f32.partialorder %v1239_v6, 8.507059e+37  ;;  %v1145_v42 = vadd.f32 %v1141_v50, %v1135_v34 }
 0x149   : > { %v1609_v9 = vadd.f32 1.0, %v1605_v12  ;;  %v1570_v62 = vmul.f32 %v1566_v5, %v2771_v14  ;;  %v1238_v32 = vsel %vm1237_vm15, %v1866_v59, %v1234_v39  ;;  %v1151_v44 = vmul.f32 %v1149_v16, %v2252_v31 }
 0x14a   : > { %v2823_v25 = vsel %vm1240_vm0, %v1242_v53, %v1238_v32  ;;  %v2826_v47 = vand.u32 2147483647, %v2820_v17  ;;  %v1161_v19 = vmul.f32 %v1159_v33, %v2310_v13  ;;  %v1302_v31 = vsub.f32 0.0, %v1298_v23 }
 0x14b   : > { %v1613_v29 = vmul.f32 %v1609_v9, %v1457_v15  ;;  %v1574_v4 = vadd.f32 0.2548296, %v1570_v62  ;;  %v1262_v41 = vmul.f32 1.0614054, %v2823_v25  ;;  %v1155_v1 = vadd.f32 %v1151_v44, %v1145_v42 }
 0x14c   : > { %v1870_v58 = vpop.eup %1869  ;;  %v1192_v51 = vmul.f32 0.3275911, %v2826_v47  ;;  %vm1466_vm1 = vcmp.lt.f32.partialorder %v2681_v52, 0.0  ;;  %v1254_v33 = vand.u32 2147483647, %v2799_v22  ;;  %vm1250_vm3 = vweird.f32 %v2799_v22 }
 0x14d   : > { %1632 = vmatpush.msrb.mxu2 %v1613_v29  ;;  %v1578_v30 = vmul.f32 %v1574_v4, %v2771_v14  ;;  %v1266_v38 = vadd.f32 -1.4531521, %v1262_v41  ;;  %v1246_v8 = vmul.f32 %v1870_v58, %v2799_v22  ;;  %v1872_v59 = vpop.eup %1871  ;;  %v1165_v54 = vadd.f32 %v1161_v19, %v1155_v1 }
 0x14e   : > { %1784 = vmatmul.msk.f32.vlgmr.msrb.gmra.mxu2 %vm758_vm4, %v2576_v3  ;;  %v2840_v16 = vadd.f32 1.0, %v1192_v51  ;;  %v1256_v14 = vand.u32 2147483648, %v2799_v22  ;;  %vm1251_vm2 = vweird.f32 %v1870_v58  ;;  %v1470_v35 = vsel %vm1466_vm1, -1.0, %v2930_v10 }
 0x14f   : > { %v1598_v48 = vmul.f32 %v1872_v59, %v1578_v30  ;;  %v1270_v0 = vmul.f32 %v1266_v38, %v2823_v25  ;;  %v1247_v13 = vsub.f32 1.0, %v1246_v8  ;;  %v1308_v28 = vmul.f32 1.442695, %v1302_v31  ;;  %vm1252_vm5 = vmor %vm1250_vm3, %vm1251_vm2 }
 0x150   : > { %1873 = vrcp.f32 %v2840_v16  ;;  %v2849_v15 = vadd.f32 %v1165_v54, %v2344_v45  ;;  %v1458_v49 = vmul.f32 0.5, %v2670_v57  ;;  %v1257_v36 = vor.u32 1.1754944e-38, %v1256_v14 }
 0x151   : > { %v1602_v60 = vsub.f32 1.0, %v1598_v48  ;;  %v1274_v40 = vadd.f32 1.4214138, %v1270_v0  ;;  %v1248_v61 = vmul.f32 %v1870_v58, %v1247_v13  ;;  %vm1255_vm6 = vcmp.eq.f32.partialorder %v1254_v33, 8.507059e+37 }
 0x152   : > { %v2855_v37 = vmul.f32 0.70710677, %v2849_v15  ;;  %1875 = vpow2.f32 %v1308_v28  ;;  %v1299_v2 = vmul.f32 %v2786_v24, %v2786_v24  ;;  %v1209_v24 = vand.u32 2147483647, %v2840_v16 }
 0x153   : > { %v1606_v52 = vmul.f32 %v1602_v60, %v1470_v35  ;;  %v1278_v18 = vmul.f32 %v1274_v40, %v2823_v25  ;;  %v1249_v43 = vadd.f32 %v1870_v58, %v1248_v61  ;;  %v1211_v23 = vand.u32 2147483648, %v2840_v16 }
 0x154   : > { %v2860_v7 = vand.u32 2147483647, %v2855_v37  ;;  %v1303_v53 = vsub.f32 0.0, %v1299_v2  ;;  %vm1182_vm8 = vcmp.lt.f32.partialorder %v2731_v56, 0.0  ;;  %vm1205_vm9 = vweird.f32 %v2840_v16 }
 0x155   : > { %v1610_v20 = vadd.f32 1.0, %v1606_v52  ;;  %v1282_v6 = vadd.f32 -0.28449672, %v1278_v18  ;;  %v1253_v46 = vsel %vm1252_vm5, %v1870_v58, %v1249_v43  ;;  %v1212_v51 = vor.u32 1.1754944e-38, %v1211_v23 }
 0x156   : > { %v1874_v11 = vpop.eup %1873  ;;  %v1258_v45 = vsel %vm1255_vm6, %v1257_v36, %v1253_v46  ;;  %v1193_v50 = vmul.f32 0.3275911, %v2860_v7  ;;  %v1310_v58 = vmul.f32 1.442695, %v1303_v53  ;;  %vm1210_vm11 = vcmp.eq.f32.partialorder %v1209_v24, 8.507059e+37 }
 0x157   : > { %v1614_v22 = vmul.f32 %v1610_v20, %v1458_v49  ;;  %v1286_v57 = vmul.f32 %v1282_v6, %v2823_v25  ;;  %v1263_v55 = vmul.f32 1.0614054, %v1258_v45  ;;  %v1201_v34 = vmul.f32 %v1874_v11, %v2840_v16 }
 0x158   : > { %v1197_v9 = vadd.f32 1.0, %v1193_v50  ;;  %vm1206_vm7 = vweird.f32 %v1874_v11  ;;  %v1876_v44 = vpop.eup %1875  ;;  %v1296_v8 = vmul.f32 %v2826_v47, %v2826_v47  ;;  %v1174_v48 = vmul.f32 0.5, %v2724_v26 }
 0x159   : > { %1652 = vmatpush.msrb.mxu3 %v1614_v22  ;;  %v1290_v12 = vadd.f32 0.2548296, %v1286_v57  ;;  %v1267_v5 = vadd.f32 -1.4531521, %v1263_v55  ;;  %v1202_v39 = vsub.f32 1.0, %v1201_v34  ;;  %vm1207_vm10 = vmor %vm1205_vm9, %vm1206_vm7  ;;  %vm1183_vm13 = vcmp.lt.f32.partialorder %v2779_v63, 0.0 }
 0x15a   : > { %1785 = vmatmul.msk.f32.vlgmr.msrb.gmra.mxu3 %vm758_vm4, %v2576_v3  ;;  %1877 = vrcp.f32 %v1197_v9  ;;  %v1300_v14 = vsub.f32 0.0, %v1296_v8  ;;  %v1224_v28 = vand.u32 2147483647, %v1197_v9  ;;  %v1226_v52 = vand.u32 2147483648, %v1197_v9 }
 0x15b   : > { %v1294_v62 = vmul.f32 %v1290_v12, %v2823_v25  ;;  %v1271_v32 = vmul.f32 %v1267_v5, %v1258_v45  ;;  %v1203_v42 = vmul.f32 %v1874_v11, %v1202_v39  ;;  %v1186_v25 = vsel %vm1182_vm8, -1.0, %v2930_v10 }
 0x15c   : > { %1879 = vpow2.f32 %v1310_v58  ;;  %v1304_v26 = vmul.f32 1.442695, %v1300_v14  ;;  %vm1220_vm14 = vweird.f32 %v1197_v9  ;;  %v1227_v46 = vor.u32 1.1754944e-38, %v1226_v52 }
 0x15d   : > { %v1314_v29 = vmul.f32 %v1876_v44, %v1294_v62  ;;  %v1275_v4 = vadd.f32 1.4214138, %v1271_v32  ;;  %v1204_v41 = vadd.f32 %v1874_v11, %v1203_v42  ;;  %vm1225_vm0 = vcmp.eq.f32.partialorder %v1224_v28, 8.507059e+37 }
 0x15e   : > { %v1187_v57 = vsel %vm1183_vm13, -1.0, %v2930_v10  ;;  %1881 = vpow2.f32 %v1304_v26  ;;  %v1297_v55 = vmul.f32 %v2860_v7, %v2860_v7  ;;  %v1175_v12 = vmul.f32 0.5, %v2774_v21 }
 0x15f   : > { %v1318_v1 = vsub.f32 1.0, %v1314_v29  ;;  %v1279_v19 = vmul.f32 %v1275_v4, %v1258_v45  ;;  %v1208_v30 = vsel %vm1207_vm10, %v1874_v11, %v1204_v41  ;;  %vm1180_vm1 = vcmp.lt.f32.partialorder %v2820_v17, 0.0 }
 0x160   : > { %v1213_v38 = vsel %vm1210_vm11, %v1212_v51, %v1208_v30  ;;  %v1878_v54 = vpop.eup %1877  ;;  %v1301_v24 = vsub.f32 0.0, %v1297_v55  ;;  %v1184_v41 = vsel %vm1180_vm1, -1.0, %v2930_v10  ;;  %v1172_v51 = vmul.f32 0.5, %v2803_v27 }
 0x161   : > { %v1322_v56 = vmul.f32 %v1318_v1, %v1186_v25  ;;  %v1283_v59 = vadd.f32 -0.28449672, %v1279_v19  ;;  %v1260_v31 = vmul.f32 1.0614054, %v1213_v38  ;;  %v1216_v33 = vmul.f32 %v1878_v54, %v1197_v9 }
 0x162   : > { %vm1221_vm12 = vweird.f32 %v1878_v54  ;;  %v1880_v49 = vpop.eup %1879  ;;  %v1306_v29 = vmul.f32 1.442695, %v1301_v24  ;;  %vm1181_vm2 = vcmp.lt.f32.partialorder %v2855_v37, 0.0  ;;  %v1173_v27 = vmul.f32 0.5, %v2849_v15 }
 0x163   : > { %v1326_v16 = vadd.f32 1.0, %v1322_v56  ;;  %v1287_v0 = vmul.f32 %v1283_v59, %v1258_v45  ;;  %v1264_v13 = vadd.f32 -1.4531521, %v1260_v31  ;;  %v1217_v35 = vsub.f32 1.0, %v1216_v33  ;;  %vm1222_vm15 = vmor %vm1220_vm14, %vm1221_vm12 }
 0x164   : > { %v1882_v32 = vpop.eup %1881  ;;  %1883 = vpow2.f32 %v1306_v29  ;;  %v1185_v59 = vsel %vm1181_vm2, -1.0, %v2930_v10  ;;  %vm805_vm3 = vcmask 1041408  }
 0x165   : > { %v1330_v60 = vmul.f32 %v1326_v16, %v1174_v48  ;;  %v1291_v40 = vadd.f32 0.2548296, %v1287_v0  ;;  %v1268_v61 = vmul.f32 %v1264_v13, %v1213_v38  ;;  %v1218_v43 = vmul.f32 %v1878_v54, %v1217_v35  ;;  %v756_v16 = vpop.permute.xlu1 %755 }
 0x167   : > { %1346 = vmatpush.msrb.mxu0 %v1330_v60  ;;  %v1295_v47 = vmul.f32 %v1291_v40, %v1258_v45  ;;  %v1272_v18 = vadd.f32 1.4214138, %v1268_v61  ;;  %v1219_v6 = vadd.f32 %v1878_v54, %v1218_v43 }
 0x169   : > { %v1315_v36 = vmul.f32 %v1880_v49, %v1295_v47  ;;  %v1276_v20 = vmul.f32 %v1272_v18, %v1213_v38  ;;  %v1223_v22 = vsel %vm1222_vm15, %v1878_v54, %v1219_v6 }
 0x16a   : > { %v1228_v45 = vsel %vm1225_vm0, %v1227_v46, %v1223_v22  ;;  %v1884_v17 = vpop.eup %1883 }
 0x16b   : > { %v1319_v11 = vsub.f32 1.0, %v1315_v36  ;;  %v1280_v2 = vadd.f32 -0.28449672, %v1276_v20  ;;  %v1261_v50 = vmul.f32 1.0614054, %v1228_v45 }
 0x16d   : > { %v1323_v34 = vmul.f32 %v1319_v11, %v1187_v57  ;;  %v1284_v63 = vmul.f32 %v1280_v2, %v1213_v38  ;;  %v1265_v53 = vadd.f32 -1.4531521, %v1261_v50 }
 0x16f   : > { %v1327_v5 = vadd.f32 1.0, %v1323_v34  ;;  %v1288_v39 = vadd.f32 0.2548296, %v1284_v63  ;;  %v1269_v62 = vmul.f32 %v1265_v53, %v1228_v45 }
 0x171   : > { %v1331_v23 = vmul.f32 %v1327_v5, %v1175_v12  ;;  %v1292_v9 = vmul.f32 %v1288_v39, %v1213_v38  ;;  %v1273_v44 = vadd.f32 1.4214138, %v1269_v62 }
 0x173   : > { %1366 = vmatpush.msrb.mxu1 %v1331_v23  ;;  %v1312_v42 = vmul.f32 %v1882_v32, %v1292_v9  ;;  %v1277_v4 = vmul.f32 %v1273_v44, %v1228_v45 }
 0x175   : > { %v1316_v7 = vsub.f32 1.0, %v1312_v42  ;;  %v1281_v21 = vadd.f32 -0.28449672, %v1277_v4 }
 0x177   : > { %v1320_v58 = vmul.f32 %v1316_v7, %v1184_v41  ;;  %v1285_v19 = vmul.f32 %v1281_v21, %v1228_v45 }
 0x179   : > { %v1324_v1 = vadd.f32 1.0, %v1320_v58  ;;  %v1289_v25 = vadd.f32 0.2548296, %v1285_v19 }
 0x17b   : > { %v1328_v30 = vmul.f32 %v1324_v1, %v1172_v51  ;;  %v1293_v38 = vmul.f32 %v1289_v25, %v1228_v45 }
 0x17d   : > { %1347 = vmatpush.msrb.mxu0 %v1328_v30  ;;  %v1313_v8 = vmul.f32 %v1884_v17, %v1293_v38 }
 0x17e   : > { %1781 = vmatmul.msk.f32.vlgmr.msrb.gmra.mxu0 %vm758_vm4, %v2576_v3 }
 0x17f   : > { %v1317_v56 = vsub.f32 1.0, %v1313_v8 }
 0x181   : > { %v1321_v31 = vmul.f32 %v1317_v56, %v1185_v59 }
 0x183   : > { %v1325_v54 = vadd.f32 1.0, %v1321_v31 }
 0x185   : > { %v1329_v48 = vmul.f32 %v1325_v54, %v1173_v27 }
 0x187   : > { %1367 = vmatpush.msrb.mxu1 %v1329_v48 }
 0x188   : > { %1782 = vmatmul.msk.f32.vlgmr.msrb.gmra.mxu1 %vm758_vm4, %v2576_v3 }
 0x189   : > { %v779_v0 = vpop.f32.mrf.mxu0 }
 0x18a   : > { %v780_v37 = vadd.f32 %v779_v0, %v756_v16 }
 0x190   : > { %v799_v13 = vpop.f32.mrf.mxu1 }
 0x191   : > { %v800_v33 = vadd.f32 %v799_v13, %v756_v16 }
 0x193   : > { %v804_v10 = vrot.slane %v800_v33, 6 }
 0x195   : > { %v806_v15 = vsel %vm805_vm3, %v780_v37, %v804_v10 }
 0x196   : > { %808 = vst [vmem:[%s390_s12] sm:$0xf] %v806_v15 }
 0x1a2   : > { %v1064_v14 = vpop.f32.mrf.mxu2 }
 0x1a3   : > { %v1065_v61 = vadd.f32 %v1064_v14, %v756_v16 }
 0x1b0   : > { %v1084_v60 = vpop.f32.mrf.mxu3 }
 0x1b1   : > { %v1085_v40 = vadd.f32 %v1084_v60, %v756_v16 }
 0x1b3   : > { %v1089_v3 = vrot.slane %v1085_v40, 6 }
 0x1b5   : > { %v1090_v35 = vsel %vm805_vm3, %v1065_v61, %v1089_v3 }
 0x1b6   : > { %1780 = vst [vmem:[%s390_s12 + $0x4] sm:$0xf] %v1090_v35 }
 0x1d1   : > { %v1634_v28 = vpop.f32.mrf.mxu2 }
 0x1d2   : > { %v1635_v18 = vadd.f32 %v1634_v28, %v756_v16 }
 0x1dd   : > { %v1654_v52 = vpop.f32.mrf.mxu3 }
 0x1de   : > { %v1655_v47 = vadd.f32 %v1654_v52, %v756_v16 }
 0x1e0   : > { %v1659_v43 = vrot.slane %v1655_v47, 6 }
 0x1e2   : > { %v1660_v49 = vsel %vm805_vm3, %v1635_v18, %v1659_v43 }
 0x1e3   : > { %1786 = vst [vmem:[%s390_s12 + $0xc] sm:$0xf] %v1660_v49 }
 0x1fb   : > { %v1349_v26 = vpop.f32.mrf.mxu0 }
 0x1fc   : > { %v1350_v6 = vadd.f32 %v1349_v26, %v756_v16 }
 0x205   : > { %v1369_v36 = vpop.f32.mrf.mxu1 }
 0x206   : > { %v1370_v20 = vadd.f32 %v1369_v36, %v756_v16 }
 0x208   : > { %v1374_v46 = vrot.slane %v1370_v20, 6 }
 0x20a   : > { %v1375_v11 = vsel %vm805_vm3, %v1350_v6, %v1374_v46 }
 0x20b   : > { %1783 = vst [vmem:[%s390_s12 + $0x8] sm:$0xf] %v1375_v11 }
 0x20c PF: > { %s19_s10 = sadd.s32 1, %s1907_s10   ;;  %s2937_s29 = smov %s1903_s30 }
 0x20d   : > { %p16_p5 = scmp.ge.s32.totalorder %s19_s10, 4   ;;  %s2938_s30 = smov %s2940_s11 }
 0x20f   :  { %18 = sbr.rel (!%p16_p5) target bundleno = 2 (0x2), region = 94 }

</bundles_post_ra>
